<compile_context>
chip_gen: v6e
topology: v6e:2x2x1
jax: 0.10.0
libtpu: 0.0.40
codegen_flags: <defaults>
</compile_context>

<pallas_src>
import functools

import jax
import jax.numpy as jnp
import numpy as np
from jax.experimental import pallas as pl
from jax.experimental.pallas import tpu as pltpu

P = 128                 # padded lane width
DEFAULT_TB = 512        # batch tile (sublane dim)

X_DIM = 2
Z_DIM = 2
HIDDEN_DIM = 32

# lane offsets inside the packed 128-lane slabs
MU_X_OFF, LV_X_OFF, MU_Z_OFF, LV_Z_OFF = 0, 32, 64, 96

N_LAYERS = 8            # 3 enc MLP + 1 fused enc head + 3 dec MLP + 1 fused dec head
N_BIAS_ROWS = 8         # one bias row per layer (already a sublane multiple)


def _vae_kernel(in_ref, w_ref, b_ref, out_ref):
    xz = in_ref[...]            # (TB, 128): x @ lanes 0:2, eps @ lanes 96:98
    b = b_ref[...]              # (8, 128)

    def lin(v, j):
        return jnp.dot(v, w_ref[j], preferred_element_type=jnp.float32) + b[j:j + 1, :]

    # ---- Encoder MLP: Linear -> ReLU (x3), lanes 0:32 active ----
    h = jnp.maximum(lin(xz, 0), 0.0)
    h = jnp.maximum(lin(h, 1), 0.0)
    h = jnp.maximum(lin(h, 2), 0.0)

    # fused encoder heads: mu_z at lanes 64:66, logvar_z at lanes 96:98
    ml = lin(h, 3)

    # ---- Reparameterization (lane-aligned, no cross-lane shuffle) ----
    # eps lives at lanes 96:98 (same lanes as logvar_z).  dec_in carries mu_z at
    # lanes 64:66 and eps*std at lanes 96:98; the decoder's first weight has its
    # real rows duplicated at 64:66 and 96:98 so the matmul itself performs
    # z @ W = mu_z @ W + (eps*std) @ W.
    lane = jax.lax.broadcasted_iota(jnp.int32, (1, P), 1)
    is_lv = lane >= LV_Z_OFF
    lv_only = jnp.where(is_lv, ml, 0.0)                      # logvar_z stripe only
    dec_in = jnp.where(is_lv, xz * jnp.exp(0.5 * lv_only), ml)

    # ---- Decoder MLP: Linear -> ReLU (x3) ----
    g = jnp.maximum(lin(dec_in, 4), 0.0)
    g = jnp.maximum(lin(g, 5), 0.0)
    g = jnp.maximum(lin(g, 6), 0.0)

    # fused decoder heads: mu_x at lanes 0:2, logvar_x at lanes 32:34
    dec_out = lin(g, 7)

    # packed output: disjoint lane stripes, single lane-dense store
    out_ref[...] = dec_out + ml


def init_linear(key, in_dim, out_dim):
    """Deterministic init mimicking torch.nn.Linear default (U(-k, k), k=1/sqrt(fan_in))."""
    k = 1.0 / np.sqrt(in_dim)
    kw, kb = jax.random.split(key)
    w = jax.random.uniform(kw, (in_dim, out_dim), jnp.float32, -k, k)
    b = jax.random.uniform(kb, (out_dim,), jnp.float32, -k, k)
    return w, b


def init_vae_params(key, x_dim=X_DIM, z_dim=Z_DIM, hidden_dim=HIDDEN_DIM):
    keys = jax.random.split(key, 10)
    enc = [
        init_linear(keys[0], x_dim, hidden_dim),
        init_linear(keys[1], hidden_dim, hidden_dim),
        init_linear(keys[2], hidden_dim, hidden_dim),
        init_linear(keys[3], hidden_dim, z_dim),       # fc_mu
        init_linear(keys[4], hidden_dim, z_dim),       # fc_logvar
    ]
    dec = [
        init_linear(keys[5], z_dim, hidden_dim),
        init_linear(keys[6], hidden_dim, hidden_dim),
        init_linear(keys[7], hidden_dim, hidden_dim),
        init_linear(keys[8], hidden_dim, x_dim),       # fc_mu
        init_linear(keys[9], hidden_dim, x_dim),       # fc_logvar
    ]
    return enc, dec


def pack_vae_params(enc, dec, x_dim=X_DIM, z_dim=Z_DIM, hidden_dim=HIDDEN_DIM):
    """Pad & stack all layers into one (8,128,128) weight and one (8,128) bias array."""
    W = jnp.zeros((N_LAYERS, P, P), jnp.float32)
    Bv = jnp.zeros((N_BIAS_ROWS, P), jnp.float32)

    def put(W, Bv, j, w, b, row_off, col_off):
        W = W.at[j, row_off:row_off + w.shape[0], col_off:col_off + w.shape[1]].set(w)
        Bv = Bv.at[j, col_off:col_off + b.shape[0]].set(b)
        return W, Bv

    # encoder body
    W, Bv = put(W, Bv, 0, enc[0][0], enc[0][1], 0, 0)
    W, Bv = put(W, Bv, 1, enc[1][0], enc[1][1], 0, 0)
    W, Bv = put(W, Bv, 2, enc[2][0], enc[2][1], 0, 0)
    # fused encoder heads: fc_mu columns at MU_Z_OFF, fc_logvar columns at LV_Z_OFF
    W, Bv = put(W, Bv, 3, enc[3][0], enc[3][1], 0, MU_Z_OFF)
    W = W.at[3, :hidden_dim, LV_Z_OFF:LV_Z_OFF + z_dim].set(enc[4][0])
    Bv = Bv.at[3, LV_Z_OFF:LV_Z_OFF + z_dim].set(enc[4][1])
    # decoder body; layer 4's real rows are duplicated at MU_Z_OFF and LV_Z_OFF
    # so the matmul itself adds mu_z + eps*std = z.
    W, Bv = put(W, Bv, 4, dec[0][0], dec[0][1], MU_Z_OFF, 0)
    W = W.at[4, LV_Z_OFF:LV_Z_OFF + z_dim, :hidden_dim].set(dec[0][0])
    W, Bv = put(W, Bv, 5, dec[1][0], dec[1][1], 0, 0)
    W, Bv = put(W, Bv, 6, dec[2][0], dec[2][1], 0, 0)
    # fused decoder heads: fc_mu columns at MU_X_OFF, fc_logvar columns at LV_X_OFF
    W, Bv = put(W, Bv, 7, dec[3][0], dec[3][1], 0, MU_X_OFF)
    W = W.at[7, :hidden_dim, LV_X_OFF:LV_X_OFF + x_dim].set(dec[4][0])
    Bv = Bv.at[7, LV_X_OFF:LV_X_OFF + x_dim].set(dec[4][1])
    return W, Bv


def _round_up(n, m):
    return ((n + m - 1) // m) * m


@functools.partial(jax.jit, static_argnames=("x_dim", "z_dim", "tb"))
def vae_forward(x, eps, w_stack, b_stack, *, x_dim=X_DIM, z_dim=Z_DIM, tb=DEFAULT_TB):
    """x: (B, x_dim), eps: (B, z_dim) -> (mu_x, logvar_x, mu_z, logvar_z)."""
    B = x.shape[0]
    tb_eff = min(int(tb), _round_up(B, 8))
    Bp = _round_up(B, tb_eff)

    # Single packed input slab: x at lanes [0:x_dim), eps at lanes [96:96+z_dim).
    xin = jnp.zeros((Bp, P), jnp.float32)
    xin = xin.at[:B, :x_dim].set(x.astype(jnp.float32))
    xin = xin.at[:B, LV_Z_OFF:LV_Z_OFF + z_dim].set(eps.astype(jnp.float32))

    io_spec = pl.BlockSpec((tb_eff, P), lambda i: (i, 0))
    # grid-invariant parameter specs (constant index_map -> fetched once)
    w_spec = pl.BlockSpec((N_LAYERS, P, P), lambda i: (0, 0, 0))
    b_spec = pl.BlockSpec((N_BIAS_ROWS, P), lambda i: (0, 0))

    out = pl.pallas_call(
        _vae_kernel,
        out_shape=jax.ShapeDtypeStruct((Bp, P), jnp.float32),
        grid_spec=pltpu.PrefetchScalarGridSpec(
            num_scalar_prefetch=0,
            grid=(Bp // tb_eff,),
            in_specs=[io_spec, w_spec, b_spec],
            out_specs=io_spec,
        ),
        compiler_params=pltpu.CompilerParams(
            dimension_semantics=("parallel",)),
    )(xin, w_stack, b_stack)

    mu_x = out[:B, MU_X_OFF:MU_X_OFF + x_dim]
    logvar_x = out[:B, LV_X_OFF:LV_X_OFF + x_dim]
    mu_z = out[:B, MU_Z_OFF:MU_Z_OFF + z_dim]
    logvar_z = out[:B, LV_Z_OFF:LV_Z_OFF + z_dim]
    return mu_x, logvar_x, mu_z, logvar_z


def vae_forward_ref(x, eps, enc, dec):
    """Pure-JAX reference matching the PyTorch forward (with given eps)."""
    def mlp3(v, layers):
        for w, b in layers:
            v = jnp.maximum(v @ w + b, 0.0)
        return v

    h = mlp3(x, enc[:3])
    mu_z = h @ enc[3][0] + enc[3][1]
    logvar_z = h @ enc[4][0] + enc[4][1]
    z = mu_z + eps * jnp.exp(0.5 * logvar_z)
    g = mlp3(z, dec[:3])
    mu_x = g @ dec[3][0] + dec[3][1]
    logvar_x = g @ dec[4][0] + dec[4][1]
    return mu_x, logvar_x, mu_z, logvar_z


if __name__ == "__main__":
    key = jax.random.PRNGKey(0)
    k_params, k_x, k_eps = jax.random.split(key, 3)

    enc, dec = init_vae_params(k_params)
    w_stack, b_stack = pack_vae_params(enc, dec)

    # Batch chosen so the padded grid has >=2 steps (exercises tiling/padding and
    # lets the parallel batch axis shard across v7x's two TensorCores).
    B = 1000
    x = jax.random.normal(k_x, (B, X_DIM), jnp.float32)
    # eps ~ N(0, I): stands in for torch.randn_like(std) (deterministic here)
    eps = jax.random.normal(k_eps, (B, Z_DIM), jnp.float32)

    outs = vae_forward(x, eps, w_stack, b_stack)
    outs = jax.block_until_ready(outs)

    refs = vae_forward_ref(x, eps, enc, dec)
    for o, r in zip(outs, refs):
        np.testing.assert_allclose(np.asarray(o), np.asarray(r), rtol=1e-5, atol=1e-5)

    print("KERNEL_OK")
</pallas_src>

<mosaic_0001>
module attributes {stable_mosaic.version = 11 : i64} {
  func.func @_vae_kernel(%arg0: i32, %arg1: memref<512x128xf32, #tpu.memory_space<vmem>>, %arg2: memref<8x128x128xf32, #tpu.memory_space<vmem>>, %arg3: memref<8x128xf32, #tpu.memory_space<vmem>>, %arg4: memref<512x128xf32, #tpu.memory_space<vmem>>) attributes {dimension_semantics = [#tpu.dimension_semantics<parallel>], iteration_bounds = array<i64: 2>, scalar_prefetch = 0 : i64, scratch_operands = 0 : i64, tpu.core_type = #tpu.core_type<tc>, window_params = [{transform_indices = @transform_0, window_bounds = array<i64: 512, 128>}, {pipeline_mode = #tpu.pipeline_mode<synchronous>, transform_indices = @transform_1, window_bounds = array<i64: 8, 128, 128>}, {pipeline_mode = #tpu.pipeline_mode<synchronous>, transform_indices = @transform_2, window_bounds = array<i64: 8, 128>}, {transform_indices = @transform_3, window_bounds = array<i64: 512, 128>}]} {
    %c0 = arith.constant 0 : index
    %c0_0 = arith.constant 0 : index
    %0 = vector.load %arg1[%c0, %c0_0] : memref<512x128xf32, #tpu.memory_space<vmem>>, vector<512x128xf32>
    %c0_1 = arith.constant 0 : index
    %c0_2 = arith.constant 0 : index
    %1 = vector.load %arg3[%c0_1, %c0_2] : memref<8x128xf32, #tpu.memory_space<vmem>>, vector<8x128xf32>
    %c0_3 = arith.constant 0 : index
    %c0_4 = arith.constant 0 : index
    %c0_5 = arith.constant 0 : index
    %2 = vector.load %arg2[%c0_3, %c0_4, %c0_5] : memref<8x128x128xf32, #tpu.memory_space<vmem>>, vector<1x128x128xf32>
    %3 = vector.shape_cast %2 : vector<1x128x128xf32> to vector<128x128xf32>
    %cst = arith.constant dense<0.000000e+00> : vector<512x128xf32>
    %4 = tpu.matmul %0, %3, %cst {dimension_numbers = #tpu.dot_dimension_numbers<[1], [0], [0], [1], [0, 0, 1, 1], [], []>} : vector<512x128xf32>, vector<128x128xf32>, vector<512x128xf32> -> vector<512x128xf32>
    %5 = vector.extract_strided_slice %1 {offsets = [0, 0], sizes = [1, 128], strides = [1, 1]} : vector<8x128xf32> to vector<1x128xf32>
    %6 = vector.broadcast %5 : vector<1x128xf32> to vector<512x128xf32>
    %7 = arith.addf %4, %6 : vector<512x128xf32>
    %cst_6 = arith.constant 0.000000e+00 : f32
    %8 = vector.broadcast %cst_6 : f32 to vector<512x128xf32>
    %9 = arith.maximumf %7, %8 : vector<512x128xf32>
    %c1 = arith.constant 1 : index
    %c0_7 = arith.constant 0 : index
    %c0_8 = arith.constant 0 : index
    %10 = vector.load %arg2[%c1, %c0_7, %c0_8] : memref<8x128x128xf32, #tpu.memory_space<vmem>>, vector<1x128x128xf32>
    %11 = vector.shape_cast %10 : vector<1x128x128xf32> to vector<128x128xf32>
    %cst_9 = arith.constant dense<0.000000e+00> : vector<512x128xf32>
    %12 = tpu.matmul %9, %11, %cst_9 {dimension_numbers = #tpu.dot_dimension_numbers<[1], [0], [0], [1], [0, 0, 1, 1], [], []>} : vector<512x128xf32>, vector<128x128xf32>, vector<512x128xf32> -> vector<512x128xf32>
    %13 = vector.extract_strided_slice %1 {offsets = [1, 0], sizes = [1, 128], strides = [1, 1]} : vector<8x128xf32> to vector<1x128xf32>
    %14 = vector.broadcast %13 : vector<1x128xf32> to vector<512x128xf32>
    %15 = arith.addf %12, %14 : vector<512x128xf32>
    %cst_10 = arith.constant 0.000000e+00 : f32
    %16 = vector.broadcast %cst_10 : f32 to vector<512x128xf32>
    %17 = arith.maximumf %15, %16 : vector<512x128xf32>
    %c2 = arith.constant 2 : index
    %c0_11 = arith.constant 0 : index
    %c0_12 = arith.constant 0 : index
    %18 = vector.load %arg2[%c2, %c0_11, %c0_12] : memref<8x128x128xf32, #tpu.memory_space<vmem>>, vector<1x128x128xf32>
    %19 = vector.shape_cast %18 : vector<1x128x128xf32> to vector<128x128xf32>
    %cst_13 = arith.constant dense<0.000000e+00> : vector<512x128xf32>
    %20 = tpu.matmul %17, %19, %cst_13 {dimension_numbers = #tpu.dot_dimension_numbers<[1], [0], [0], [1], [0, 0, 1, 1], [], []>} : vector<512x128xf32>, vector<128x128xf32>, vector<512x128xf32> -> vector<512x128xf32>
    %21 = vector.extract_strided_slice %1 {offsets = [2, 0], sizes = [1, 128], strides = [1, 1]} : vector<8x128xf32> to vector<1x128xf32>
    %22 = vector.broadcast %21 : vector<1x128xf32> to vector<512x128xf32>
    %23 = arith.addf %20, %22 : vector<512x128xf32>
    %cst_14 = arith.constant 0.000000e+00 : f32
    %24 = vector.broadcast %cst_14 : f32 to vector<512x128xf32>
    %25 = arith.maximumf %23, %24 : vector<512x128xf32>
    %c3 = arith.constant 3 : index
    %c0_15 = arith.constant 0 : index
    %c0_16 = arith.constant 0 : index
    %26 = vector.load %arg2[%c3, %c0_15, %c0_16] : memref<8x128x128xf32, #tpu.memory_space<vmem>>, vector<1x128x128xf32>
    %27 = vector.shape_cast %26 : vector<1x128x128xf32> to vector<128x128xf32>
    %cst_17 = arith.constant dense<0.000000e+00> : vector<512x128xf32>
    %28 = tpu.matmul %25, %27, %cst_17 {dimension_numbers = #tpu.dot_dimension_numbers<[1], [0], [0], [1], [0, 0, 1, 1], [], []>} : vector<512x128xf32>, vector<128x128xf32>, vector<512x128xf32> -> vector<512x128xf32>
    %29 = vector.extract_strided_slice %1 {offsets = [3, 0], sizes = [1, 128], strides = [1, 1]} : vector<8x128xf32> to vector<1x128xf32>
    %30 = vector.broadcast %29 : vector<1x128xf32> to vector<512x128xf32>
    %31 = arith.addf %28, %30 : vector<512x128xf32>
    %32 = tpu.iota {dimensions = array<i32: 1>} : vector<1x128xi32>
    %c96_i32 = arith.constant 96 : i32
    %33 = vector.broadcast %c96_i32 : i32 to vector<1x128xi32>
    %34 = arith.cmpi sge, %32, %33 : vector<1x128xi32>
    %cst_18 = arith.constant 0.000000e+00 : f32
    %35 = vector.shape_cast %34 : vector<1x128xi1> to vector<1x128xi1>
    %36 = vector.broadcast %35 : vector<1x128xi1> to vector<512x128xi1>
    %37 = vector.broadcast %cst_18 : f32 to vector<512x128xf32>
    %38 = arith.select %36, %31, %37 : vector<512x128xi1>, vector<512x128xf32>
    %cst_19 = arith.constant 5.000000e-01 : f32
    %39 = vector.broadcast %cst_19 : f32 to vector<512x128xf32>
    %40 = arith.mulf %39, %38 : vector<512x128xf32>
    %41 = math.exp %40 : vector<512x128xf32>
    %42 = arith.mulf %0, %41 : vector<512x128xf32>
    %43 = vector.shape_cast %34 : vector<1x128xi1> to vector<1x128xi1>
    %44 = vector.broadcast %43 : vector<1x128xi1> to vector<512x128xi1>
    %45 = arith.select %44, %42, %31 : vector<512x128xi1>, vector<512x128xf32>
    %c4 = arith.constant 4 : index
    %c0_20 = arith.constant 0 : index
    %c0_21 = arith.constant 0 : index
    %46 = vector.load %arg2[%c4, %c0_20, %c0_21] : memref<8x128x128xf32, #tpu.memory_space<vmem>>, vector<1x128x128xf32>
    %47 = vector.shape_cast %46 : vector<1x128x128xf32> to vector<128x128xf32>
    %cst_22 = arith.constant dense<0.000000e+00> : vector<512x128xf32>
    %48 = tpu.matmul %45, %47, %cst_22 {dimension_numbers = #tpu.dot_dimension_numbers<[1], [0], [0], [1], [0, 0, 1, 1], [], []>} : vector<512x128xf32>, vector<128x128xf32>, vector<512x128xf32> -> vector<512x128xf32>
    %49 = vector.extract_strided_slice %1 {offsets = [4, 0], sizes = [1, 128], strides = [1, 1]} : vector<8x128xf32> to vector<1x128xf32>
    %50 = vector.broadcast %49 : vector<1x128xf32> to vector<512x128xf32>
    %51 = arith.addf %48, %50 : vector<512x128xf32>
    %cst_23 = arith.constant 0.000000e+00 : f32
    %52 = vector.broadcast %cst_23 : f32 to vector<512x128xf32>
    %53 = arith.maximumf %51, %52 : vector<512x128xf32>
    %c5 = arith.constant 5 : index
    %c0_24 = arith.constant 0 : index
    %c0_25 = arith.constant 0 : index
    %54 = vector.load %arg2[%c5, %c0_24, %c0_25] : memref<8x128x128xf32, #tpu.memory_space<vmem>>, vector<1x128x128xf32>
    %55 = vector.shape_cast %54 : vector<1x128x128xf32> to vector<128x128xf32>
    %cst_26 = arith.constant dense<0.000000e+00> : vector<512x128xf32>
    %56 = tpu.matmul %53, %55, %cst_26 {dimension_numbers = #tpu.dot_dimension_numbers<[1], [0], [0], [1], [0, 0, 1, 1], [], []>} : vector<512x128xf32>, vector<128x128xf32>, vector<512x128xf32> -> vector<512x128xf32>
    %57 = vector.extract_strided_slice %1 {offsets = [5, 0], sizes = [1, 128], strides = [1, 1]} : vector<8x128xf32> to vector<1x128xf32>
    %58 = vector.broadcast %57 : vector<1x128xf32> to vector<512x128xf32>
    %59 = arith.addf %56, %58 : vector<512x128xf32>
    %cst_27 = arith.constant 0.000000e+00 : f32
    %60 = vector.broadcast %cst_27 : f32 to vector<512x128xf32>
    %61 = arith.maximumf %59, %60 : vector<512x128xf32>
    %c6 = arith.constant 6 : index
    %c0_28 = arith.constant 0 : index
    %c0_29 = arith.constant 0 : index
    %62 = vector.load %arg2[%c6, %c0_28, %c0_29] : memref<8x128x128xf32, #tpu.memory_space<vmem>>, vector<1x128x128xf32>
    %63 = vector.shape_cast %62 : vector<1x128x128xf32> to vector<128x128xf32>
    %cst_30 = arith.constant dense<0.000000e+00> : vector<512x128xf32>
    %64 = tpu.matmul %61, %63, %cst_30 {dimension_numbers = #tpu.dot_dimension_numbers<[1], [0], [0], [1], [0, 0, 1, 1], [], []>} : vector<512x128xf32>, vector<128x128xf32>, vector<512x128xf32> -> vector<512x128xf32>
    %65 = vector.extract_strided_slice %1 {offsets = [6, 0], sizes = [1, 128], strides = [1, 1]} : vector<8x128xf32> to vector<1x128xf32>
    %66 = vector.broadcast %65 : vector<1x128xf32> to vector<512x128xf32>
    %67 = arith.addf %64, %66 : vector<512x128xf32>
    %cst_31 = arith.constant 0.000000e+00 : f32
    %68 = vector.broadcast %cst_31 : f32 to vector<512x128xf32>
    %69 = arith.maximumf %67, %68 : vector<512x128xf32>
    %c7 = arith.constant 7 : index
    %c0_32 = arith.constant 0 : index
    %c0_33 = arith.constant 0 : index
    %70 = vector.load %arg2[%c7, %c0_32, %c0_33] : memref<8x128x128xf32, #tpu.memory_space<vmem>>, vector<1x128x128xf32>
    %71 = vector.shape_cast %70 : vector<1x128x128xf32> to vector<128x128xf32>
    %cst_34 = arith.constant dense<0.000000e+00> : vector<512x128xf32>
    %72 = tpu.matmul %69, %71, %cst_34 {dimension_numbers = #tpu.dot_dimension_numbers<[1], [0], [0], [1], [0, 0, 1, 1], [], []>} : vector<512x128xf32>, vector<128x128xf32>, vector<512x128xf32> -> vector<512x128xf32>
    %73 = vector.extract_strided_slice %1 {offsets = [7, 0], sizes = [1, 128], strides = [1, 1]} : vector<8x128xf32> to vector<1x128xf32>
    %74 = vector.broadcast %73 : vector<1x128xf32> to vector<512x128xf32>
    %75 = arith.addf %72, %74 : vector<512x128xf32>
    %76 = arith.addf %75, %31 : vector<512x128xf32>
    %c0_35 = arith.constant 0 : index
    %c0_36 = arith.constant 0 : index
    %77 = vector.load %arg4[%c0_35, %c0_36] : memref<512x128xf32, #tpu.memory_space<vmem>>, vector<512x128xf32>
    tpu.vector_store %arg4[%c0_35, %c0_36], %76 {strides = array<i32>} : memref<512x128xf32, #tpu.memory_space<vmem>>, vector<512x128xf32>,
    return
  }
  func.func @transform_0(%arg0: i32) -> (i32, i32) {
    %c0_i32 = arith.constant 0 : i32
    %c0_i32_0 = arith.constant 0 : i32
    return %arg0, %c0_i32 : i32, i32
  }
  func.func @transform_1(%arg0: i32) -> (i32, i32, i32) {
    %c0_i32 = arith.constant 0 : i32
    %c0_i32_0 = arith.constant 0 : i32
    %c0_i32_1 = arith.constant 0 : i32
    %c0_i32_2 = arith.constant 0 : i32
    return %c0_i32, %c0_i32_0, %c0_i32_1 : i32, i32, i32
  }
  func.func @transform_2(%arg0: i32) -> (i32, i32) {
    %c0_i32 = arith.constant 0 : i32
    %c0_i32_0 = arith.constant 0 : i32
    %c0_i32_1 = arith.constant 0 : i32
    return %c0_i32, %c0_i32_0 : i32, i32
  }
  func.func @transform_3(%arg0: i32) -> (i32, i32) {
    %c0_i32 = arith.constant 0 : i32
    %c0_i32_0 = arith.constant 0 : i32
    return %arg0, %c0_i32 : i32, i32
  }
}

</mosaic_0001>

<bundles_post_ra>
// kernel: vae_forward.1
= control target key start
LH: loop header
LB: loop body
LE: loop exit
PB: predicated region body
PF: predicated region fallthrough
CT: control target
= control target key end

     0   :  { %s6461_s12 = smov 0   ;;  %s8212_s0 = inlined_call_operand.vmem [shape: f32[1024,128], index: 0, kind: input, shape index: {}]   ;;  %s8213_s1 = inlined_call_operand.vmem [shape: f32[8,128,128], index: 1, kind: input, shape index: {}]   ;;  %s8214_s2 = inlined_call_operand.vmem [shape: f32[8,128], index: 2, kind: input, shape index: {}]   ;;  %s8215_s3 = inlined_call_operand.vmem [shape: f32[1024,128], index: 3, kind: output, shape index: {}]  }
   0x1 LB: > { %s4443_s13 = sadd.s32 4294967295, %s6439_s12   ;;  %p4447_p0 = scmp.ge.s32.totalorder %s6439_s12, 1  ;;  %s6439_s12 = sphi %s6461_s12, %s13_s12  }
   0x2   : > { %p138_p1 = scmp.lt.s32.totalorder %s6439_s12, 3 }
   0x4   : > { %p139_p2 = pnand %p4447_p0, %p138_p1 }
   0x6   : > { %142 = sbr.rel (%p139_p2) target bundleno = 1788 (0x6fc), region = 32 }
   0xb   : > { %v254_v0 = vld [vmem:[%s8213_s1 + $0x78] sm:$0xff]  ;;  %v253_v1 = vld [vmem:[%s8213_s1 + $0x70] sm:$0xff]  ;;  %s4448_s18 = sshll.u32 %s4443_s13, 6  ;;  %v252_v2 = vld [vmem:[%s8213_s1 + $0x68] sm:$0xff] }
   0xc   : > { %5206 = vmatprep.subr.mxu0 %v254_v0  ;;  %p163_p3 = scmp.lt.s32.totalorder %s4448_s18, 127  ;;  %v251_v3 = vld [vmem:[%s8213_s1 + $0x60] sm:$0xff]  ;;  %v250_v4 = vld [vmem:[%s8213_s1 + $0x58] sm:$0xff]  ;;  %v249_v6 = vld [vmem:[%s8213_s1 + $0x50] sm:$0xff] }
   0xd   : > { %5207 = vmatpush3.msra.mxu0 %v254_v0  ;;  %v248_v7 = vld [vmem:[%s8213_s1 + $0x48] sm:$0xff]  ;;  %v247_v8 = vld [vmem:[%s8213_s1 + $0x40] sm:$0xff]  ;;  %v246_v9 = vld [vmem:[%s8213_s1 + $0x38] sm:$0xff] }
   0xe   : > { %5208 = vmatprep.subr.mxu0 %v253_v1  ;;  %s8274_s18 = smov (!%p163_p3, %s4448_s18), 127  ;;  %v245_v10 = vld [vmem:[%s8213_s1 + $0x30] sm:$0xff]  ;;  %v244_v11 = vld [vmem:[%s8213_s1 + $0x28] sm:$0xff]  ;;  %v243_v12 = vld [vmem:[%s8213_s1 + $0x20] sm:$0xff] }
   0xf   : > { %5209 = vmatpush3.msra.mxu0 %v253_v1  ;;  %s4449_s23 = sshll.u32 %s8274_s18, 3  ;;  %v242_v13 = vld [vmem:[%s8213_s1 + $0x18] sm:$0xff]  ;;  %v241_v14 = vld [vmem:[%s8213_s1 + $0x10] sm:$0xff]  ;;  %v240_v15 = vld [vmem:[%s8213_s1 + $0x8] sm:$0xff] }
  0x10   : > { %5210 = vmatprep.subr.mxu0 %v252_v2  ;;  %s6492_s28 = scalar_lea.vmem %s8212_s0, %s4449_s23  ;;  %v239_v16 = vld [vmem:[%s8213_s1] sm:$0xff]  ;;  %v4467_v17 = vld [vmem:[%s8213_s1 + $0xf8] sm:$0xff]  ;;  %v4466_v18 = vld [vmem:[%s8213_s1 + $0xf0] sm:$0xff]  ;;  %s8016_s29 = scalar_lea.vmem %s8215_s3, %s4449_s23 }
  0x11   : > { %5211 = vmatpush3.msra.mxu0 %v252_v2  ;;  %v174_v5 = vld [vmem:[%s6492_s28] sm:$0xff]  ;;  %v175_v19 = vld [vmem:[%s6492_s28 + $0x8] sm:$0xff]  ;;  %5334 = vmatprep.subr.mxu1 %v4467_v17  ;;  %v176_v20 = vld [vmem:[%s6492_s28 + $0x10] sm:$0xff] }
  0x12   : > { %5212 = vmatprep.subr.mxu0 %v251_v3  ;;  %5238 = vmatprep.mubr.f32.mxu0 %v174_v5  ;;  %v4465_v21 = vld [vmem:[%s8213_s1 + $0xe8] sm:$0xff]  ;;  %v4464_v22 = vld [vmem:[%s8213_s1 + $0xe0] sm:$0xff]  ;;  %v177_v23 = vld [vmem:[%s6492_s28 + $0x18] sm:$0xff] }
  0x13   : > { %5213 = vmatpush3.msra.mxu0 %v251_v3  ;;  %5335 = vmatpush3.msra.mxu1 %v4467_v17  ;;  %v178_v24 = vld [vmem:[%s6492_s28 + $0x20] sm:$0xff]  ;;  %v4463_v25 = vld [vmem:[%s8213_s1 + $0xd8] sm:$0xff]  ;;  %v4462_v26 = vld [vmem:[%s8213_s1 + $0xd0] sm:$0xff] }
  0x14   : > { %5214 = vmatprep.subr.mxu0 %v250_v4  ;;  %5336 = vmatprep.subr.mxu1 %v4466_v18  ;;  %v179_v27 = vld [vmem:[%s6492_s28 + $0x28] sm:$0xff]  ;;  %v180_v28 = vld [vmem:[%s6492_s28 + $0x30] sm:$0xff]  ;;  %v4460_v30 = vld [vmem:[%s8213_s1 + $0xc0] sm:$0xff] }
  0x15   : > { %5215 = vmatpush3.msra.mxu0 %v250_v4  ;;  %5337 = vmatpush3.msra.mxu1 %v4466_v18  ;;  %v4461_v29 = vld [vmem:[%s8213_s1 + $0xc8] sm:$0xff]  ;;  %v181_v31 = vld [vmem:[%s6492_s28 + $0x38] sm:$0xff]  ;;  %v182_v32 = vld [vmem:[%s6492_s28 + $0x40] sm:$0xff] }
  0x16   : > { %5216 = vmatprep.subr.mxu0 %v249_v6  ;;  %5338 = vmatprep.subr.mxu1 %v4465_v21  ;;  %v4459_v33 = vld [vmem:[%s8213_s1 + $0xb8] sm:$0xff]  ;;  %v4458_v34 = vld [vmem:[%s8213_s1 + $0xb0] sm:$0xff]  ;;  %v183_v35 = vld [vmem:[%s6492_s28 + $0x48] sm:$0xff] }
  0x17   : > { %5217 = vmatpush3.msra.mxu0 %v249_v6  ;;  %5339 = vmatpush3.msra.mxu1 %v4465_v21  ;;  %v184_v36 = vld [vmem:[%s6492_s28 + $0x50] sm:$0xff]  ;;  %v4457_v37 = vld [vmem:[%s8213_s1 + $0xa8] sm:$0xff]  ;;  %v4456_v38 = vld [vmem:[%s8213_s1 + $0xa0] sm:$0xff] }
  0x18   : > { %5218 = vmatprep.subr.mxu0 %v248_v7  ;;  %5340 = vmatprep.subr.mxu1 %v4464_v22  ;;  %v185_v39 = vld [vmem:[%s6492_s28 + $0x58] sm:$0xff]  ;;  %v186_v40 = vld [vmem:[%s6492_s28 + $0x60] sm:$0xff]  ;;  %v187_v41 = vld [vmem:[%s6492_s28 + $0x68] sm:$0xff] }
  0x19   : > { %5219 = vmatpush3.msra.mxu0 %v248_v7  ;;  %5341 = vmatpush3.msra.mxu1 %v4464_v22  ;;  %v188_v42 = vld [vmem:[%s6492_s28 + $0x70] sm:$0xff]  ;;  %v189_v43 = vld [vmem:[%s6492_s28 + $0x78] sm:$0xff]  ;;  %v190_v44 = vld [vmem:[%s6492_s28 + $0x80] sm:$0xff] }
  0x1a   : > { %5220 = vmatprep.subr.mxu0 %v247_v8  ;;  %5342 = vmatprep.subr.mxu1 %v4463_v25  ;;  %v191_v45 = vld [vmem:[%s6492_s28 + $0x88] sm:$0xff]  ;;  %v192_v46 = vld [vmem:[%s6492_s28 + $0x90] sm:$0xff]  ;;  %v193_v47 = vld [vmem:[%s6492_s28 + $0x98] sm:$0xff] }
  0x1b   : > { %5221 = vmatpush3.msra.mxu0 %v247_v8  ;;  %5343 = vmatpush3.msra.mxu1 %v4463_v25  ;;  %v194_v48 = vld [vmem:[%s6492_s28 + $0xa0] sm:$0xff]  ;;  %v195_v49 = vld [vmem:[%s6492_s28 + $0xa8] sm:$0xff]  ;;  %v196_v50 = vld [vmem:[%s6492_s28 + $0xb0] sm:$0xff] }
  0x1c   : > { %5222 = vmatprep.subr.mxu0 %v246_v9  ;;  %5344 = vmatprep.subr.mxu1 %v4462_v26  ;;  %v197_v51 = vld [vmem:[%s6492_s28 + $0xb8] sm:$0xff]  ;;  %v198_v52 = vld [vmem:[%s6492_s28 + $0xc0] sm:$0xff]  ;;  %v199_v53 = vld [vmem:[%s6492_s28 + $0xc8] sm:$0xff] }
  0x1d   : > { %5223 = vmatpush3.msra.mxu0 %v246_v9  ;;  %5345 = vmatpush3.msra.mxu1 %v4462_v26  ;;  %v200_v54 = vld [vmem:[%s6492_s28 + $0xd0] sm:$0xff]  ;;  %v201_v55 = vld [vmem:[%s6492_s28 + $0xd8] sm:$0xff]  ;;  %v202_v56 = vld [vmem:[%s6492_s28 + $0xe0] sm:$0xff] }
  0x1e   : > { %5224 = vmatprep.subr.mxu0 %v245_v10  ;;  %5346 = vmatprep.subr.mxu1 %v4461_v29  ;;  %v203_v57 = vld [vmem:[%s6492_s28 + $0xe8] sm:$0xff]  ;;  %v204_v58 = vld [vmem:[%s6492_s28 + $0xf0] sm:$0xff]  ;;  %v205_v59 = vld [vmem:[%s6492_s28 + $0xf8] sm:$0xff] }
  0x1f   : > { %5225 = vmatpush3.msra.mxu0 %v245_v10  ;;  %5347 = vmatpush3.msra.mxu1 %v4461_v29  ;;  %v206_v60 = vld [vmem:[%s6492_s28 + $0x100] sm:$0xff]  ;;  %v207_v61 = vld [vmem:[%s6492_s28 + $0x108] sm:$0xff]  ;;  %v208_v62 = vld [vmem:[%s6492_s28 + $0x110] sm:$0xff] }
  0x20   : > { %5226 = vmatprep.subr.mxu0 %v244_v11  ;;  %5348 = vmatprep.subr.mxu1 %v4460_v30  ;;  %v4455_v63 = vld [vmem:[%s8213_s1 + $0x98] sm:$0xff]  ;;  %v4454_v1 = vld [vmem:[%s8213_s1 + $0x90] sm:$0xff]  ;;  %v210_v2 = vld [vmem:[%s6492_s28 + $0x120] sm:$0xff] }
  0x21   : > { %5227 = vmatpush3.msra.mxu0 %v244_v11  ;;  %5349 = vmatpush3.msra.mxu1 %v4460_v30  ;;  %v209_v0 = vld [vmem:[%s6492_s28 + $0x118] sm:$0xff]  ;;  %v4453_v3 = vld [vmem:[%s8213_s1 + $0x88] sm:$0xff]  ;;  %v4452_v5 = vld [vmem:[%s8213_s1 + $0x80] sm:$0xff] }
  0x22   : > { %5228 = vmatprep.subr.mxu0 %v243_v12  ;;  %5350 = vmatprep.subr.mxu1 %v4459_v33  ;;  %v211_v4 = vld [vmem:[%s6492_s28 + $0x128] sm:$0xff]  ;;  %v212_v6 = vld [vmem:[%s6492_s28 + $0x130] sm:$0xff]  ;;  %v213_v7 = vld [vmem:[%s6492_s28 + $0x138] sm:$0xff] }
  0x23   : > { %5229 = vmatpush3.msra.mxu0 %v243_v12  ;;  %5351 = vmatpush3.msra.mxu1 %v4459_v33  ;;  %v214_v8 = vld [vmem:[%s6492_s28 + $0x140] sm:$0xff]  ;;  %v215_v9 = vld [vmem:[%s6492_s28 + $0x148] sm:$0xff]  ;;  %v216_v10 = vld [vmem:[%s6492_s28 + $0x150] sm:$0xff] }
  0x24   : > { %5230 = vmatprep.subr.mxu0 %v242_v13  ;;  %5352 = vmatprep.subr.mxu1 %v4458_v34  ;;  %v217_v11 = vld [vmem:[%s6492_s28 + $0x158] sm:$0xff]  ;;  %v218_v12 = vld [vmem:[%s6492_s28 + $0x160] sm:$0xff]  ;;  %v223_v17 = vld [vmem:[%s6492_s28 + $0x188] sm:$0xff] }
  0x25   : > { %5231 = vmatpush3.msra.mxu0 %v242_v13  ;;  %5353 = vmatpush3.msra.mxu1 %v4458_v34  ;;  %v219_v13 = vld [vmem:[%s6492_s28 + $0x168] sm:$0xff]  ;;  %v224_v18 = vld [vmem:[%s6492_s28 + $0x190] sm:$0xff] }
  0x26   : > { %5232 = vmatprep.subr.mxu0 %v241_v14  ;;  %5354 = vmatprep.subr.mxu1 %v4457_v37  ;;  %v227_v21 = vld [vmem:[%s6492_s28 + $0x1a8] sm:$0xff]  ;;  %v228_v22 = vld [vmem:[%s6492_s28 + $0x1b0] sm:$0xff] }
  0x27   : > { %5233 = vmatpush3.msra.mxu0 %v241_v14  ;;  %5355 = vmatpush3.msra.mxu1 %v4457_v37  ;;  %v220_v14 = vld [vmem:[%s6492_s28 + $0x170] sm:$0xff]  ;;  %v231_v25 = vld [vmem:[%s6492_s28 + $0x1c8] sm:$0xff]  ;;  %v255_v37 = vlaneseq }
  0x28   : > { %5234 = vmatprep.subr.mxu0 %v240_v15  ;;  %5356 = vmatprep.subr.mxu1 %v4456_v38  ;;  %v232_v26 = vld [vmem:[%s6492_s28 + $0x1d0] sm:$0xff]  ;;  %v235_v29 = vld [vmem:[%s6492_s28 + $0x1e8] sm:$0xff] }
  0x29   : > { %5235 = vmatpush3.msra.mxu0 %v240_v15  ;;  %5357 = vmatpush3.msra.mxu1 %v4456_v38  ;;  %v221_v15 = vld [vmem:[%s6492_s28 + $0x178] sm:$0xff]  ;;  %v236_v30 = vld [vmem:[%s6492_s28 + $0x1f0] sm:$0xff]  ;;  %v4481_v34 = vld [vmem:[%s8213_s1 + $0x168] sm:$0xff]  ;;  %v6655_v38 = vshrl.u32 %v255_v37, 7 }
  0x2a   : > { %5236 = vmatprep.subr.mxu0 %v239_v16  ;;  %5358 = vmatprep.subr.mxu1 %v4455_v63  ;;  %v4482_v33 = vld [vmem:[%s8213_s1 + $0x170] sm:$0xff] }
  0x2b   : > { %5237 = vmatpush3.msra.mxu0 %v239_v16  ;;  %5359 = vmatpush3.msra.mxu1 %v4455_v63  ;;  %v222_v16 = vld [vmem:[%s6492_s28 + $0x180] sm:$0xff] }
  0x2c   : > { %5239 = vmatmul.mubr.f32.vlgmr.msra.gmra.mxu0 %v175_v19  ;;  %5360 = vmatprep.subr.mxu1 %v4454_v1  ;;  %v225_v19 = vld [vmem:[%s6492_s28 + $0x198] sm:$0xff]  ;;  %v4472_v63 = vld [vmem:[%s8213_s1 + $0x120] sm:$0xff] }
  0x2d   : > { %5241 = vmatprep.mubr.f32.mxu0 %v176_v20  ;;  %5361 = vmatpush3.msra.mxu1 %v4454_v1  ;;  %v226_v20 = vld [vmem:[%s6492_s28 + $0x1a0] sm:$0xff] }
  0x2e   : > { %5362 = vmatprep.subr.mxu1 %v4453_v3 }
  0x2f   : > { %5363 = vmatpush3.msra.mxu1 %v4453_v3 }
  0x30   : > { %5242 = vmatmul.mubr.f32.gmra.mxu0 %v177_v23  ;;  %5364 = vmatprep.subr.mxu1 %v4452_v5  ;;  %v229_v23 = vld [vmem:[%s6492_s28 + $0x1b8] sm:$0xff] }
  0x31   : > { %5244 = vmatprep.mubr.f32.mxu0 %v178_v24  ;;  %5365 = vmatpush3.msra.mxu1 %v4452_v5  ;;  %v230_v24 = vld [vmem:[%s6492_s28 + $0x1c0] sm:$0xff] }
  0x34   : > { %5245 = vmatmul.mubr.f32.gmra.mxu0 %v179_v27  ;;  %v233_v27 = vld [vmem:[%s6492_s28 + $0x1d8] sm:$0xff] }
  0x35   : > { %5247 = vmatprep.mubr.f32.mxu0 %v180_v28  ;;  %v234_v28 = vld [vmem:[%s6492_s28 + $0x1e0] sm:$0xff] }
  0x38   : > { %5248 = vmatmul.mubr.f32.gmra.mxu0 %v181_v31  ;;  %v237_v31 = vld [vmem:[%s6492_s28 + $0x1f8] sm:$0xff] }
  0x39   : > { %5250 = vmatprep.mubr.f32.mxu0 %v182_v32  ;;  %v4483_v32 = vld [vmem:[%s8213_s1 + $0x178] sm:$0xff] }
  0x3a   : > { %5462 = vmatprep.subr.mxu0 %v4483_v32 }
  0x3b   : > { %5463 = vmatpush3.msra.mxu0 %v4483_v32 }
  0x3c   : > { %5251 = vmatmul.mubr.f32.gmra.mxu0 %v183_v35  ;;  %5464 = vmatprep.subr.mxu0 %v4482_v33  ;;  %v4480_v35 = vld [vmem:[%s8213_s1 + $0x160] sm:$0xff] }
  0x3d   : > { %5253 = vmatprep.mubr.f32.mxu0 %v184_v36  ;;  %5465 = vmatpush3.msra.mxu0 %v4482_v33  ;;  %v4479_v36 = vld [vmem:[%s8213_s1 + $0x158] sm:$0xff] }
  0x3e   : > { %5466 = vmatprep.subr.mxu0 %v4481_v34 }
  0x3f   : > { %5467 = vmatpush3.msra.mxu0 %v4481_v34 }
  0x40   : > { %5254 = vmatmul.mubr.f32.gmra.mxu0 %v185_v39  ;;  %5468 = vmatprep.subr.mxu0 %v4480_v35  ;;  %v4478_v39 = vld [vmem:[%s8213_s1 + $0x150] sm:$0xff] }
  0x41   : > { %5256 = vmatprep.mubr.f32.mxu0 %v186_v40  ;;  %5469 = vmatpush3.msra.mxu0 %v4480_v35  ;;  %v257_v40 = vsub.s32 0, %v6655_v38 }
  0x42   : > { %5470 = vmatprep.subr.mxu0 %v4479_v36 }
  0x43   : > { %5471 = vmatpush3.msra.mxu0 %v4479_v36 }
  0x44   : > { %5257 = vmatmul.mubr.f32.gmra.mxu0 %v187_v41  ;;  %5472 = vmatprep.subr.mxu0 %v4478_v39  ;;  %v6664_v41 = vld [vmem:[%s8214_s2] sm:$0xff] }
  0x45   : > { %5259 = vmatprep.mubr.f32.mxu0 %v188_v42  ;;  %5473 = vmatpush3.msra.mxu0 %v4478_v39  ;;  %v6667_v42 = vrot.slane %v6664_v41, %v257_v40 }
  0x48   : > { %5260 = vmatmul.mubr.f32.gmra.mxu0 %v189_v43 }
  0x49   : > { %5262 = vmatprep.mubr.f32.mxu0 %v190_v44  ;;  %v4477_v44 = vld [vmem:[%s8213_s1 + $0x148] sm:$0xff] }
  0x4a   : > { %5474 = vmatprep.subr.mxu0 %v4477_v44 }
  0x4b   : > { %5475 = vmatpush3.msra.mxu0 %v4477_v44 }
  0x4c   : > { %5263 = vmatmul.mubr.f32.gmra.mxu0 %v191_v45 }
  0x4d   : > { %5265 = vmatprep.mubr.f32.mxu0 %v192_v46 }
  0x50   : > { %5266 = vmatmul.mubr.f32.gmra.mxu0 %v193_v47 }
  0x51   : > { %5268 = vmatprep.mubr.f32.mxu0 %v194_v48 }
  0x54   : > { %5269 = vmatmul.mubr.f32.gmra.mxu0 %v195_v49  ;;  %v4476_v49 = vld [vmem:[%s8213_s1 + $0x140] sm:$0xff] }
  0x55   : > { %5271 = vmatprep.mubr.f32.mxu0 %v196_v50  ;;  %v4475_v50 = vld [vmem:[%s8213_s1 + $0x138] sm:$0xff]  ;;  %5476 = vmatprep.subr.mxu0 %v4476_v49 }
  0x56   : > { %5477 = vmatpush3.msra.mxu0 %v4476_v49 }
  0x57   : > { %5478 = vmatprep.subr.mxu0 %v4475_v50 }
  0x58   : > { %5272 = vmatmul.mubr.f32.gmra.mxu0 %v197_v51 }
  0x59   : > { %5274 = vmatprep.mubr.f32.mxu0 %v198_v52  ;;  %5479 = vmatpush3.msra.mxu0 %v4475_v50 }
  0x5c   : > { %5275 = vmatmul.mubr.f32.gmra.mxu0 %v199_v53 }
  0x5d   : > { %5277 = vmatprep.mubr.f32.mxu0 %v200_v54 }
  0x60   : > { %5278 = vmatmul.mubr.f32.gmra.mxu0 %v201_v55  ;;  %v4474_v55 = vld [vmem:[%s8213_s1 + $0x130] sm:$0xff] }
  0x61   : > { %5280 = vmatprep.mubr.f32.mxu0 %v202_v56  ;;  %5480 = vmatprep.subr.mxu0 %v4474_v55 }
  0x62   : > { %5481 = vmatpush3.msra.mxu0 %v4474_v55 }
  0x64   : > { %5281 = vmatmul.mubr.f32.gmra.mxu0 %v203_v57 }
  0x65   : > { %5283 = vmatprep.mubr.f32.mxu0 %v204_v58  ;;  %v4473_v58 = vld [vmem:[%s8213_s1 + $0x128] sm:$0xff] }
  0x66   : > { %5482 = vmatprep.subr.mxu0 %v4473_v58 }
  0x67   : > { %5483 = vmatpush3.msra.mxu0 %v4473_v58 }
  0x68   : > { %5284 = vmatmul.mubr.f32.gmra.mxu0 %v205_v59  ;;  %5484 = vmatprep.subr.mxu0 %v4472_v63 }
  0x69   : > { %5286 = vmatprep.mubr.f32.mxu0 %v206_v60  ;;  %5485 = vmatpush3.msra.mxu0 %v4472_v63 }
  0x6c   : > { %5287 = vmatmul.mubr.f32.gmra.mxu0 %v207_v61 }
  0x6d   : > { %5289 = vmatprep.mubr.f32.mxu0 %v208_v62 }
  0x70   : > { %5290 = vmatmul.mubr.f32.gmra.mxu0 %v209_v0 }
  0x71   : > { %5292 = vmatprep.mubr.f32.mxu0 %v210_v2  ;;  %v4471_v2 = vld [vmem:[%s8213_s1 + $0x118] sm:$0xff] }
  0x72   : > { %5486 = vmatprep.subr.mxu0 %v4471_v2 }
  0x73   : > { %5487 = vmatpush3.msra.mxu0 %v4471_v2 }
  0x74   : > { %5293 = vmatmul.mubr.f32.gmra.mxu0 %v211_v4 }
  0x75   : > { %5295 = vmatprep.mubr.f32.mxu0 %v212_v6 }
  0x78   : > { %5296 = vmatmul.mubr.f32.gmra.mxu0 %v213_v7  ;;  %v4470_v7 = vld [vmem:[%s8213_s1 + $0x110] sm:$0xff] }
  0x79   : > { %5298 = vmatprep.mubr.f32.mxu0 %v214_v8  ;;  %5488 = vmatprep.subr.mxu0 %v4470_v7 }
  0x7a   : > { %5489 = vmatpush3.msra.mxu0 %v4470_v7 }
  0x7c   : > { %5299 = vmatmul.mubr.f32.gmra.mxu0 %v215_v9 }
  0x7d   : > { %5301 = vmatprep.mubr.f32.mxu0 %v216_v10  ;;  %v4469_v10 = vld [vmem:[%s8213_s1 + $0x108] sm:$0xff] }
  0x7e   : > { %5490 = vmatprep.subr.mxu0 %v4469_v10 }
  0x7f   : > { %5491 = vmatpush3.msra.mxu0 %v4469_v10 }
  0x80   : > { %5302 = vmatmul.mubr.f32.gmra.mxu0 %v217_v11 }
  0x81   : > { %5304 = vmatprep.mubr.f32.mxu0 %v218_v12 }
  0x84   : > { %5305 = vmatmul.mubr.f32.gmra.mxu0 %v219_v13 }
  0x85   : > { %5307 = vmatprep.mubr.f32.mxu0 %v220_v14 }
  0x88   : > { %5308 = vmatmul.mubr.f32.gmra.mxu0 %v221_v15  ;;  %v4468_v15 = vld [vmem:[%s8213_s1 + $0x100] sm:$0xff] }
  0x89   : > { %5310 = vmatprep.mubr.f32.mxu0 %v222_v16  ;;  %5492 = vmatprep.subr.mxu0 %v4468_v15 }
  0x8a   : > { %5493 = vmatpush3.msra.mxu0 %v4468_v15 }
  0x8c   : > { %5311 = vmatmul.mubr.f32.gmra.mxu0 %v223_v17 }
  0x8d   : > { %5313 = vmatprep.mubr.f32.mxu0 %v224_v18 }
  0x90   : > { %5314 = vmatmul.mubr.f32.gmra.mxu0 %v225_v19 }
  0x91   : > { %5316 = vmatprep.mubr.f32.mxu0 %v226_v20 }
  0x94   : > { %5317 = vmatmul.mubr.f32.gmra.mxu0 %v227_v21 }
  0x95   : > { %5319 = vmatprep.mubr.f32.mxu0 %v228_v22 }
  0x98   : > { %5320 = vmatmul.mubr.f32.gmra.mxu0 %v229_v23 }
  0x99   : > { %5322 = vmatprep.mubr.f32.mxu0 %v230_v24 }
  0x9c   : > { %5323 = vmatmul.mubr.f32.gmra.mxu0 %v231_v25 }
  0x9d   : > { %5325 = vmatprep.mubr.f32.mxu0 %v232_v26 }
  0xa0   : > { %5326 = vmatmul.mubr.f32.gmra.mxu0 %v233_v27 }
  0xa1   : > { %5328 = vmatprep.mubr.f32.mxu0 %v234_v28 }
  0xa4   : > { %5329 = vmatmul.mubr.f32.gmra.mxu0 %v235_v29 }
  0xa5   : > { %5331 = vmatprep.mubr.f32.mxu0 %v236_v30 }
  0xa8   : > { %5332 = vmatmul.mubr.f32.gmra.mxu0 %v237_v31 }
  0xec   : > { %v5240_v43 = vpop.f32.mrf.mxu0 }
  0xed   : > { %v331_v45 = vadd.f32 %v5240_v43, %v6667_v42 }
  0xee   : > { %v325_v46 = vpop.f32.mrf.mxu0 }
  0xef   : > { %v326_v47 = vadd.f32 %v325_v46, %v6667_v42  ;;  %v645_v52 = vmax.f32 %v331_v45, 0.0 }
  0xf0   : > { %v5243_v48 = vpop.f32.mrf.mxu0 }
  0xf1   : > { %v644_v51 = vmax.f32 %v326_v47, 0.0  ;;  %v341_v53 = vadd.f32 %v5243_v48, %v6667_v42 }
  0xf2   : > { %v335_v54 = vpop.f32.mrf.mxu0 }
  0xf3   : > { %v336_v56 = vadd.f32 %v335_v54, %v6667_v42  ;;  %5366 = vmatprep.mubr.f32.mxu1 %v644_v51  ;;  %v647_v60 = vmax.f32 %v341_v53, 0.0 }
  0xf4   : > { %v5246_v57 = vpop.f32.mrf.mxu0  ;;  %5367 = vmatmul.mubr.f32.vlgmr.msra.gmra.mxu1 %v645_v52 }
  0xf5   : > { %v646_v59 = vmax.f32 %v336_v56, 0.0  ;;  %v351_v61 = vadd.f32 %v5246_v57, %v6667_v42 }
  0xf6   : > { %v345_v62 = vpop.f32.mrf.mxu0 }
  0xf7   : > { %v346_v0 = vadd.f32 %v345_v62, %v6667_v42  ;;  %5369 = vmatprep.mubr.f32.mxu1 %v646_v59  ;;  %v649_v4 = vmax.f32 %v351_v61, 0.0 }
  0xf8   : > { %v5249_v1 = vpop.f32.mrf.mxu0  ;;  %5370 = vmatmul.mubr.f32.gmra.mxu1 %v647_v60 }
  0xf9   : > { %v648_v3 = vmax.f32 %v346_v0, 0.0  ;;  %v361_v5 = vadd.f32 %v5249_v1, %v6667_v42 }
  0xfa   : > { %v355_v6 = vpop.f32.mrf.mxu0 }
  0xfb   : > { %v356_v8 = vadd.f32 %v355_v6, %v6667_v42  ;;  %5372 = vmatprep.mubr.f32.mxu1 %v648_v3  ;;  %v651_v12 = vmax.f32 %v361_v5, 0.0 }
  0xfc   : > { %v5252_v9 = vpop.f32.mrf.mxu0  ;;  %5373 = vmatmul.mubr.f32.gmra.mxu1 %v649_v4 }
  0xfd   : > { %v650_v11 = vmax.f32 %v356_v8, 0.0  ;;  %v371_v13 = vadd.f32 %v5252_v9, %v6667_v42 }
  0xfe   : > { %v365_v14 = vpop.f32.mrf.mxu0 }
  0xff   : > { %v366_v16 = vadd.f32 %v365_v14, %v6667_v42  ;;  %5375 = vmatprep.mubr.f32.mxu1 %v650_v11  ;;  %v653_v19 = vmax.f32 %v371_v13, 0.0 }
 0x100   : > { %v5255_v17 = vpop.f32.mrf.mxu0  ;;  %5376 = vmatmul.mubr.f32.gmra.mxu1 %v651_v12 }
 0x101   : > { %v652_v18 = vmax.f32 %v366_v16, 0.0  ;;  %v381_v20 = vadd.f32 %v5255_v17, %v6667_v42 }
 0x102   : > { %v375_v21 = vpop.f32.mrf.mxu0 }
 0x103   : > { %v376_v22 = vadd.f32 %v375_v21, %v6667_v42  ;;  %5378 = vmatprep.mubr.f32.mxu1 %v652_v18  ;;  %v655_v25 = vmax.f32 %v381_v20, 0.0 }
 0x104   : > { %v5258_v23 = vpop.f32.mrf.mxu0  ;;  %5379 = vmatmul.mubr.f32.gmra.mxu1 %v653_v19 }
 0x105   : > { %v654_v24 = vmax.f32 %v376_v22, 0.0  ;;  %v391_v26 = vadd.f32 %v5258_v23, %v6667_v42 }
 0x106   : > { %v385_v27 = vpop.f32.mrf.mxu0 }
 0x107   : > { %v386_v28 = vadd.f32 %v385_v27, %v6667_v42  ;;  %5381 = vmatprep.mubr.f32.mxu1 %v654_v24  ;;  %v657_v31 = vmax.f32 %v391_v26, 0.0 }
 0x108   : > { %v5261_v29 = vpop.f32.mrf.mxu0  ;;  %5382 = vmatmul.mubr.f32.gmra.mxu1 %v655_v25 }
 0x109   : > { %v656_v30 = vmax.f32 %v386_v28, 0.0  ;;  %v401_v32 = vadd.f32 %v5261_v29, %v6667_v42 }
 0x10a   : > { %v395_v33 = vpop.f32.mrf.mxu0 }
 0x10b   : > { %v396_v34 = vadd.f32 %v395_v33, %v6667_v42  ;;  %5384 = vmatprep.mubr.f32.mxu1 %v656_v30  ;;  %v659_v39 = vmax.f32 %v401_v32, 0.0 }
 0x10c   : > { %v5264_v35 = vpop.f32.mrf.mxu0  ;;  %5385 = vmatmul.mubr.f32.gmra.mxu1 %v657_v31 }
 0x10d   : > { %v658_v36 = vmax.f32 %v396_v34, 0.0  ;;  %v411_v40 = vadd.f32 %v5264_v35, %v6667_v42 }
 0x10e   : > { %v405_v43 = vpop.f32.mrf.mxu0 }
 0x10f   : > { %v406_v44 = vadd.f32 %v405_v43, %v6667_v42  ;;  %5387 = vmatprep.mubr.f32.mxu1 %v658_v36  ;;  %v661_v47 = vmax.f32 %v411_v40, 0.0 }
 0x110   : > { %v5267_v45 = vpop.f32.mrf.mxu0  ;;  %5388 = vmatmul.mubr.f32.gmra.mxu1 %v659_v39 }
 0x111   : > { %v660_v46 = vmax.f32 %v406_v44, 0.0  ;;  %v421_v48 = vadd.f32 %v5267_v45, %v6667_v42 }
 0x112   : > { %v415_v49 = vpop.f32.mrf.mxu0 }
 0x113   : > { %v416_v50 = vadd.f32 %v415_v49, %v6667_v42  ;;  %5390 = vmatprep.mubr.f32.mxu1 %v660_v46  ;;  %v663_v53 = vmax.f32 %v421_v48, 0.0 }
 0x114   : > { %v5270_v51 = vpop.f32.mrf.mxu0  ;;  %5391 = vmatmul.mubr.f32.gmra.mxu1 %v661_v47 }
 0x115   : > { %v662_v52 = vmax.f32 %v416_v50, 0.0  ;;  %v431_v54 = vadd.f32 %v5270_v51, %v6667_v42 }
 0x116   : > { %v425_v55 = vpop.f32.mrf.mxu0 }
 0x117   : > { %v426_v56 = vadd.f32 %v425_v55, %v6667_v42  ;;  %5393 = vmatprep.mubr.f32.mxu1 %v662_v52  ;;  %v665_v59 = vmax.f32 %v431_v54, 0.0 }
 0x118   : > { %v5273_v57 = vpop.f32.mrf.mxu0  ;;  %5394 = vmatmul.mubr.f32.gmra.mxu1 %v663_v53 }
 0x119   : > { %v664_v58 = vmax.f32 %v426_v56, 0.0  ;;  %v441_v60 = vadd.f32 %v5273_v57, %v6667_v42 }
 0x11a   : > { %v435_v61 = vpop.f32.mrf.mxu0 }
 0x11b   : > { %v436_v62 = vadd.f32 %v435_v61, %v6667_v42  ;;  %5396 = vmatprep.mubr.f32.mxu1 %v664_v58  ;;  %v667_v1 = vmax.f32 %v441_v60, 0.0 }
 0x11c   : > { %v5276_v63 = vpop.f32.mrf.mxu0  ;;  %5397 = vmatmul.mubr.f32.gmra.mxu1 %v665_v59 }
 0x11d   : > { %v666_v0 = vmax.f32 %v436_v62, 0.0  ;;  %v451_v2 = vadd.f32 %v5276_v63, %v6667_v42 }
 0x11e   : > { %v445_v3 = vpop.f32.mrf.mxu0 }
 0x11f   : > { %v446_v4 = vadd.f32 %v445_v3, %v6667_v42  ;;  %5399 = vmatprep.mubr.f32.mxu1 %v666_v0  ;;  %v669_v7 = vmax.f32 %v451_v2, 0.0 }
 0x120   : > { %v5279_v5 = vpop.f32.mrf.mxu0  ;;  %5400 = vmatmul.mubr.f32.gmra.mxu1 %v667_v1 }
 0x121   : > { %v668_v6 = vmax.f32 %v446_v4, 0.0  ;;  %v461_v8 = vadd.f32 %v5279_v5, %v6667_v42 }
 0x122   : > { %v455_v9 = vpop.f32.mrf.mxu0 }
 0x123   : > { %v456_v10 = vadd.f32 %v455_v9, %v6667_v42  ;;  %5402 = vmatprep.mubr.f32.mxu1 %v668_v6  ;;  %v671_v13 = vmax.f32 %v461_v8, 0.0 }
 0x124   : > { %v5282_v11 = vpop.f32.mrf.mxu0  ;;  %5403 = vmatmul.mubr.f32.gmra.mxu1 %v669_v7 }
 0x125   : > { %v670_v12 = vmax.f32 %v456_v10, 0.0  ;;  %v471_v14 = vadd.f32 %v5282_v11, %v6667_v42 }
 0x126   : > { %v465_v15 = vpop.f32.mrf.mxu0 }
 0x127   : > { %v466_v16 = vadd.f32 %v465_v15, %v6667_v42  ;;  %5405 = vmatprep.mubr.f32.mxu1 %v670_v12  ;;  %v673_v19 = vmax.f32 %v471_v14, 0.0 }
 0x128   : > { %v5285_v17 = vpop.f32.mrf.mxu0  ;;  %5406 = vmatmul.mubr.f32.gmra.mxu1 %v671_v13 }
 0x129   : > { %v672_v18 = vmax.f32 %v466_v16, 0.0  ;;  %v481_v20 = vadd.f32 %v5285_v17, %v6667_v42 }
 0x12a   : > { %v475_v21 = vpop.f32.mrf.mxu0 }
 0x12b   : > { %v476_v22 = vadd.f32 %v475_v21, %v6667_v42  ;;  %5408 = vmatprep.mubr.f32.mxu1 %v672_v18  ;;  %v675_v25 = vmax.f32 %v481_v20, 0.0 }
 0x12c   : > { %v5288_v23 = vpop.f32.mrf.mxu0  ;;  %5409 = vmatmul.mubr.f32.gmra.mxu1 %v673_v19 }
 0x12d   : > { %v674_v24 = vmax.f32 %v476_v22, 0.0  ;;  %v491_v26 = vadd.f32 %v5288_v23, %v6667_v42 }
 0x12e   : > { %v485_v27 = vpop.f32.mrf.mxu0 }
 0x12f   : > { %v486_v28 = vadd.f32 %v485_v27, %v6667_v42  ;;  %5411 = vmatprep.mubr.f32.mxu1 %v674_v24  ;;  %v677_v31 = vmax.f32 %v491_v26, 0.0 }
 0x130   : > { %v5291_v29 = vpop.f32.mrf.mxu0  ;;  %5412 = vmatmul.mubr.f32.gmra.mxu1 %v675_v25 }
 0x131   : > { %v676_v30 = vmax.f32 %v486_v28, 0.0  ;;  %v501_v32 = vadd.f32 %v5291_v29, %v6667_v42 }
 0x132   : > { %v495_v33 = vpop.f32.mrf.mxu0 }
 0x133   : > { %v496_v34 = vadd.f32 %v495_v33, %v6667_v42  ;;  %5414 = vmatprep.mubr.f32.mxu1 %v676_v30  ;;  %v679_v39 = vmax.f32 %v501_v32, 0.0 }
 0x134   : > { %v5294_v35 = vpop.f32.mrf.mxu0  ;;  %5415 = vmatmul.mubr.f32.gmra.mxu1 %v677_v31 }
 0x135   : > { %v678_v36 = vmax.f32 %v496_v34, 0.0  ;;  %v511_v40 = vadd.f32 %v5294_v35, %v6667_v42 }
 0x136   : > { %v505_v43 = vpop.f32.mrf.mxu0 }
 0x137   : > { %v506_v44 = vadd.f32 %v505_v43, %v6667_v42  ;;  %5417 = vmatprep.mubr.f32.mxu1 %v678_v36  ;;  %v681_v47 = vmax.f32 %v511_v40, 0.0 }
 0x138   : > { %v5297_v45 = vpop.f32.mrf.mxu0  ;;  %5418 = vmatmul.mubr.f32.gmra.mxu1 %v679_v39 }
 0x139   : > { %v680_v46 = vmax.f32 %v506_v44, 0.0  ;;  %v521_v48 = vadd.f32 %v5297_v45, %v6667_v42 }
 0x13a   : > { %v515_v49 = vpop.f32.mrf.mxu0 }
 0x13b   : > { %v516_v50 = vadd.f32 %v515_v49, %v6667_v42  ;;  %5420 = vmatprep.mubr.f32.mxu1 %v680_v46  ;;  %v683_v53 = vmax.f32 %v521_v48, 0.0 }
 0x13c   : > { %v5300_v51 = vpop.f32.mrf.mxu0  ;;  %5421 = vmatmul.mubr.f32.gmra.mxu1 %v681_v47 }
 0x13d   : > { %v682_v52 = vmax.f32 %v516_v50, 0.0  ;;  %v531_v54 = vadd.f32 %v5300_v51, %v6667_v42 }
 0x13e   : > { %v525_v55 = vpop.f32.mrf.mxu0 }
 0x13f   : > { %v526_v56 = vadd.f32 %v525_v55, %v6667_v42  ;;  %5423 = vmatprep.mubr.f32.mxu1 %v682_v52  ;;  %v685_v59 = vmax.f32 %v531_v54, 0.0 }
 0x140   : > { %v5303_v57 = vpop.f32.mrf.mxu0  ;;  %5424 = vmatmul.mubr.f32.gmra.mxu1 %v683_v53 }
 0x141   : > { %v684_v58 = vmax.f32 %v526_v56, 0.0  ;;  %v541_v60 = vadd.f32 %v5303_v57, %v6667_v42 }
 0x142   : > { %v535_v61 = vpop.f32.mrf.mxu0 }
 0x143   : > { %v536_v62 = vadd.f32 %v535_v61, %v6667_v42  ;;  %5426 = vmatprep.mubr.f32.mxu1 %v684_v58  ;;  %v687_v1 = vmax.f32 %v541_v60, 0.0 }
 0x144   : > { %v5306_v63 = vpop.f32.mrf.mxu0  ;;  %5427 = vmatmul.mubr.f32.gmra.mxu1 %v685_v59 }
 0x145   : > { %v686_v0 = vmax.f32 %v536_v62, 0.0  ;;  %v551_v2 = vadd.f32 %v5306_v63, %v6667_v42 }
 0x146   : > { %v545_v3 = vpop.f32.mrf.mxu0 }
 0x147   : > { %v546_v4 = vadd.f32 %v545_v3, %v6667_v42  ;;  %5429 = vmatprep.mubr.f32.mxu1 %v686_v0  ;;  %v689_v7 = vmax.f32 %v551_v2, 0.0  ;;  %v4498_v2 = vld [vmem:[%s8213_s1 + $0x1f0] sm:$0xff]  ;;  %v4496_v3 = vld [vmem:[%s8213_s1 + $0x1e0] sm:$0xff] }
 0x148   : > { %v5309_v5 = vpop.f32.mrf.mxu0  ;;  %5430 = vmatmul.mubr.f32.gmra.mxu1 %v687_v1  ;;  %v4499_v1 = vld [vmem:[%s8213_s1 + $0x1f8] sm:$0xff] }
 0x149   : > { %v688_v6 = vmax.f32 %v546_v4, 0.0  ;;  %v561_v8 = vadd.f32 %v5309_v5, %v6667_v42  ;;  %5590 = vmatprep.subr.mxu1 %v4499_v1  ;;  %v4495_v4 = vld [vmem:[%s8213_s1 + $0x1d8] sm:$0xff]  ;;  %v4494_v5 = vld [vmem:[%s8213_s1 + $0x1d0] sm:$0xff] }
 0x14a   : > { %v555_v9 = vpop.f32.mrf.mxu0  ;;  %5591 = vmatpush3.msra.mxu1 %v4499_v1 }
 0x14b   : > { %v556_v10 = vadd.f32 %v555_v9, %v6667_v42  ;;  %5432 = vmatprep.mubr.f32.mxu1 %v688_v6  ;;  %v691_v13 = vmax.f32 %v561_v8, 0.0  ;;  %5592 = vmatprep.subr.mxu1 %v4498_v2  ;;  %v727_v6 = vsub.s32 1, %v6655_v38  ;;  %v4493_v9 = vld [vmem:[%s8213_s1 + $0x1c8] sm:$0xff] }
 0x14c   : > { %v5312_v11 = vpop.f32.mrf.mxu0  ;;  %5433 = vmatmul.mubr.f32.gmra.mxu1 %v689_v7 }
 0x14d   : > { %v690_v12 = vmax.f32 %v556_v10, 0.0  ;;  %v571_v14 = vadd.f32 %v5312_v11, %v6667_v42  ;;  %5593 = vmatpush3.msra.mxu1 %v4498_v2  ;;  %v6783_v7 = vrot.slane %v6664_v41, %v727_v6  ;;  %v4491_v41 = vld [vmem:[%s8213_s1 + $0x1b8] sm:$0xff] }
 0x14e   : > { %v565_v15 = vpop.f32.mrf.mxu0 }
 0x14f   : > { %v566_v16 = vadd.f32 %v565_v15, %v6667_v42  ;;  %5435 = vmatprep.mubr.f32.mxu1 %v690_v12  ;;  %v693_v19 = vmax.f32 %v571_v14, 0.0  ;;  %v4492_v14 = vld [vmem:[%s8213_s1 + $0x1c0] sm:$0xff] }
 0x150   : > { %v5315_v17 = vpop.f32.mrf.mxu0  ;;  %5436 = vmatmul.mubr.f32.gmra.mxu1 %v691_v13 }
 0x151   : > { %v692_v18 = vmax.f32 %v566_v16, 0.0  ;;  %v581_v20 = vadd.f32 %v5315_v17, %v6667_v42 }
 0x152   : > { %v575_v21 = vpop.f32.mrf.mxu0 }
 0x153   : > { %v576_v22 = vadd.f32 %v575_v21, %v6667_v42  ;;  %5438 = vmatprep.mubr.f32.mxu1 %v692_v18  ;;  %v695_v25 = vmax.f32 %v581_v20, 0.0 }
 0x154   : > { %v5318_v23 = vpop.f32.mrf.mxu0  ;;  %5439 = vmatmul.mubr.f32.gmra.mxu1 %v693_v19  ;;  %v4490_v19 = vld [vmem:[%s8213_s1 + $0x1b0] sm:$0xff] }
 0x155   : > { %v694_v24 = vmax.f32 %v576_v22, 0.0  ;;  %v591_v26 = vadd.f32 %v5318_v23, %v6667_v42  ;;  %v4489_v22 = vld [vmem:[%s8213_s1 + $0x1a8] sm:$0xff] }
 0x156   : > { %v585_v27 = vpop.f32.mrf.mxu0 }
 0x157   : > { %v586_v28 = vadd.f32 %v585_v27, %v6667_v42  ;;  %5441 = vmatprep.mubr.f32.mxu1 %v694_v24  ;;  %v697_v31 = vmax.f32 %v591_v26, 0.0  ;;  %v4488_v27 = vld [vmem:[%s8213_s1 + $0x1a0] sm:$0xff] }
 0x158   : > { %v5321_v29 = vpop.f32.mrf.mxu0  ;;  %5442 = vmatmul.mubr.f32.gmra.mxu1 %v695_v25 }
 0x159   : > { %v696_v30 = vmax.f32 %v586_v28, 0.0  ;;  %v601_v32 = vadd.f32 %v5321_v29, %v6667_v42 }
 0x15a   : > { %v595_v33 = vpop.f32.mrf.mxu0 }
 0x15b   : > { %v596_v34 = vadd.f32 %v595_v33, %v6667_v42  ;;  %5444 = vmatprep.mubr.f32.mxu1 %v696_v30  ;;  %v699_v39 = vmax.f32 %v601_v32, 0.0  ;;  %v4487_v30 = vld [vmem:[%s8213_s1 + $0x198] sm:$0xff] }
 0x15c   : > { %v5324_v35 = vpop.f32.mrf.mxu0  ;;  %5445 = vmatmul.mubr.f32.gmra.mxu1 %v697_v31 }
 0x15d   : > { %v698_v36 = vmax.f32 %v596_v34, 0.0  ;;  %v611_v40 = vadd.f32 %v5324_v35, %v6667_v42  ;;  %v4486_v35 = vld [vmem:[%s8213_s1 + $0x190] sm:$0xff] }
 0x15e   : > { %v605_v43 = vpop.f32.mrf.mxu0 }
 0x15f   : > { %v606_v44 = vadd.f32 %v605_v43, %v6667_v42  ;;  %5447 = vmatprep.mubr.f32.mxu1 %v698_v36  ;;  %v701_v47 = vmax.f32 %v611_v40, 0.0  ;;  %v4485_v40 = vld [vmem:[%s8213_s1 + $0x188] sm:$0xff] }
 0x160   : > { %v5327_v45 = vpop.f32.mrf.mxu0  ;;  %5448 = vmatmul.mubr.f32.gmra.mxu1 %v699_v39 }
 0x161   : > { %v700_v46 = vmax.f32 %v606_v44, 0.0  ;;  %v621_v48 = vadd.f32 %v5327_v45, %v6667_v42 }
 0x162   : > { %v615_v49 = vpop.f32.mrf.mxu0 }
 0x163   : > { %v616_v50 = vadd.f32 %v615_v49, %v6667_v42  ;;  %5450 = vmatprep.mubr.f32.mxu1 %v700_v46  ;;  %v703_v53 = vmax.f32 %v621_v48, 0.0 }
 0x164   : > { %v5330_v51 = vpop.f32.mrf.mxu0  ;;  %5451 = vmatmul.mubr.f32.gmra.mxu1 %v701_v47  ;;  %v4484_v47 = vld [vmem:[%s8213_s1 + $0x180] sm:$0xff] }
 0x165   : > { %v702_v52 = vmax.f32 %v616_v50, 0.0  ;;  %v631_v54 = vadd.f32 %v5330_v51, %v6667_v42 }
 0x166   : > { %v625_v55 = vpop.f32.mrf.mxu0 }
 0x167   : > { %v626_v56 = vadd.f32 %v625_v55, %v6667_v42  ;;  %5453 = vmatprep.mubr.f32.mxu1 %v702_v52  ;;  %v705_v59 = vmax.f32 %v631_v54, 0.0 }
 0x168   : > { %v5333_v57 = vpop.f32.mrf.mxu0  ;;  %5454 = vmatmul.mubr.f32.gmra.mxu1 %v703_v53 }
 0x169   : > { %v704_v58 = vmax.f32 %v626_v56, 0.0  ;;  %v641_v60 = vadd.f32 %v5333_v57, %v6667_v42 }
 0x16a   : > { %v635_v61 = vpop.f32.mrf.mxu0 }
 0x16b   : > { %v636_v62 = vadd.f32 %v635_v61, %v6667_v42  ;;  %5456 = vmatprep.mubr.f32.mxu1 %v704_v58  ;;  %v707_v0 = vmax.f32 %v641_v60, 0.0  ;;  %v4497_v42 = vld [vmem:[%s8213_s1 + $0x1e8] sm:$0xff] }
 0x16c   : > { %5457 = vmatmul.mubr.f32.gmra.mxu1 %v705_v59  ;;  %5594 = vmatprep.subr.mxu1 %v4497_v42 }
 0x16d   : > { %v706_v63 = vmax.f32 %v636_v62, 0.0  ;;  %5595 = vmatpush3.msra.mxu1 %v4497_v42 }
 0x16e   : > { %5596 = vmatprep.subr.mxu1 %v4496_v3 }
 0x16f   : > { %5459 = vmatprep.mubr.f32.mxu1 %v706_v63  ;;  %5597 = vmatpush3.msra.mxu1 %v4496_v3 }
 0x170   : > { %5460 = vmatmul.mubr.f32.gmra.mxu1 %v707_v0  ;;  %5598 = vmatprep.subr.mxu1 %v4495_v4 }
 0x171   : > { %5599 = vmatpush3.msra.mxu1 %v4495_v4 }
 0x172   : > { %5600 = vmatprep.subr.mxu1 %v4494_v5 }
 0x173   : > { %5601 = vmatpush3.msra.mxu1 %v4494_v5 }
 0x174   : > { %5602 = vmatprep.subr.mxu1 %v4493_v9 }
 0x175   : > { %5603 = vmatpush3.msra.mxu1 %v4493_v9 }
 0x176   : > { %5604 = vmatprep.subr.mxu1 %v4492_v14 }
 0x177   : > { %5605 = vmatpush3.msra.mxu1 %v4492_v14 }
 0x178   : > { %5606 = vmatprep.subr.mxu1 %v4491_v41 }
 0x179   : > { %5607 = vmatpush3.msra.mxu1 %v4491_v41 }
 0x17a   : > { %5608 = vmatprep.subr.mxu1 %v4490_v19 }
 0x17b   : > { %5609 = vmatpush3.msra.mxu1 %v4490_v19 }
 0x17c   : > { %5610 = vmatprep.subr.mxu1 %v4489_v22 }
 0x17d   : > { %5611 = vmatpush3.msra.mxu1 %v4489_v22 }
 0x17e   : > { %5612 = vmatprep.subr.mxu1 %v4488_v27 }
 0x17f   : > { %5613 = vmatpush3.msra.mxu1 %v4488_v27 }
 0x180   : > { %5614 = vmatprep.subr.mxu1 %v4487_v30 }
 0x181   : > { %5615 = vmatpush3.msra.mxu1 %v4487_v30 }
 0x182   : > { %5616 = vmatprep.subr.mxu1 %v4486_v35 }
 0x183   : > { %5617 = vmatpush3.msra.mxu1 %v4486_v35 }
 0x184   : > { %5618 = vmatprep.subr.mxu1 %v4485_v40 }
 0x185   : > { %5619 = vmatpush3.msra.mxu1 %v4485_v40 }
 0x186   : > { %5620 = vmatprep.subr.mxu1 %v4484_v47 }
 0x187   : > { %5621 = vmatpush3.msra.mxu1 %v4484_v47 }
 0x1b4   : > { %v5368_v8 = vpop.f32.mrf.mxu1 }
 0x1b5   : > { %v801_v10 = vadd.f32 %v5368_v8, %v6783_v7 }
 0x1b6   : > { %v795_v11 = vpop.f32.mrf.mxu1 }
 0x1b7   : > { %v796_v12 = vadd.f32 %v795_v11, %v6783_v7  ;;  %v1115_v16 = vmax.f32 %v801_v10, 0.0 }
 0x1b8   : > { %v5371_v13 = vpop.f32.mrf.mxu1 }
 0x1b9   : > { %v1114_v15 = vmax.f32 %v796_v12, 0.0  ;;  %v811_v17 = vadd.f32 %v5371_v13, %v6783_v7 }
 0x1ba   : > { %v805_v18 = vpop.f32.mrf.mxu1 }
 0x1bb   : > { %v806_v20 = vadd.f32 %v805_v18, %v6783_v7  ;;  %5494 = vmatprep.mubr.f32.mxu0 %v1114_v15  ;;  %v1117_v24 = vmax.f32 %v811_v17, 0.0 }
 0x1bc   : > { %v5374_v21 = vpop.f32.mrf.mxu1  ;;  %5495 = vmatmul.mubr.f32.vlgmr.msra.gmra.mxu0 %v1115_v16 }
 0x1bd   : > { %v1116_v23 = vmax.f32 %v806_v20, 0.0  ;;  %v821_v25 = vadd.f32 %v5374_v21, %v6783_v7 }
 0x1be   : > { %v815_v26 = vpop.f32.mrf.mxu1 }
 0x1bf   : > { %v816_v28 = vadd.f32 %v815_v26, %v6783_v7  ;;  %5497 = vmatprep.mubr.f32.mxu0 %v1116_v23  ;;  %v1119_v32 = vmax.f32 %v821_v25, 0.0 }
 0x1c0   : > { %v5377_v29 = vpop.f32.mrf.mxu1  ;;  %5498 = vmatmul.mubr.f32.gmra.mxu0 %v1117_v24 }
 0x1c1   : > { %v1118_v31 = vmax.f32 %v816_v28, 0.0  ;;  %v831_v33 = vadd.f32 %v5377_v29, %v6783_v7 }
 0x1c2   : > { %v825_v34 = vpop.f32.mrf.mxu1 }
 0x1c3   : > { %v826_v36 = vadd.f32 %v825_v34, %v6783_v7  ;;  %5500 = vmatprep.mubr.f32.mxu0 %v1118_v31  ;;  %v1121_v44 = vmax.f32 %v831_v33, 0.0 }
 0x1c4   : > { %v5380_v39 = vpop.f32.mrf.mxu1  ;;  %5501 = vmatmul.mubr.f32.gmra.mxu0 %v1119_v32 }
 0x1c5   : > { %v1120_v43 = vmax.f32 %v826_v36, 0.0  ;;  %v841_v45 = vadd.f32 %v5380_v39, %v6783_v7 }
 0x1c6   : > { %v835_v46 = vpop.f32.mrf.mxu1 }
 0x1c7   : > { %v836_v48 = vadd.f32 %v835_v46, %v6783_v7  ;;  %5503 = vmatprep.mubr.f32.mxu0 %v1120_v43  ;;  %v1123_v51 = vmax.f32 %v841_v45, 0.0 }
 0x1c8   : > { %v5383_v49 = vpop.f32.mrf.mxu1  ;;  %5504 = vmatmul.mubr.f32.gmra.mxu0 %v1121_v44 }
 0x1c9   : > { %v1122_v50 = vmax.f32 %v836_v48, 0.0  ;;  %v851_v52 = vadd.f32 %v5383_v49, %v6783_v7 }
 0x1ca   : > { %v845_v53 = vpop.f32.mrf.mxu1 }
 0x1cb   : > { %v846_v54 = vadd.f32 %v845_v53, %v6783_v7  ;;  %5506 = vmatprep.mubr.f32.mxu0 %v1122_v50  ;;  %v1125_v57 = vmax.f32 %v851_v52, 0.0 }
 0x1cc   : > { %v5386_v55 = vpop.f32.mrf.mxu1  ;;  %5507 = vmatmul.mubr.f32.gmra.mxu0 %v1123_v51 }
 0x1cd   : > { %v1124_v56 = vmax.f32 %v846_v54, 0.0  ;;  %v861_v58 = vadd.f32 %v5386_v55, %v6783_v7 }
 0x1ce   : > { %v855_v59 = vpop.f32.mrf.mxu1 }
 0x1cf   : > { %v856_v60 = vadd.f32 %v855_v59, %v6783_v7  ;;  %5509 = vmatprep.mubr.f32.mxu0 %v1124_v56  ;;  %v1127_v63 = vmax.f32 %v861_v58, 0.0 }
 0x1d0   : > { %v5389_v61 = vpop.f32.mrf.mxu1  ;;  %5510 = vmatmul.mubr.f32.gmra.mxu0 %v1125_v57 }
 0x1d1   : > { %v1126_v62 = vmax.f32 %v856_v60, 0.0  ;;  %v871_v0 = vadd.f32 %v5389_v61, %v6783_v7 }
 0x1d2   : > { %v865_v1 = vpop.f32.mrf.mxu1 }
 0x1d3   : > { %v866_v2 = vadd.f32 %v865_v1, %v6783_v7  ;;  %5512 = vmatprep.mubr.f32.mxu0 %v1126_v62  ;;  %v1129_v4 = vmax.f32 %v871_v0, 0.0 }
 0x1d4   : > { %v5392_v42 = vpop.f32.mrf.mxu1  ;;  %5513 = vmatmul.mubr.f32.gmra.mxu0 %v1127_v63 }
 0x1d5   : > { %v1128_v3 = vmax.f32 %v866_v2, 0.0  ;;  %v881_v5 = vadd.f32 %v5392_v42, %v6783_v7 }
 0x1d6   : > { %v875_v6 = vpop.f32.mrf.mxu1 }
 0x1d7   : > { %v876_v8 = vadd.f32 %v875_v6, %v6783_v7  ;;  %5515 = vmatprep.mubr.f32.mxu0 %v1128_v3  ;;  %v1131_v11 = vmax.f32 %v881_v5, 0.0 }
 0x1d8   : > { %v5395_v9 = vpop.f32.mrf.mxu1  ;;  %5516 = vmatmul.mubr.f32.gmra.mxu0 %v1129_v4 }
 0x1d9   : > { %v1130_v10 = vmax.f32 %v876_v8, 0.0  ;;  %v891_v12 = vadd.f32 %v5395_v9, %v6783_v7 }
 0x1da   : > { %v885_v13 = vpop.f32.mrf.mxu1 }
 0x1db   : > { %v886_v14 = vadd.f32 %v885_v13, %v6783_v7  ;;  %5518 = vmatprep.mubr.f32.mxu0 %v1130_v10  ;;  %v1133_v16 = vmax.f32 %v891_v12, 0.0 }
 0x1dc   : > { %v5398_v41 = vpop.f32.mrf.mxu1  ;;  %5519 = vmatmul.mubr.f32.gmra.mxu0 %v1131_v11 }
 0x1dd   : > { %v1132_v15 = vmax.f32 %v886_v14, 0.0  ;;  %v901_v17 = vadd.f32 %v5398_v41, %v6783_v7 }
 0x1de   : > { %v895_v18 = vpop.f32.mrf.mxu1 }
 0x1df   : > { %v896_v19 = vadd.f32 %v895_v18, %v6783_v7  ;;  %5521 = vmatprep.mubr.f32.mxu0 %v1132_v15  ;;  %v1135_v22 = vmax.f32 %v901_v17, 0.0 }
 0x1e0   : > { %v5401_v20 = vpop.f32.mrf.mxu1  ;;  %5522 = vmatmul.mubr.f32.gmra.mxu0 %v1133_v16 }
 0x1e1   : > { %v1134_v21 = vmax.f32 %v896_v19, 0.0  ;;  %v911_v23 = vadd.f32 %v5401_v20, %v6783_v7 }
 0x1e2   : > { %v905_v24 = vpop.f32.mrf.mxu1 }
 0x1e3   : > { %v906_v25 = vadd.f32 %v905_v24, %v6783_v7  ;;  %5524 = vmatprep.mubr.f32.mxu0 %v1134_v21  ;;  %v1137_v28 = vmax.f32 %v911_v23, 0.0 }
 0x1e4   : > { %v5404_v26 = vpop.f32.mrf.mxu1  ;;  %5525 = vmatmul.mubr.f32.gmra.mxu0 %v1135_v22 }
 0x1e5   : > { %v1136_v27 = vmax.f32 %v906_v25, 0.0  ;;  %v921_v29 = vadd.f32 %v5404_v26, %v6783_v7 }
 0x1e6   : > { %v915_v30 = vpop.f32.mrf.mxu1 }
 0x1e7   : > { %v916_v31 = vadd.f32 %v915_v30, %v6783_v7  ;;  %5527 = vmatprep.mubr.f32.mxu0 %v1136_v27  ;;  %v1139_v34 = vmax.f32 %v921_v29, 0.0 }
 0x1e8   : > { %v5407_v32 = vpop.f32.mrf.mxu1  ;;  %5528 = vmatmul.mubr.f32.gmra.mxu0 %v1137_v28 }
 0x1e9   : > { %v1138_v33 = vmax.f32 %v916_v31, 0.0  ;;  %v931_v35 = vadd.f32 %v5407_v32, %v6783_v7 }
 0x1ea   : > { %v925_v36 = vpop.f32.mrf.mxu1 }
 0x1eb   : > { %v926_v39 = vadd.f32 %v925_v36, %v6783_v7  ;;  %5530 = vmatprep.mubr.f32.mxu0 %v1138_v33  ;;  %v1141_v44 = vmax.f32 %v931_v35, 0.0 }
 0x1ec   : > { %v5410_v40 = vpop.f32.mrf.mxu1  ;;  %5531 = vmatmul.mubr.f32.gmra.mxu0 %v1139_v34 }
 0x1ed   : > { %v1140_v43 = vmax.f32 %v926_v39, 0.0  ;;  %v941_v45 = vadd.f32 %v5410_v40, %v6783_v7 }
 0x1ee   : > { %v935_v46 = vpop.f32.mrf.mxu1 }
 0x1ef   : > { %v936_v47 = vadd.f32 %v935_v46, %v6783_v7  ;;  %5533 = vmatprep.mubr.f32.mxu0 %v1140_v43  ;;  %v1143_v50 = vmax.f32 %v941_v45, 0.0 }
 0x1f0   : > { %v5413_v48 = vpop.f32.mrf.mxu1  ;;  %5534 = vmatmul.mubr.f32.gmra.mxu0 %v1141_v44 }
 0x1f1   : > { %v1142_v49 = vmax.f32 %v936_v47, 0.0  ;;  %v951_v51 = vadd.f32 %v5413_v48, %v6783_v7 }
 0x1f2   : > { %v945_v52 = vpop.f32.mrf.mxu1 }
 0x1f3   : > { %v946_v53 = vadd.f32 %v945_v52, %v6783_v7  ;;  %5536 = vmatprep.mubr.f32.mxu0 %v1142_v49  ;;  %v1145_v56 = vmax.f32 %v951_v51, 0.0 }
 0x1f4   : > { %v5416_v54 = vpop.f32.mrf.mxu1  ;;  %5537 = vmatmul.mubr.f32.gmra.mxu0 %v1143_v50 }
 0x1f5   : > { %v1144_v55 = vmax.f32 %v946_v53, 0.0  ;;  %v961_v57 = vadd.f32 %v5416_v54, %v6783_v7 }
 0x1f6   : > { %v955_v58 = vpop.f32.mrf.mxu1 }
 0x1f7   : > { %v956_v59 = vadd.f32 %v955_v58, %v6783_v7  ;;  %5539 = vmatprep.mubr.f32.mxu0 %v1144_v55  ;;  %v1147_v62 = vmax.f32 %v961_v57, 0.0 }
 0x1f8   : > { %v5419_v60 = vpop.f32.mrf.mxu1  ;;  %5540 = vmatmul.mubr.f32.gmra.mxu0 %v1145_v56 }
 0x1f9   : > { %v1146_v61 = vmax.f32 %v956_v59, 0.0  ;;  %v971_v63 = vadd.f32 %v5419_v60, %v6783_v7 }
 0x1fa   : > { %v965_v0 = vpop.f32.mrf.mxu1 }
 0x1fb   : > { %v966_v1 = vadd.f32 %v965_v0, %v6783_v7  ;;  %5542 = vmatprep.mubr.f32.mxu0 %v1146_v61  ;;  %v1149_v3 = vmax.f32 %v971_v63, 0.0 }
 0x1fc   : > { %v5422_v2 = vpop.f32.mrf.mxu1  ;;  %5543 = vmatmul.mubr.f32.gmra.mxu0 %v1147_v62 }
 0x1fd   : > { %v1148_v42 = vmax.f32 %v966_v1, 0.0  ;;  %v981_v4 = vadd.f32 %v5422_v2, %v6783_v7 }
 0x1fe   : > { %v975_v5 = vpop.f32.mrf.mxu1 }
 0x1ff   : > { %v976_v6 = vadd.f32 %v975_v5, %v6783_v7  ;;  %5545 = vmatprep.mubr.f32.mxu0 %v1148_v42  ;;  %v1151_v10 = vmax.f32 %v981_v4, 0.0 }
 0x200   : > { %v5425_v8 = vpop.f32.mrf.mxu1  ;;  %5546 = vmatmul.mubr.f32.gmra.mxu0 %v1149_v3 }
 0x201   : > { %v1150_v9 = vmax.f32 %v976_v6, 0.0  ;;  %v991_v11 = vadd.f32 %v5425_v8, %v6783_v7 }
 0x202   : > { %v985_v12 = vpop.f32.mrf.mxu1 }
 0x203   : > { %v986_v13 = vadd.f32 %v985_v12, %v6783_v7  ;;  %5548 = vmatprep.mubr.f32.mxu0 %v1150_v9  ;;  %v1153_v15 = vmax.f32 %v991_v11, 0.0 }
 0x204   : > { %v5428_v14 = vpop.f32.mrf.mxu1  ;;  %5549 = vmatmul.mubr.f32.gmra.mxu0 %v1151_v10 }
 0x205   : > { %v1152_v41 = vmax.f32 %v986_v13, 0.0  ;;  %v1001_v16 = vadd.f32 %v5428_v14, %v6783_v7 }
 0x206   : > { %v995_v17 = vpop.f32.mrf.mxu1 }
 0x207   : > { %v996_v18 = vadd.f32 %v995_v17, %v6783_v7  ;;  %5551 = vmatprep.mubr.f32.mxu0 %v1152_v41  ;;  %v1155_v21 = vmax.f32 %v1001_v16, 0.0 }
 0x208   : > { %v5431_v19 = vpop.f32.mrf.mxu1  ;;  %5552 = vmatmul.mubr.f32.gmra.mxu0 %v1153_v15 }
 0x209   : > { %v1154_v20 = vmax.f32 %v996_v18, 0.0  ;;  %v1011_v22 = vadd.f32 %v5431_v19, %v6783_v7 }
 0x20a   : > { %v1005_v23 = vpop.f32.mrf.mxu1 }
 0x20b   : > { %v1006_v24 = vadd.f32 %v1005_v23, %v6783_v7  ;;  %5554 = vmatprep.mubr.f32.mxu0 %v1154_v20  ;;  %v1157_v27 = vmax.f32 %v1011_v22, 0.0 }
 0x20c   : > { %v5434_v25 = vpop.f32.mrf.mxu1  ;;  %5555 = vmatmul.mubr.f32.gmra.mxu0 %v1155_v21 }
 0x20d   : > { %v1156_v26 = vmax.f32 %v1006_v24, 0.0  ;;  %v1021_v28 = vadd.f32 %v5434_v25, %v6783_v7 }
 0x20e   : > { %v1015_v29 = vpop.f32.mrf.mxu1 }
 0x20f   : > { %v1016_v30 = vadd.f32 %v1015_v29, %v6783_v7  ;;  %5557 = vmatprep.mubr.f32.mxu0 %v1156_v26  ;;  %v1159_v33 = vmax.f32 %v1021_v28, 0.0  ;;  %v4515_v26 = vld [vmem:[%s8213_s1 + $0x278] sm:$0xff]  ;;  %v1197_v28 = vsub.s32 2, %v6655_v38  ;;  %v4512_v29 = vld [vmem:[%s8213_s1 + $0x260] sm:$0xff] }
 0x210   : > { %v5437_v31 = vpop.f32.mrf.mxu1  ;;  %5558 = vmatmul.mubr.f32.gmra.mxu0 %v1157_v27  ;;  %5718 = vmatprep.subr.mxu0 %v4515_v26  ;;  %v4514_v27 = vld [vmem:[%s8213_s1 + $0x270] sm:$0xff] }
 0x211   : > { %v1158_v32 = vmax.f32 %v1016_v30, 0.0  ;;  %v1031_v34 = vadd.f32 %v5437_v31, %v6783_v7  ;;  %5719 = vmatpush3.msra.mxu0 %v4515_v26  ;;  %v6895_v30 = vld [vmem:[%s8214_s2] sm:$0xff] }
 0x212   : > { %v1025_v35 = vpop.f32.mrf.mxu1  ;;  %5720 = vmatprep.subr.mxu0 %v4514_v27  ;;  %v6898_v31 = vrot.slane %v6895_v30, %v1197_v28 }
 0x213   : > { %v1026_v36 = vadd.f32 %v1025_v35, %v6783_v7  ;;  %5560 = vmatprep.mubr.f32.mxu0 %v1158_v32  ;;  %v1161_v43 = vmax.f32 %v1031_v34, 0.0  ;;  %5721 = vmatpush3.msra.mxu0 %v4514_v27 }
 0x214   : > { %v5440_v39 = vpop.f32.mrf.mxu1  ;;  %5561 = vmatmul.mubr.f32.gmra.mxu0 %v1159_v33 }
 0x215   : > { %v1160_v40 = vmax.f32 %v1026_v36, 0.0  ;;  %v1041_v44 = vadd.f32 %v5440_v39, %v6783_v7  ;;  %v4511_v36 = vld [vmem:[%s8213_s1 + $0x258] sm:$0xff] }
 0x216   : > { %v1035_v45 = vpop.f32.mrf.mxu1 }
 0x217   : > { %v1036_v46 = vadd.f32 %v1035_v45, %v6783_v7  ;;  %5563 = vmatprep.mubr.f32.mxu0 %v1160_v40  ;;  %v1163_v49 = vmax.f32 %v1041_v44, 0.0  ;;  %v4510_v40 = vld [vmem:[%s8213_s1 + $0x250] sm:$0xff]  ;;  %v4509_v44 = vld [vmem:[%s8213_s1 + $0x248] sm:$0xff] }
 0x218   : > { %v5443_v47 = vpop.f32.mrf.mxu1  ;;  %5564 = vmatmul.mubr.f32.gmra.mxu0 %v1161_v43 }
 0x219   : > { %v1162_v48 = vmax.f32 %v1036_v46, 0.0  ;;  %v1051_v50 = vadd.f32 %v5443_v47, %v6783_v7 }
 0x21a   : > { %v1045_v51 = vpop.f32.mrf.mxu1 }
 0x21b   : > { %v1046_v52 = vadd.f32 %v1045_v51, %v6783_v7  ;;  %5566 = vmatprep.mubr.f32.mxu0 %v1162_v48  ;;  %v1165_v55 = vmax.f32 %v1051_v50, 0.0 }
 0x21c   : > { %v5446_v53 = vpop.f32.mrf.mxu1  ;;  %5567 = vmatmul.mubr.f32.gmra.mxu0 %v1163_v49  ;;  %v4508_v49 = vld [vmem:[%s8213_s1 + $0x240] sm:$0xff] }
 0x21d   : > { %v1164_v54 = vmax.f32 %v1046_v52, 0.0  ;;  %v1061_v56 = vadd.f32 %v5446_v53, %v6783_v7  ;;  %v4507_v52 = vld [vmem:[%s8213_s1 + $0x238] sm:$0xff] }
 0x21e   : > { %v1055_v57 = vpop.f32.mrf.mxu1 }
 0x21f   : > { %v1056_v58 = vadd.f32 %v1055_v57, %v6783_v7  ;;  %5569 = vmatprep.mubr.f32.mxu0 %v1164_v54  ;;  %v1167_v61 = vmax.f32 %v1061_v56, 0.0  ;;  %v4506_v57 = vld [vmem:[%s8213_s1 + $0x230] sm:$0xff] }
 0x220   : > { %v5449_v59 = vpop.f32.mrf.mxu1  ;;  %5570 = vmatmul.mubr.f32.gmra.mxu0 %v1165_v55 }
 0x221   : > { %v1166_v60 = vmax.f32 %v1056_v58, 0.0  ;;  %v1071_v62 = vadd.f32 %v5449_v59, %v6783_v7 }
 0x222   : > { %v1065_v63 = vpop.f32.mrf.mxu1 }
 0x223   : > { %v1066_v0 = vadd.f32 %v1065_v63, %v6783_v7  ;;  %5572 = vmatprep.mubr.f32.mxu0 %v1166_v60  ;;  %v1169_v42 = vmax.f32 %v1071_v62, 0.0  ;;  %v4505_v60 = vld [vmem:[%s8213_s1 + $0x228] sm:$0xff] }
 0x224   : > { %v5452_v1 = vpop.f32.mrf.mxu1  ;;  %5573 = vmatmul.mubr.f32.gmra.mxu0 %v1167_v61 }
 0x225   : > { %v1168_v2 = vmax.f32 %v1066_v0, 0.0  ;;  %v1081_v3 = vadd.f32 %v5452_v1, %v6783_v7  ;;  %v4504_v1 = vld [vmem:[%s8213_s1 + $0x220] sm:$0xff] }
 0x226   : > { %v1075_v4 = vpop.f32.mrf.mxu1 }
 0x227   : > { %v1076_v5 = vadd.f32 %v1075_v4, %v6783_v7  ;;  %5575 = vmatprep.mubr.f32.mxu0 %v1168_v2  ;;  %v1171_v9 = vmax.f32 %v1081_v3, 0.0  ;;  %v4503_v3 = vld [vmem:[%s8213_s1 + $0x218] sm:$0xff] }
 0x228   : > { %v5455_v6 = vpop.f32.mrf.mxu1  ;;  %5576 = vmatmul.mubr.f32.gmra.mxu0 %v1169_v42 }
 0x229   : > { %v1170_v8 = vmax.f32 %v1076_v5, 0.0  ;;  %v1091_v10 = vadd.f32 %v5455_v6, %v6783_v7 }
 0x22a   : > { %v1085_v11 = vpop.f32.mrf.mxu1 }
 0x22b   : > { %v1086_v12 = vadd.f32 %v1085_v11, %v6783_v7  ;;  %5578 = vmatprep.mubr.f32.mxu0 %v1170_v8  ;;  %v1173_v41 = vmax.f32 %v1091_v10, 0.0 }
 0x22c   : > { %v5458_v13 = vpop.f32.mrf.mxu1  ;;  %5579 = vmatmul.mubr.f32.gmra.mxu0 %v1171_v9 }
 0x22d   : > { %v1172_v14 = vmax.f32 %v1086_v12, 0.0  ;;  %v1101_v15 = vadd.f32 %v5458_v13, %v6783_v7 }
 0x22e   : > { %v1095_v16 = vpop.f32.mrf.mxu1 }
 0x22f   : > { %v1096_v17 = vadd.f32 %v1095_v16, %v6783_v7  ;;  %5581 = vmatprep.mubr.f32.mxu0 %v1172_v14  ;;  %v1175_v20 = vmax.f32 %v1101_v15, 0.0 }
 0x230   : > { %v5461_v18 = vpop.f32.mrf.mxu1  ;;  %5582 = vmatmul.mubr.f32.gmra.mxu0 %v1173_v41 }
 0x231   : > { %v1174_v19 = vmax.f32 %v1096_v17, 0.0  ;;  %v1111_v21 = vadd.f32 %v5461_v18, %v6783_v7 }
 0x232   : > { %v1105_v22 = vpop.f32.mrf.mxu1 }
 0x233   : > { %v1106_v23 = vadd.f32 %v1105_v22, %v6783_v7  ;;  %5584 = vmatprep.mubr.f32.mxu0 %v1174_v19  ;;  %v1177_v25 = vmax.f32 %v1111_v21, 0.0  ;;  %v4513_v7 = vld [vmem:[%s8213_s1 + $0x268] sm:$0xff] }
 0x234   : > { %5585 = vmatmul.mubr.f32.gmra.mxu0 %v1175_v20  ;;  %5722 = vmatprep.subr.mxu0 %v4513_v7 }
 0x235   : > { %v1176_v24 = vmax.f32 %v1106_v23, 0.0  ;;  %5723 = vmatpush3.msra.mxu0 %v4513_v7 }
 0x236   : > { %5724 = vmatprep.subr.mxu0 %v4512_v29 }
 0x237   : > { %5587 = vmatprep.mubr.f32.mxu0 %v1176_v24  ;;  %5725 = vmatpush3.msra.mxu0 %v4512_v29 }
 0x238   : > { %5588 = vmatmul.mubr.f32.gmra.mxu0 %v1177_v25  ;;  %5726 = vmatprep.subr.mxu0 %v4511_v36 }
 0x239   : > { %5727 = vmatpush3.msra.mxu0 %v4511_v36 }
 0x23a   : > { %5728 = vmatprep.subr.mxu0 %v4510_v40 }
 0x23b   : > { %5729 = vmatpush3.msra.mxu0 %v4510_v40 }
 0x23c   : > { %5730 = vmatprep.subr.mxu0 %v4509_v44 }
 0x23d   : > { %5731 = vmatpush3.msra.mxu0 %v4509_v44 }
 0x23e   : > { %5732 = vmatprep.subr.mxu0 %v4508_v49 }
 0x23f   : > { %5733 = vmatpush3.msra.mxu0 %v4508_v49 }
 0x240   : > { %5734 = vmatprep.subr.mxu0 %v4507_v52 }
 0x241   : > { %5735 = vmatpush3.msra.mxu0 %v4507_v52 }
 0x242   : > { %5736 = vmatprep.subr.mxu0 %v4506_v57 }
 0x243   : > { %5737 = vmatpush3.msra.mxu0 %v4506_v57 }
 0x244   : > { %5738 = vmatprep.subr.mxu0 %v4505_v60 }
 0x245   : > { %5739 = vmatpush3.msra.mxu0 %v4505_v60 }
 0x246   : > { %5740 = vmatprep.subr.mxu0 %v4504_v1 }
 0x247   : > { %5741 = vmatpush3.msra.mxu0 %v4504_v1 }
 0x248   : > { %5742 = vmatprep.subr.mxu0 %v4503_v3 }
 0x249   : > { %5743 = vmatpush3.msra.mxu0 %v4503_v3 }
 0x27c   : > { %v5496_v32 = vpop.f32.mrf.mxu0 }
 0x27d   : > { %v1271_v33 = vadd.f32 %v5496_v32, %v6898_v31 }
 0x27e   : > { %v1265_v34 = vpop.f32.mrf.mxu0 }
 0x27f   : > { %v1266_v35 = vadd.f32 %v1265_v34, %v6898_v31  ;;  %v1585_v45 = vmax.f32 %v1271_v33, 0.0 }
 0x280   : > { %v5499_v39 = vpop.f32.mrf.mxu0 }
 0x281   : > { %v1584_v43 = vmax.f32 %v1266_v35, 0.0  ;;  %v1281_v46 = vadd.f32 %v5499_v39, %v6898_v31 }
 0x282   : > { %v1275_v47 = vpop.f32.mrf.mxu0 }
 0x283   : > { %v1276_v48 = vadd.f32 %v1275_v47, %v6898_v31  ;;  %5622 = vmatprep.mubr.f32.mxu1 %v1584_v43  ;;  %v1587_v53 = vmax.f32 %v1281_v46, 0.0 }
 0x284   : > { %v5502_v50 = vpop.f32.mrf.mxu0  ;;  %5623 = vmatmul.mubr.f32.vlgmr.msra.gmra.mxu1 %v1585_v45 }
 0x285   : > { %v1586_v51 = vmax.f32 %v1276_v48, 0.0  ;;  %v1291_v54 = vadd.f32 %v5502_v50, %v6898_v31 }
 0x286   : > { %v1285_v55 = vpop.f32.mrf.mxu0 }
 0x287   : > { %v1286_v56 = vadd.f32 %v1285_v55, %v6898_v31  ;;  %5625 = vmatprep.mubr.f32.mxu1 %v1586_v51  ;;  %v1589_v61 = vmax.f32 %v1291_v54, 0.0 }
 0x288   : > { %v5505_v58 = vpop.f32.mrf.mxu0  ;;  %5626 = vmatmul.mubr.f32.gmra.mxu1 %v1587_v53 }
 0x289   : > { %v1588_v59 = vmax.f32 %v1286_v56, 0.0  ;;  %v1301_v62 = vadd.f32 %v5505_v58, %v6898_v31 }
 0x28a   : > { %v1295_v63 = vpop.f32.mrf.mxu0 }
 0x28b   : > { %v1296_v0 = vadd.f32 %v1295_v63, %v6898_v31  ;;  %5628 = vmatprep.mubr.f32.mxu1 %v1588_v59  ;;  %v1591_v4 = vmax.f32 %v1301_v62, 0.0 }
 0x28c   : > { %v5508_v2 = vpop.f32.mrf.mxu0  ;;  %5629 = vmatmul.mubr.f32.gmra.mxu1 %v1589_v61 }
 0x28d   : > { %v1590_v42 = vmax.f32 %v1296_v0, 0.0  ;;  %v1311_v5 = vadd.f32 %v5508_v2, %v6898_v31 }
 0x28e   : > { %v1305_v6 = vpop.f32.mrf.mxu0 }
 0x28f   : > { %v1306_v8 = vadd.f32 %v1305_v6, %v6898_v31  ;;  %5631 = vmatprep.mubr.f32.mxu1 %v1590_v42  ;;  %v1593_v11 = vmax.f32 %v1311_v5, 0.0 }
 0x290   : > { %v5511_v9 = vpop.f32.mrf.mxu0  ;;  %5632 = vmatmul.mubr.f32.gmra.mxu1 %v1591_v4 }
 0x291   : > { %v1592_v10 = vmax.f32 %v1306_v8, 0.0  ;;  %v1321_v12 = vadd.f32 %v5511_v9, %v6898_v31 }
 0x292   : > { %v1315_v13 = vpop.f32.mrf.mxu0 }
 0x293   : > { %v1316_v14 = vadd.f32 %v1315_v13, %v6898_v31  ;;  %5634 = vmatprep.mubr.f32.mxu1 %v1592_v10  ;;  %v1595_v16 = vmax.f32 %v1321_v12, 0.0 }
 0x294   : > { %v5514_v41 = vpop.f32.mrf.mxu0  ;;  %5635 = vmatmul.mubr.f32.gmra.mxu1 %v1593_v11 }
 0x295   : > { %v1594_v15 = vmax.f32 %v1316_v14, 0.0  ;;  %v1331_v17 = vadd.f32 %v5514_v41, %v6898_v31 }
 0x296   : > { %v1325_v18 = vpop.f32.mrf.mxu0 }
 0x297   : > { %v1326_v19 = vadd.f32 %v1325_v18, %v6898_v31  ;;  %5637 = vmatprep.mubr.f32.mxu1 %v1594_v15  ;;  %v1597_v22 = vmax.f32 %v1331_v17, 0.0 }
 0x298   : > { %v5517_v20 = vpop.f32.mrf.mxu0  ;;  %5638 = vmatmul.mubr.f32.gmra.mxu1 %v1595_v16 }
 0x299   : > { %v1596_v21 = vmax.f32 %v1326_v19, 0.0  ;;  %v1341_v23 = vadd.f32 %v5517_v20, %v6898_v31 }
 0x29a   : > { %v1335_v24 = vpop.f32.mrf.mxu0 }
 0x29b   : > { %v1336_v25 = vadd.f32 %v1335_v24, %v6898_v31  ;;  %5640 = vmatprep.mubr.f32.mxu1 %v1596_v21  ;;  %v1599_v7 = vmax.f32 %v1341_v23, 0.0 }
 0x29c   : > { %v5520_v26 = vpop.f32.mrf.mxu0  ;;  %5641 = vmatmul.mubr.f32.gmra.mxu1 %v1597_v22 }
 0x29d   : > { %v1598_v27 = vmax.f32 %v1336_v25, 0.0  ;;  %v1351_v28 = vadd.f32 %v5520_v26, %v6898_v31 }
 0x29e   : > { %v1345_v29 = vpop.f32.mrf.mxu0 }
 0x29f   : > { %v1346_v32 = vadd.f32 %v1345_v29, %v6898_v31  ;;  %5643 = vmatprep.mubr.f32.mxu1 %v1598_v27  ;;  %v1601_v35 = vmax.f32 %v1351_v28, 0.0 }
 0x2a0   : > { %v5523_v33 = vpop.f32.mrf.mxu0  ;;  %5644 = vmatmul.mubr.f32.gmra.mxu1 %v1599_v7 }
 0x2a1   : > { %v1600_v34 = vmax.f32 %v1346_v32, 0.0  ;;  %v1361_v36 = vadd.f32 %v5523_v33, %v6898_v31 }
 0x2a2   : > { %v1355_v39 = vpop.f32.mrf.mxu0 }
 0x2a3   : > { %v1356_v40 = vadd.f32 %v1355_v39, %v6898_v31  ;;  %5646 = vmatprep.mubr.f32.mxu1 %v1600_v34  ;;  %v1603_v45 = vmax.f32 %v1361_v36, 0.0 }
 0x2a4   : > { %v5526_v43 = vpop.f32.mrf.mxu0  ;;  %5647 = vmatmul.mubr.f32.gmra.mxu1 %v1601_v35 }
 0x2a5   : > { %v1602_v44 = vmax.f32 %v1356_v40, 0.0  ;;  %v1371_v46 = vadd.f32 %v5526_v43, %v6898_v31 }
 0x2a6   : > { %v1365_v47 = vpop.f32.mrf.mxu0 }
 0x2a7   : > { %v1366_v48 = vadd.f32 %v1365_v47, %v6898_v31  ;;  %5649 = vmatprep.mubr.f32.mxu1 %v1602_v44  ;;  %v1605_v51 = vmax.f32 %v1371_v46, 0.0 }
 0x2a8   : > { %v5529_v49 = vpop.f32.mrf.mxu0  ;;  %5650 = vmatmul.mubr.f32.gmra.mxu1 %v1603_v45 }
 0x2a9   : > { %v1604_v50 = vmax.f32 %v1366_v48, 0.0  ;;  %v1381_v52 = vadd.f32 %v5529_v49, %v6898_v31 }
 0x2aa   : > { %v1375_v53 = vpop.f32.mrf.mxu0 }
 0x2ab   : > { %v1376_v54 = vadd.f32 %v1375_v53, %v6898_v31  ;;  %5652 = vmatprep.mubr.f32.mxu1 %v1604_v50  ;;  %v1607_v57 = vmax.f32 %v1381_v52, 0.0 }
 0x2ac   : > { %v5532_v55 = vpop.f32.mrf.mxu0  ;;  %5653 = vmatmul.mubr.f32.gmra.mxu1 %v1605_v51 }
 0x2ad   : > { %v1606_v56 = vmax.f32 %v1376_v54, 0.0  ;;  %v1391_v58 = vadd.f32 %v5532_v55, %v6898_v31 }
 0x2ae   : > { %v1385_v59 = vpop.f32.mrf.mxu0 }
 0x2af   : > { %v1386_v60 = vadd.f32 %v1385_v59, %v6898_v31  ;;  %5655 = vmatprep.mubr.f32.mxu1 %v1606_v56  ;;  %v1609_v63 = vmax.f32 %v1391_v58, 0.0 }
 0x2b0   : > { %v5535_v61 = vpop.f32.mrf.mxu0  ;;  %5656 = vmatmul.mubr.f32.gmra.mxu1 %v1607_v57 }
 0x2b1   : > { %v1608_v62 = vmax.f32 %v1386_v60, 0.0  ;;  %v1401_v0 = vadd.f32 %v5535_v61, %v6898_v31 }
 0x2b2   : > { %v1395_v1 = vpop.f32.mrf.mxu0 }
 0x2b3   : > { %v1396_v2 = vadd.f32 %v1395_v1, %v6898_v31  ;;  %5658 = vmatprep.mubr.f32.mxu1 %v1608_v62  ;;  %v1611_v4 = vmax.f32 %v1401_v0, 0.0 }
 0x2b4   : > { %v5538_v42 = vpop.f32.mrf.mxu0  ;;  %5659 = vmatmul.mubr.f32.gmra.mxu1 %v1609_v63  ;;  %v4502_v63 = vld [vmem:[%s8213_s1 + $0x210] sm:$0xff] }
 0x2b5   : > { %v1610_v3 = vmax.f32 %v1396_v2, 0.0  ;;  %v1411_v5 = vadd.f32 %v5538_v42, %v6898_v31  ;;  %5744 = vmatprep.subr.mxu0 %v4502_v63 }
 0x2b6   : > { %v1405_v6 = vpop.f32.mrf.mxu0  ;;  %5745 = vmatpush3.msra.mxu0 %v4502_v63  ;;  %v7011_v63 = vand.u32 127, %v255_v37 }
 0x2b7   : > { %v1406_v8 = vadd.f32 %v1405_v6, %v6898_v31  ;;  %5661 = vmatprep.mubr.f32.mxu1 %v1610_v3  ;;  %v1613_v11 = vmax.f32 %v1411_v5, 0.0  ;;  %v4501_v3 = vld [vmem:[%s8213_s1 + $0x208] sm:$0xff]  ;;  %v4500_v6 = vld [vmem:[%s8213_s1 + $0x200] sm:$0xff] }
 0x2b8   : > { %v5541_v9 = vpop.f32.mrf.mxu0  ;;  %5662 = vmatmul.mubr.f32.gmra.mxu1 %v1611_v4  ;;  %5746 = vmatprep.subr.mxu0 %v4501_v3  ;;  %vm2056_vm0 = vcmp.ge.s32.totalorder %v7011_v63, 96  ;;  %v4544_v63 = vld [vmem:[%s8213_s1 + $0x360] sm:$0xff] }
 0x2b9   : > { %v1612_v10 = vmax.f32 %v1406_v8, 0.0  ;;  %v1421_v12 = vadd.f32 %v5541_v9, %v6898_v31  ;;  %5747 = vmatpush3.msra.mxu0 %v4501_v3  ;;  %v4528_v3 = vld [vmem:[%s8213_s1 + $0x2e0] sm:$0xff] }
 0x2ba   : > { %v1415_v13 = vpop.f32.mrf.mxu0  ;;  %5748 = vmatprep.subr.mxu0 %v4500_v6 }
 0x2bb   : > { %v1416_v14 = vadd.f32 %v1415_v13, %v6898_v31  ;;  %5664 = vmatprep.mubr.f32.mxu1 %v1612_v10  ;;  %v1615_v16 = vmax.f32 %v1421_v12, 0.0  ;;  %5749 = vmatpush3.msra.mxu0 %v4500_v6 }
 0x2bc   : > { %v5544_v41 = vpop.f32.mrf.mxu0  ;;  %5665 = vmatmul.mubr.f32.gmra.mxu1 %v1613_v11 }
 0x2bd   : > { %v1614_v15 = vmax.f32 %v1416_v14, 0.0  ;;  %v1431_v17 = vadd.f32 %v5544_v41, %v6898_v31 }
 0x2be   : > { %v1425_v18 = vpop.f32.mrf.mxu0 }
 0x2bf   : > { %v1426_v19 = vadd.f32 %v1425_v18, %v6898_v31  ;;  %5667 = vmatprep.mubr.f32.mxu1 %v1614_v15  ;;  %v1617_v22 = vmax.f32 %v1431_v17, 0.0 }
 0x2c0   : > { %v5547_v20 = vpop.f32.mrf.mxu0  ;;  %5668 = vmatmul.mubr.f32.gmra.mxu1 %v1615_v16 }
 0x2c1   : > { %v1616_v21 = vmax.f32 %v1426_v19, 0.0  ;;  %v1441_v23 = vadd.f32 %v5547_v20, %v6898_v31 }
 0x2c2   : > { %v1435_v24 = vpop.f32.mrf.mxu0 }
 0x2c3   : > { %v1436_v25 = vadd.f32 %v1435_v24, %v6898_v31  ;;  %5670 = vmatprep.mubr.f32.mxu1 %v1616_v21  ;;  %v1619_v7 = vmax.f32 %v1441_v23, 0.0 }
 0x2c4   : > { %v5550_v26 = vpop.f32.mrf.mxu0  ;;  %5671 = vmatmul.mubr.f32.gmra.mxu1 %v1617_v22 }
 0x2c5   : > { %v1618_v27 = vmax.f32 %v1436_v25, 0.0  ;;  %v1451_v28 = vadd.f32 %v5550_v26, %v6898_v31 }
 0x2c6   : > { %v1445_v29 = vpop.f32.mrf.mxu0 }
 0x2c7   : > { %v1446_v32 = vadd.f32 %v1445_v29, %v6898_v31  ;;  %5673 = vmatprep.mubr.f32.mxu1 %v1618_v27  ;;  %v1621_v35 = vmax.f32 %v1451_v28, 0.0 }
 0x2c8   : > { %v5553_v33 = vpop.f32.mrf.mxu0  ;;  %5674 = vmatmul.mubr.f32.gmra.mxu1 %v1619_v7 }
 0x2c9   : > { %v1620_v34 = vmax.f32 %v1446_v32, 0.0  ;;  %v1461_v36 = vadd.f32 %v5553_v33, %v6898_v31 }
 0x2ca   : > { %v1455_v39 = vpop.f32.mrf.mxu0 }
 0x2cb   : > { %v1456_v40 = vadd.f32 %v1455_v39, %v6898_v31  ;;  %5676 = vmatprep.mubr.f32.mxu1 %v1620_v34  ;;  %v1623_v45 = vmax.f32 %v1461_v36, 0.0 }
 0x2cc   : > { %v5556_v43 = vpop.f32.mrf.mxu0  ;;  %5677 = vmatmul.mubr.f32.gmra.mxu1 %v1621_v35 }
 0x2cd   : > { %v1622_v44 = vmax.f32 %v1456_v40, 0.0  ;;  %v1471_v46 = vadd.f32 %v5556_v43, %v6898_v31 }
 0x2ce   : > { %v1465_v47 = vpop.f32.mrf.mxu0 }
 0x2cf   : > { %v1466_v48 = vadd.f32 %v1465_v47, %v6898_v31  ;;  %5679 = vmatprep.mubr.f32.mxu1 %v1622_v44  ;;  %v1625_v51 = vmax.f32 %v1471_v46, 0.0 }
 0x2d0   : > { %v5559_v49 = vpop.f32.mrf.mxu0  ;;  %5680 = vmatmul.mubr.f32.gmra.mxu1 %v1623_v45 }
 0x2d1   : > { %v1624_v50 = vmax.f32 %v1466_v48, 0.0  ;;  %v1481_v52 = vadd.f32 %v5559_v49, %v6898_v31 }
 0x2d2   : > { %v1475_v53 = vpop.f32.mrf.mxu0 }
 0x2d3   : > { %v1476_v54 = vadd.f32 %v1475_v53, %v6898_v31  ;;  %5682 = vmatprep.mubr.f32.mxu1 %v1624_v50  ;;  %v1627_v57 = vmax.f32 %v1481_v52, 0.0 }
 0x2d4   : > { %v5562_v55 = vpop.f32.mrf.mxu0  ;;  %5683 = vmatmul.mubr.f32.gmra.mxu1 %v1625_v51 }
 0x2d5   : > { %v1626_v56 = vmax.f32 %v1476_v54, 0.0  ;;  %v1491_v58 = vadd.f32 %v5562_v55, %v6898_v31 }
 0x2d6   : > { %v1485_v59 = vpop.f32.mrf.mxu0 }
 0x2d7   : > { %v1486_v60 = vadd.f32 %v1485_v59, %v6898_v31  ;;  %5685 = vmatprep.mubr.f32.mxu1 %v1626_v56  ;;  %v1629_v0 = vmax.f32 %v1491_v58, 0.0 }
 0x2d8   : > { %v5565_v61 = vpop.f32.mrf.mxu0  ;;  %5686 = vmatmul.mubr.f32.gmra.mxu1 %v1627_v57 }
 0x2d9   : > { %v1628_v62 = vmax.f32 %v1486_v60, 0.0  ;;  %v1501_v1 = vadd.f32 %v5565_v61, %v6898_v31  ;;  %v4531_v60 = vld [vmem:[%s8213_s1 + $0x2f8] sm:$0xff]  ;;  %v4530_v61 = vld [vmem:[%s8213_s1 + $0x2f0] sm:$0xff] }
 0x2da   : > { %v1495_v2 = vpop.f32.mrf.mxu0  ;;  %5846 = vmatprep.subr.mxu1 %v4531_v60 }
 0x2db   : > { %v1496_v42 = vadd.f32 %v1495_v2, %v6898_v31  ;;  %5688 = vmatprep.mubr.f32.mxu1 %v1628_v62  ;;  %v1631_v8 = vmax.f32 %v1501_v1, 0.0  ;;  %5847 = vmatpush3.msra.mxu1 %v4531_v60  ;;  %v4529_v62 = vld [vmem:[%s8213_s1 + $0x2e8] sm:$0xff] }
 0x2dc   : > { %v5568_v4 = vpop.f32.mrf.mxu0  ;;  %5689 = vmatmul.mubr.f32.gmra.mxu1 %v1629_v0  ;;  %5848 = vmatprep.subr.mxu1 %v4530_v61 }
 0x2dd   : > { %v1630_v5 = vmax.f32 %v1496_v42, 0.0  ;;  %v1511_v9 = vadd.f32 %v5568_v4, %v6898_v31  ;;  %5849 = vmatpush3.msra.mxu1 %v4530_v61 }
 0x2de   : > { %v1505_v10 = vpop.f32.mrf.mxu0  ;;  %5850 = vmatprep.subr.mxu1 %v4529_v62 }
 0x2df   : > { %v1506_v11 = vadd.f32 %v1505_v10, %v6898_v31  ;;  %5691 = vmatprep.mubr.f32.mxu1 %v1630_v5  ;;  %v1633_v14 = vmax.f32 %v1511_v9, 0.0  ;;  %5851 = vmatpush3.msra.mxu1 %v4529_v62 }
 0x2e0   : > { %v5571_v12 = vpop.f32.mrf.mxu0  ;;  %5692 = vmatmul.mubr.f32.gmra.mxu1 %v1631_v8  ;;  %5852 = vmatprep.subr.mxu1 %v4528_v3 }
 0x2e1   : > { %v1632_v13 = vmax.f32 %v1506_v11, 0.0  ;;  %v1521_v41 = vadd.f32 %v5571_v12, %v6898_v31  ;;  %5853 = vmatpush3.msra.mxu1 %v4528_v3  ;;  %v4527_v12 = vld [vmem:[%s8213_s1 + $0x2d8] sm:$0xff] }
 0x2e2   : > { %v1515_v15 = vpop.f32.mrf.mxu0  ;;  %5854 = vmatprep.subr.mxu1 %v4527_v12 }
 0x2e3   : > { %v1516_v16 = vadd.f32 %v1515_v15, %v6898_v31  ;;  %5694 = vmatprep.mubr.f32.mxu1 %v1632_v13  ;;  %v1635_v19 = vmax.f32 %v1521_v41, 0.0  ;;  %5855 = vmatpush3.msra.mxu1 %v4527_v12  ;;  %v4523_v12 = vld [vmem:[%s8213_s1 + $0x2b8] sm:$0xff] }
 0x2e4   : > { %v5574_v17 = vpop.f32.mrf.mxu0  ;;  %5695 = vmatmul.mubr.f32.gmra.mxu1 %v1633_v14 }
 0x2e5   : > { %v1634_v18 = vmax.f32 %v1516_v16, 0.0  ;;  %v1531_v20 = vadd.f32 %v5574_v17, %v6898_v31 }
 0x2e6   : > { %v1525_v21 = vpop.f32.mrf.mxu0 }
 0x2e7   : > { %v1526_v22 = vadd.f32 %v1525_v21, %v6898_v31  ;;  %5697 = vmatprep.mubr.f32.mxu1 %v1634_v18  ;;  %v1637_v25 = vmax.f32 %v1531_v20, 0.0 }
 0x2e8   : > { %v5577_v23 = vpop.f32.mrf.mxu0  ;;  %5698 = vmatmul.mubr.f32.gmra.mxu1 %v1635_v19 }
 0x2e9   : > { %v1636_v24 = vmax.f32 %v1526_v22, 0.0  ;;  %v1541_v26 = vadd.f32 %v5577_v23, %v6898_v31 }
 0x2ea   : > { %v1535_v27 = vpop.f32.mrf.mxu0 }
 0x2eb   : > { %v1536_v7 = vadd.f32 %v1535_v27, %v6898_v31  ;;  %5700 = vmatprep.mubr.f32.mxu1 %v1636_v24  ;;  %v1639_v32 = vmax.f32 %v1541_v26, 0.0  ;;  %v4526_v24 = vld [vmem:[%s8213_s1 + $0x2d0] sm:$0xff] }
 0x2ec   : > { %v5580_v28 = vpop.f32.mrf.mxu0  ;;  %5701 = vmatmul.mubr.f32.gmra.mxu1 %v1637_v25  ;;  %5856 = vmatprep.subr.mxu1 %v4526_v24 }
 0x2ed   : > { %v1638_v29 = vmax.f32 %v1536_v7, 0.0  ;;  %v1551_v33 = vadd.f32 %v5580_v28, %v6898_v31  ;;  %5857 = vmatpush3.msra.mxu1 %v4526_v24 }
 0x2ee   : > { %v1545_v34 = vpop.f32.mrf.mxu0 }
 0x2ef   : > { %v1546_v35 = vadd.f32 %v1545_v34, %v6898_v31  ;;  %5703 = vmatprep.mubr.f32.mxu1 %v1638_v29  ;;  %v1641_v40 = vmax.f32 %v1551_v33, 0.0 }
 0x2f0   : > { %v5583_v36 = vpop.f32.mrf.mxu0  ;;  %5704 = vmatmul.mubr.f32.gmra.mxu1 %v1639_v32 }
 0x2f1   : > { %v1640_v39 = vmax.f32 %v1546_v35, 0.0  ;;  %v1561_v43 = vadd.f32 %v5583_v36, %v6898_v31 }
 0x2f2   : > { %v1555_v44 = vpop.f32.mrf.mxu0 }
 0x2f3   : > { %v1556_v45 = vadd.f32 %v1555_v44, %v6898_v31  ;;  %5706 = vmatprep.mubr.f32.mxu1 %v1640_v39  ;;  %v1643_v48 = vmax.f32 %v1561_v43, 0.0 }
 0x2f4   : > { %v5586_v46 = vpop.f32.mrf.mxu0  ;;  %5707 = vmatmul.mubr.f32.gmra.mxu1 %v1641_v40 }
 0x2f5   : > { %v1642_v47 = vmax.f32 %v1556_v45, 0.0  ;;  %v1571_v49 = vadd.f32 %v5586_v46, %v6898_v31 }
 0x2f6   : > { %v1565_v50 = vpop.f32.mrf.mxu0 }
 0x2f7   : > { %v1566_v51 = vadd.f32 %v1565_v50, %v6898_v31  ;;  %5709 = vmatprep.mubr.f32.mxu1 %v1642_v47  ;;  %v1645_v54 = vmax.f32 %v1571_v49, 0.0  ;;  %v4525_v50 = vld [vmem:[%s8213_s1 + $0x2c8] sm:$0xff] }
 0x2f8   : > { %v5589_v52 = vpop.f32.mrf.mxu0  ;;  %5710 = vmatmul.mubr.f32.gmra.mxu1 %v1643_v48  ;;  %5858 = vmatprep.subr.mxu1 %v4525_v50 }
 0x2f9   : > { %v1644_v53 = vmax.f32 %v1566_v51, 0.0  ;;  %v1581_v55 = vadd.f32 %v5589_v52, %v6898_v31  ;;  %5859 = vmatpush3.msra.mxu1 %v4525_v50 }
 0x2fa   : > { %v1575_v56 = vpop.f32.mrf.mxu0 }
 0x2fb   : > { %v1576_v57 = vadd.f32 %v1575_v56, %v6898_v31  ;;  %5712 = vmatprep.mubr.f32.mxu1 %v1644_v53  ;;  %v1647_v59 = vmax.f32 %v1581_v55, 0.0  ;;  %v1667_v31 = vsub.s32 3, %v6655_v38 }
 0x2fc   : > { %5713 = vmatmul.mubr.f32.gmra.mxu1 %v1645_v54 }
 0x2fd   : > { %v1646_v58 = vmax.f32 %v1576_v57, 0.0  ;;  %v7014_v0 = vrot.slane %v6895_v30, %v1667_v31  ;;  %v6367_v57 = vld [vmem:[%s6492_s28 + $0x8] sm:$0xff] }
 0x2ff   : > { %5715 = vmatprep.mubr.f32.mxu1 %v1646_v58 }
 0x300   : > { %5716 = vmatmul.mubr.f32.gmra.mxu1 %v1647_v59 }
 0x344   : > { %v5624_v1 = vpop.f32.mrf.mxu1 }
 0x345   : > { %v7018_v2 = vadd.f32 %v5624_v1, %v7014_v0 }
 0x346   : > { %v1735_v42 = vpop.f32.mrf.mxu1 }
 0x347   : > { %v2060_v37 = vsel %vm2056_vm0, %v7018_v2, 0.0  ;;  %v7027_v4 = vadd.f32 %v1735_v42, %v7014_v0 }
 0x348   : > { %v2124_v30 = vmul.f32 0.5, %v2060_v37  ;;  %v5627_v5 = vpop.f32.mrf.mxu1 }
 0x349   : > { %v2059_v6 = vsel %vm2056_vm0, %v7027_v4, 0.0  ;;  %v7033_v8 = vadd.f32 %v5627_v5, %v7014_v0 }
 0x34a   : > { %v2189_v9 = vmul.f32 1.442695, %v2124_v30  ;;  %v2123_v10 = vmul.f32 0.5, %v2059_v6  ;;  %v1745_v11 = vpop.f32.mrf.mxu1 }
 0x34b   : > { %v2062_v13 = vsel %vm2056_vm0, %v7033_v8, 0.0  ;;  %v7042_v14 = vadd.f32 %v1745_v11, %v7014_v0  ;;  %v4524_v11 = vld [vmem:[%s8213_s1 + $0x2c0] sm:$0xff] }
 0x34c   : > { %6238 = vpow2.f32 %v2189_v9  ;;  %v2187_v41 = vmul.f32 1.442695, %v2123_v10  ;;  %v2126_v15 = vmul.f32 0.5, %v2062_v13  ;;  %v5630_v16 = vpop.f32.mrf.mxu1  ;;  %v6368_v9 = vld [vmem:[%s6492_s28] sm:$0xff]  ;;  %5860 = vmatprep.subr.mxu1 %v4524_v11 }
 0x34d   : > { %v2061_v17 = vsel %vm2056_vm0, %v7042_v14, 0.0  ;;  %v7048_v18 = vadd.f32 %v5630_v16, %v7014_v0  ;;  %5861 = vmatpush3.msra.mxu1 %v4524_v11 }
 0x34e   : > { %6240 = vpow2.f32 %v2187_v41  ;;  %v2193_v19 = vmul.f32 1.442695, %v2126_v15  ;;  %v2125_v20 = vmul.f32 0.5, %v2061_v17  ;;  %v1755_v21 = vpop.f32.mrf.mxu1  ;;  %5862 = vmatprep.subr.mxu1 %v4523_v12 }
 0x34f   : > { %v2064_v22 = vsel %vm2056_vm0, %v7048_v18, 0.0  ;;  %v7054_v23 = vadd.f32 %v1755_v21, %v7014_v0  ;;  %5863 = vmatpush3.msra.mxu1 %v4523_v12 }
 0x350   : > { %6242 = vpow2.f32 %v2193_v19  ;;  %v2191_v25 = vmul.f32 1.442695, %v2125_v20  ;;  %v2128_v26 = vmul.f32 0.5, %v2064_v22  ;;  %v5633_v27 = vpop.f32.mrf.mxu1  ;;  %v6369_v22 = vld [vmem:[%s6492_s28 + $0x18] sm:$0xff] }
 0x351   : > { %v2063_v7 = vsel %vm2056_vm0, %v7054_v23, 0.0  ;;  %v7063_v28 = vadd.f32 %v5633_v27, %v7014_v0 }
 0x352   : > { %6244 = vpow2.f32 %v2191_v25  ;;  %v2197_v29 = vmul.f32 1.442695, %v2128_v26  ;;  %v2127_v32 = vmul.f32 0.5, %v2063_v7  ;;  %v1765_v33 = vpop.f32.mrf.mxu1  ;;  %v4522_v25 = vld [vmem:[%s8213_s1 + $0x2b0] sm:$0xff] }
 0x353   : > { %v2066_v34 = vsel %vm2056_vm0, %v7063_v28, 0.0  ;;  %v7069_v35 = vadd.f32 %v1765_v33, %v7014_v0  ;;  %5864 = vmatprep.subr.mxu1 %v4522_v25 }
 0x354   : > { %6246 = vpow2.f32 %v2197_v29  ;;  %v2195_v36 = vmul.f32 1.442695, %v2127_v32  ;;  %v2130_v39 = vmul.f32 0.5, %v2066_v34  ;;  %v5636_v40 = vpop.f32.mrf.mxu1  ;;  %v6370_v29 = vld [vmem:[%s6492_s28 + $0x10] sm:$0xff]  ;;  %5865 = vmatpush3.msra.mxu1 %v4522_v25 }
 0x355   : > { %v2065_v43 = vsel %vm2056_vm0, %v7069_v35, 0.0  ;;  %v7075_v44 = vadd.f32 %v5636_v40, %v7014_v0 }
 0x356   : > { %6248 = vpow2.f32 %v2195_v36  ;;  %v2201_v45 = vmul.f32 1.442695, %v2130_v39  ;;  %v2129_v46 = vmul.f32 0.5, %v2065_v43  ;;  %v1775_v47 = vpop.f32.mrf.mxu1  ;;  %v4521_v39 = vld [vmem:[%s8213_s1 + $0x2a8] sm:$0xff] }
 0x357   : > { %v2068_v48 = vsel %vm2056_vm0, %v7075_v44, 0.0  ;;  %v7081_v49 = vadd.f32 %v1775_v47, %v7014_v0  ;;  %5866 = vmatprep.subr.mxu1 %v4521_v39 }
 0x358   : > { %6250 = vpow2.f32 %v2201_v45  ;;  %v2199_v51 = vmul.f32 1.442695, %v2129_v46  ;;  %v2132_v52 = vmul.f32 0.5, %v2068_v48  ;;  %v5639_v53 = vpop.f32.mrf.mxu1  ;;  %5867 = vmatpush3.msra.mxu1 %v4521_v39 }
 0x359   : > { %v6239_v54 = vpop.eup %6238  ;;  %v2067_v55 = vsel %vm2056_vm0, %v7081_v49, 0.0  ;;  %v7090_v56 = vadd.f32 %v5639_v53, %v7014_v0 }
 0x35a   : > { %v2316_v58 = vmul.f32 %v6367_v57, %v6239_v54  ;;  %6252 = vpow2.f32 %v2199_v51  ;;  %v2205_v59 = vmul.f32 1.442695, %v2132_v52  ;;  %v2131_v60 = vmul.f32 0.5, %v2067_v55  ;;  %v1785_v61 = vpop.f32.mrf.mxu1  ;;  %v6371_v52 = vld [vmem:[%s6492_s28 + $0x28] sm:$0xff]  ;;  %v4520_v54 = vld [vmem:[%s8213_s1 + $0x2a0] sm:$0xff] }
 0x35b   : > { %v6241_v31 = vpop.eup %6240  ;;  %v2070_v62 = vsel %vm2056_vm0, %v7090_v56, 0.0  ;;  %v7097_v1 = vadd.f32 %v1785_v61, %v7014_v0  ;;  %5868 = vmatprep.subr.mxu1 %v4520_v54 }
 0x35c   : > { %6254 = vpow2.f32 %v2205_v59  ;;  %v2203_v42 = vmul.f32 1.442695, %v2131_v60  ;;  %v2134_v3 = vmul.f32 0.5, %v2070_v62  ;;  %v5642_v37 = vpop.f32.mrf.mxu1  ;;  %v2315_v10 = vmul.f32 %v6368_v9, %v6241_v31  ;;  %v6372_v59 = vld [vmem:[%s6492_s28 + $0x20] sm:$0xff]  ;;  %5869 = vmatpush3.msra.mxu1 %v4520_v54 }
 0x35d   : > { %v6243_v30 = vpop.eup %6242  ;;  %v2069_v5 = vsel %vm2056_vm0, %v7097_v1, 0.0  ;;  %v7103_v6 = vadd.f32 %v5642_v37, %v7014_v0  ;;  %v2380_v13 = vsel %vm2056_vm0, %v2316_v58, %v7018_v2 }
 0x35e   : > { %6256 = vpow2.f32 %v2203_v42  ;;  %v2209_v41 = vmul.f32 1.442695, %v2134_v3  ;;  %v2133_v15 = vmul.f32 0.5, %v2069_v5  ;;  %v1795_v16 = vpop.f32.mrf.mxu1  ;;  %v2379_v21 = vsel %vm2056_vm0, %v2315_v10, %v7027_v4  ;;  %v4519_v42 = vld [vmem:[%s8213_s1 + $0x298] sm:$0xff] }
 0x35f   : > { %v6245_v17 = vpop.eup %6244  ;;  %v2072_v19 = vsel %vm2056_vm0, %v7103_v6, 0.0  ;;  %v7119_v20 = vadd.f32 %v1795_v16, %v7014_v0  ;;  %v2318_v24 = vmul.f32 %v6369_v22, %v6243_v30  ;;  %5750 = vmatprep.mubr.f32.mxu0 %v2379_v21  ;;  %v6374_v21 = vld [vmem:[%s6492_s28 + $0x30] sm:$0xff]  ;;  %5870 = vmatprep.subr.mxu1 %v4519_v42 }
 0x360   : > { %6258 = vpow2.f32 %v2209_v41  ;;  %v2207_v26 = vmul.f32 1.442695, %v2133_v15  ;;  %v2136_v27 = vmul.f32 0.5, %v2072_v19  ;;  %v5645_v7 = vpop.f32.mrf.mxu1  ;;  %v2317_v32 = vmul.f32 %v6370_v29, %v6245_v17  ;;  %5751 = vmatmul.mubr.f32.vlgmr.msra.gmra.mxu0 %v2380_v13  ;;  %v6373_v13 = vld [vmem:[%s6492_s28 + $0x38] sm:$0xff]  ;;  %v4518_v15 = vld [vmem:[%s8213_s1 + $0x290] sm:$0xff]  ;;  %5871 = vmatpush3.msra.mxu1 %v4519_v42 }
 0x361   : > { %v6247_v33 = vpop.eup %6246  ;;  %v2071_v34 = vsel %vm2056_vm0, %v7119_v20, 0.0  ;;  %v7133_v36 = vadd.f32 %v5645_v7, %v7014_v0  ;;  %v2382_v51 = vsel %vm2056_vm0, %v2318_v24, %v7033_v8  ;;  %5872 = vmatprep.subr.mxu1 %v4518_v15 }
 0x362   : > { %6260 = vpow2.f32 %v2207_v26  ;;  %v2213_v40 = vmul.f32 1.442695, %v2136_v27  ;;  %v2135_v43 = vmul.f32 0.5, %v2071_v34  ;;  %v1805_v45 = vpop.f32.mrf.mxu1  ;;  %v2381_v46 = vsel %vm2056_vm0, %v2317_v32, %v7042_v14  ;;  %v4517_v27 = vld [vmem:[%s8213_s1 + $0x288] sm:$0xff]  ;;  %5873 = vmatpush3.msra.mxu1 %v4518_v15 }
 0x363   : > { %v6249_v47 = vpop.eup %6248  ;;  %v2074_v48 = vsel %vm2056_vm0, %v7133_v36, 0.0  ;;  %v7145_v50 = vadd.f32 %v1805_v45, %v7014_v0  ;;  %5753 = vmatprep.mubr.f32.mxu0 %v2381_v46  ;;  %v2320_v53 = vmul.f32 %v6371_v52, %v6247_v33  ;;  %v6375_v45 = vld [vmem:[%s6492_s28 + $0x48] sm:$0xff]  ;;  %5874 = vmatprep.subr.mxu1 %v4517_v27 }
 0x364   : > { %6262 = vpow2.f32 %v2213_v40  ;;  %v2211_v55 = vmul.f32 1.442695, %v2135_v43  ;;  %v2138_v57 = vmul.f32 0.5, %v2074_v48  ;;  %v5648_v58 = vpop.f32.mrf.mxu1  ;;  %v2319_v60 = vmul.f32 %v6372_v59, %v6249_v47  ;;  %5754 = vmatmul.mubr.f32.gmra.mxu0 %v2382_v51  ;;  %v4516_v47 = vld [vmem:[%s8213_s1 + $0x280] sm:$0xff]  ;;  %5875 = vmatpush3.msra.mxu1 %v4517_v27 }
 0x365   : > { %v6251_v61 = vpop.eup %6250  ;;  %v2073_v31 = vsel %vm2056_vm0, %v7145_v50, 0.0  ;;  %v7159_v62 = vadd.f32 %v5648_v58, %v7014_v0  ;;  %v2384_v12 = vsel %vm2056_vm0, %v2320_v53, %v7048_v18  ;;  %v6376_v53 = vld [vmem:[%s6492_s28 + $0x40] sm:$0xff]  ;;  %5876 = vmatprep.subr.mxu1 %v4516_v47 }
 0x366   : > { %6264 = vpow2.f32 %v2211_v55  ;;  %v2217_v3 = vmul.f32 1.442695, %v2138_v57  ;;  %v2137_v37 = vmul.f32 0.5, %v2073_v31  ;;  %v1815_v30 = vpop.f32.mrf.mxu1  ;;  %v2383_v5 = vsel %vm2056_vm0, %v2319_v60, %v7054_v23  ;;  %5877 = vmatpush3.msra.mxu1 %v4516_v47 }
 0x367   : > { %v6253_v9 = vpop.eup %6252  ;;  %v2076_v10 = vsel %vm2056_vm0, %v7159_v62, 0.0  ;;  %v7171_v11 = vadd.f32 %v1815_v30, %v7014_v0  ;;  %5756 = vmatprep.mubr.f32.mxu0 %v2383_v5  ;;  %v2322_v41 = vmul.f32 %v6373_v13, %v6251_v61  ;;  %v6377_v5 = vld [vmem:[%s6492_s28 + $0x58] sm:$0xff] }
 0x368   : > { %6266 = vpow2.f32 %v2217_v3  ;;  %v2215_v16 = vmul.f32 1.442695, %v2137_v37  ;;  %v2140_v17 = vmul.f32 0.5, %v2076_v10  ;;  %v5651_v19 = vpop.f32.mrf.mxu1  ;;  %v2321_v22 = vmul.f32 %v6374_v21, %v6253_v9  ;;  %5757 = vmatmul.mubr.f32.gmra.mxu0 %v2384_v12 }
 0x369   : > { %v6255_v24 = vpop.eup %6254  ;;  %v2075_v25 = vsel %vm2056_vm0, %v7171_v11, 0.0  ;;  %v7185_v26 = vadd.f32 %v5651_v19, %v7014_v0  ;;  %v2386_v43 = vsel %vm2056_vm0, %v2322_v41, %v7063_v28  ;;  %v6378_v41 = vld [vmem:[%s6492_s28 + $0x50] sm:$0xff] }
 0x36a   : > { %6268 = vpow2.f32 %v2215_v16  ;;  %v2221_v7 = vmul.f32 1.442695, %v2140_v17  ;;  %v2139_v29 = vmul.f32 0.5, %v2075_v25  ;;  %v1825_v32 = vpop.f32.mrf.mxu1  ;;  %v2385_v33 = vsel %vm2056_vm0, %v2321_v22, %v7069_v35 }
 0x36b   : > { %v6257_v34 = vpop.eup %6256  ;;  %v2078_v39 = vsel %vm2056_vm0, %v7185_v26, 0.0  ;;  %v7197_v40 = vadd.f32 %v1825_v32, %v7014_v0  ;;  %5759 = vmatprep.mubr.f32.mxu0 %v2385_v33  ;;  %v2324_v46 = vmul.f32 %v6375_v45, %v6255_v24  ;;  %v6379_v33 = vld [vmem:[%s6492_s28 + $0x68] sm:$0xff] }
 0x36c   : > { %6270 = vpow2.f32 %v2221_v7  ;;  %v2219_v48 = vmul.f32 1.442695, %v2139_v29  ;;  %v2142_v51 = vmul.f32 0.5, %v2078_v39  ;;  %v5654_v52 = vpop.f32.mrf.mxu1  ;;  %v2323_v54 = vmul.f32 %v6376_v53, %v6257_v34  ;;  %5760 = vmatmul.mubr.f32.gmra.mxu0 %v2386_v43 }
 0x36d   : > { %v6259_v55 = vpop.eup %6258  ;;  %v2077_v57 = vsel %vm2056_vm0, %v7197_v40, 0.0  ;;  %v7211_v58 = vadd.f32 %v5654_v52, %v7014_v0  ;;  %v2388_v30 = vsel %vm2056_vm0, %v2324_v46, %v7075_v44  ;;  %v6380_v46 = vld [vmem:[%s6492_s28 + $0x60] sm:$0xff] }
 0x36e   : > { %6272 = vpow2.f32 %v2219_v48  ;;  %v2225_v59 = vmul.f32 1.442695, %v2142_v51  ;;  %v2141_v60 = vmul.f32 0.5, %v2077_v57  ;;  %v1835_v61 = vpop.f32.mrf.mxu1  ;;  %v2387_v31 = vsel %vm2056_vm0, %v2323_v54, %v7081_v49 }
 0x36f   : > { %v6261_v42 = vpop.eup %6260  ;;  %v2080_v3 = vsel %vm2056_vm0, %v7211_v58, 0.0  ;;  %v7220_v37 = vadd.f32 %v1835_v61, %v7014_v0  ;;  %5762 = vmatprep.mubr.f32.mxu0 %v2387_v31  ;;  %v2326_v9 = vmul.f32 %v6377_v5, %v6259_v55 }
 0x370   : > { %6274 = vpow2.f32 %v2225_v59  ;;  %v2223_v10 = vmul.f32 1.442695, %v2141_v60  ;;  %v2144_v12 = vmul.f32 0.5, %v2080_v3  ;;  %v5657_v13 = vpop.f32.mrf.mxu1  ;;  %v2325_v15 = vmul.f32 %v6378_v41, %v6261_v42  ;;  %5763 = vmatmul.mubr.f32.gmra.mxu0 %v2388_v30  ;;  %v6381_v42 = vld [vmem:[%s6492_s28 + $0x78] sm:$0xff] }
 0x371   : > { %v6263_v16 = vpop.eup %6262  ;;  %v2079_v17 = vsel %vm2056_vm0, %v7220_v37, 0.0  ;;  %v7231_v19 = vadd.f32 %v5657_v13, %v7014_v0  ;;  %v2390_v32 = vsel %vm2056_vm0, %v2326_v9, %v7090_v56 }
 0x372   : > { %6276 = vpow2.f32 %v2223_v10  ;;  %v2229_v21 = vmul.f32 1.442695, %v2144_v12  ;;  %v2143_v22 = vmul.f32 0.5, %v2079_v17  ;;  %v1845_v24 = vpop.f32.mrf.mxu1  ;;  %v2389_v25 = vsel %vm2056_vm0, %v2325_v15, %v7097_v1  ;;  %v6382_v10 = vld [vmem:[%s6492_s28 + $0x70] sm:$0xff] }
 0x373   : > { %v6265_v27 = vpop.eup %6264  ;;  %v2082_v7 = vsel %vm2056_vm0, %v7231_v19, 0.0  ;;  %v7240_v29 = vadd.f32 %v1845_v24, %v7014_v0  ;;  %5765 = vmatprep.mubr.f32.mxu0 %v2389_v25  ;;  %v2328_v34 = vmul.f32 %v6379_v33, %v6263_v16 }
 0x374   : > { %6278 = vpow2.f32 %v2229_v21  ;;  %v2227_v39 = vmul.f32 1.442695, %v2143_v22  ;;  %v2146_v43 = vmul.f32 0.5, %v2082_v7  ;;  %v5660_v45 = vpop.f32.mrf.mxu1  ;;  %v2327_v47 = vmul.f32 %v6380_v46, %v6265_v27  ;;  %5766 = vmatmul.mubr.f32.gmra.mxu0 %v2390_v32  ;;  %v6383_v32 = vld [vmem:[%s6492_s28 + $0x88] sm:$0xff] }
 0x375   : > { %v6267_v48 = vpop.eup %6266  ;;  %v2081_v51 = vsel %vm2056_vm0, %v7240_v29, 0.0  ;;  %v7251_v52 = vadd.f32 %v5660_v45, %v7014_v0  ;;  %v2392_v31 = vsel %vm2056_vm0, %v2328_v34, %v7103_v6  ;;  %v6384_v45 = vld [vmem:[%s6492_s28 + $0x80] sm:$0xff] }
 0x376   : > { %6280 = vpow2.f32 %v2227_v39  ;;  %v2233_v53 = vmul.f32 1.442695, %v2146_v43  ;;  %v2145_v54 = vmul.f32 0.5, %v2081_v51  ;;  %v1855_v55 = vpop.f32.mrf.mxu1  ;;  %v2391_v57 = vsel %vm2056_vm0, %v2327_v47, %v7119_v20 }
 0x377   : > { %v6269_v59 = vpop.eup %6268  ;;  %v2084_v60 = vsel %vm2056_vm0, %v7251_v52, 0.0  ;;  %v7260_v61 = vadd.f32 %v1855_v55, %v7014_v0  ;;  %5768 = vmatprep.mubr.f32.mxu0 %v2391_v57  ;;  %v2330_v3 = vmul.f32 %v6381_v42, %v6267_v48 }
 0x378   : > { %6282 = vpow2.f32 %v2233_v53  ;;  %v2231_v30 = vmul.f32 1.442695, %v2145_v54  ;;  %v2148_v5 = vmul.f32 0.5, %v2084_v60  ;;  %v5663_v9 = vpop.f32.mrf.mxu1  ;;  %v2329_v12 = vmul.f32 %v6382_v10, %v6269_v59  ;;  %5769 = vmatmul.mubr.f32.gmra.mxu0 %v2392_v31 }
 0x379   : > { %v6271_v13 = vpop.eup %6270  ;;  %v2083_v41 = vsel %vm2056_vm0, %v7260_v61, 0.0  ;;  %v7271_v15 = vadd.f32 %v5663_v9, %v7014_v0  ;;  %v2394_v7 = vsel %vm2056_vm0, %v2330_v3, %v7133_v36  ;;  %v6385_v3 = vld [vmem:[%s6492_s28 + $0x98] sm:$0xff] }
 0x37a   : > { %6284 = vpow2.f32 %v2231_v30  ;;  %v2237_v16 = vmul.f32 1.442695, %v2148_v5  ;;  %v2147_v17 = vmul.f32 0.5, %v2083_v41  ;;  %v1865_v21 = vpop.f32.mrf.mxu1  ;;  %v2393_v22 = vsel %vm2056_vm0, %v2329_v12, %v7145_v50  ;;  %v6386_v12 = vld [vmem:[%s6492_s28 + $0x90] sm:$0xff] }
 0x37b   : > { %v6273_v24 = vpop.eup %6272  ;;  %v2086_v25 = vsel %vm2056_vm0, %v7271_v15, 0.0  ;;  %v7280_v27 = vadd.f32 %v1865_v21, %v7014_v0  ;;  %5771 = vmatprep.mubr.f32.mxu0 %v2393_v22  ;;  %v2332_v33 = vmul.f32 %v6383_v32, %v6271_v13 }
 0x37c   : > { %6286 = vpow2.f32 %v2237_v16  ;;  %v2235_v34 = vmul.f32 1.442695, %v2147_v17  ;;  %v2150_v39 = vmul.f32 0.5, %v2086_v25  ;;  %v5666_v43 = vpop.f32.mrf.mxu1  ;;  %v2331_v46 = vmul.f32 %v6384_v45, %v6273_v24  ;;  %5772 = vmatmul.mubr.f32.gmra.mxu0 %v2394_v7 }
 0x37d   : > { %v6275_v47 = vpop.eup %6274  ;;  %v2085_v48 = vsel %vm2056_vm0, %v7280_v27, 0.0  ;;  %v7291_v51 = vadd.f32 %v5666_v43, %v7014_v0  ;;  %v2396_v42 = vsel %vm2056_vm0, %v2332_v33, %v7159_v62 }
 0x37e   : > { %6288 = vpow2.f32 %v2235_v34  ;;  %v2241_v53 = vmul.f32 1.442695, %v2150_v39  ;;  %v2149_v54 = vmul.f32 0.5, %v2085_v48  ;;  %v1875_v55 = vpop.f32.mrf.mxu1  ;;  %v2395_v57 = vsel %vm2056_vm0, %v2331_v46, %v7171_v11  ;;  %v6387_v39 = vld [vmem:[%s6492_s28 + $0xa8] sm:$0xff]  ;;  %v6388_v48 = vld [vmem:[%s6492_s28 + $0xa0] sm:$0xff] }
 0x37f   : > { %v6277_v59 = vpop.eup %6276  ;;  %v2088_v60 = vsel %vm2056_vm0, %v7291_v51, 0.0  ;;  %v7300_v31 = vadd.f32 %v1875_v55, %v7014_v0  ;;  %5774 = vmatprep.mubr.f32.mxu0 %v2395_v57  ;;  %v2334_v30 = vmul.f32 %v6385_v3, %v6275_v47 }
 0x380   : > { %6290 = vpow2.f32 %v2241_v53  ;;  %v2239_v5 = vmul.f32 1.442695, %v2149_v54  ;;  %v2152_v9 = vmul.f32 0.5, %v2088_v60  ;;  %v5669_v10 = vpop.f32.mrf.mxu1  ;;  %v2333_v13 = vmul.f32 %v6386_v12, %v6277_v59  ;;  %5775 = vmatmul.mubr.f32.gmra.mxu0 %v2396_v42  ;;  %v6389_v12 = vld [vmem:[%s6492_s28 + $0xb8] sm:$0xff] }
 0x381   : > { %v6279_v41 = vpop.eup %6278  ;;  %v2087_v16 = vsel %vm2056_vm0, %v7300_v31, 0.0  ;;  %v7311_v17 = vadd.f32 %v5669_v10, %v7014_v0  ;;  %v2398_v34 = vsel %vm2056_vm0, %v2334_v30, %v7185_v26 }
 0x382   : > { %6292 = vpow2.f32 %v2239_v5  ;;  %v2245_v21 = vmul.f32 1.442695, %v2152_v9  ;;  %v2151_v22 = vmul.f32 0.5, %v2087_v16  ;;  %v1885_v24 = vpop.f32.mrf.mxu1  ;;  %v2397_v25 = vsel %vm2056_vm0, %v2333_v13, %v7197_v40 }
 0x383   : > { %v6281_v7 = vpop.eup %6280  ;;  %v2090_v32 = vsel %vm2056_vm0, %v7311_v17, 0.0  ;;  %v7320_v33 = vadd.f32 %v1885_v24, %v7014_v0  ;;  %5777 = vmatprep.mubr.f32.mxu0 %v2397_v25  ;;  %v2336_v43 = vmul.f32 %v6387_v39, %v6279_v41 }
 0x384   : > { %6294 = vpow2.f32 %v2245_v21  ;;  %v2243_v45 = vmul.f32 1.442695, %v2151_v22  ;;  %v2154_v46 = vmul.f32 0.5, %v2090_v32  ;;  %v5672_v47 = vpop.f32.mrf.mxu1  ;;  %v2335_v53 = vmul.f32 %v6388_v48, %v6281_v7  ;;  %5778 = vmatmul.mubr.f32.gmra.mxu0 %v2398_v34  ;;  %v6390_v22 = vld [vmem:[%s6492_s28 + $0xb0] sm:$0xff] }
 0x385   : > { %8235 = vst [vmem:[#allocation2_spill] sm:$0xff] %v7320_v33  ;;  %v6283_v54 = vpop.eup %6282  ;;  %v2089_v55 = vsel %vm2056_vm0, %v7320_v33, 0.0  ;;  %v7331_v57 = vadd.f32 %v5672_v47, %v7014_v0  ;;  %v2400_v10 = vsel %vm2056_vm0, %v2336_v43, %v7211_v58 }
 0x386   : > { %6296 = vpow2.f32 %v2243_v45  ;;  %v2249_v59 = vmul.f32 1.442695, %v2154_v46  ;;  %v2153_v60 = vmul.f32 0.5, %v2089_v55  ;;  %v1895_v42 = vpop.f32.mrf.mxu1  ;;  %v2399_v3 = vsel %vm2056_vm0, %v2335_v53, %v7220_v37 }
 0x387   : > { %8236 = vst [vmem:[#allocation3_spill] sm:$0xff] %v7331_v57  ;;  %v6285_v30 = vpop.eup %6284  ;;  %v2092_v5 = vsel %vm2056_vm0, %v7331_v57, 0.0  ;;  %v7340_v9 = vadd.f32 %v1895_v42, %v7014_v0  ;;  %5780 = vmatprep.mubr.f32.mxu0 %v2399_v3  ;;  %v2338_v13 = vmul.f32 %v6389_v12, %v6283_v54  ;;  %v6391_v54 = vld [vmem:[%s6492_s28 + $0xc8] sm:$0xff]  ;;  %v6392_v3 = vld [vmem:[%s6492_s28 + $0xc0] sm:$0xff] }
 0x388   : > { %6298 = vpow2.f32 %v2249_v59  ;;  %v2247_v41 = vmul.f32 1.442695, %v2153_v60  ;;  %v2156_v16 = vmul.f32 0.5, %v2092_v5  ;;  %v5675_v21 = vpop.f32.mrf.mxu1  ;;  %v2337_v24 = vmul.f32 %v6390_v22, %v6285_v30  ;;  %5781 = vmatmul.mubr.f32.gmra.mxu0 %v2400_v10 }
 0x389   : > { %8237 = vst [vmem:[#allocation4_spill] sm:$0xff] %v7340_v9  ;;  %v6287_v25 = vpop.eup %6286  ;;  %v2091_v7 = vsel %vm2056_vm0, %v7340_v9, 0.0  ;;  %v7351_v32 = vadd.f32 %v5675_v21, %v7014_v0  ;;  %v2402_v53 = vsel %vm2056_vm0, %v2338_v13, %v7231_v19 }
 0x38a   : > { %6300 = vpow2.f32 %v2247_v41  ;;  %v2253_v34 = vmul.f32 1.442695, %v2156_v16  ;;  %v2155_v39 = vmul.f32 0.5, %v2091_v7  ;;  %v1905_v43 = vpop.f32.mrf.mxu1  ;;  %v2401_v45 = vsel %vm2056_vm0, %v2337_v24, %v7240_v29 }
 0x38b   : > { %8238 = vst [vmem:[#allocation5_spill] sm:$0xff] %v7351_v32  ;;  %v6289_v46 = vpop.eup %6288  ;;  %v2094_v47 = vsel %vm2056_vm0, %v7351_v32, 0.0  ;;  %v7360_v48 = vadd.f32 %v1905_v43, %v7014_v0  ;;  %5783 = vmatprep.mubr.f32.mxu0 %v2401_v45  ;;  %v2340_v55 = vmul.f32 %v6391_v54, %v6287_v25 }
 0x38c   : > { %6302 = vpow2.f32 %v2253_v34  ;;  %v2251_v59 = vmul.f32 1.442695, %v2155_v39  ;;  %v2158_v60 = vmul.f32 0.5, %v2094_v47  ;;  %v5678_v42 = vpop.f32.mrf.mxu1  ;;  %v2339_v30 = vmul.f32 %v6392_v3, %v6289_v46  ;;  %5784 = vmatmul.mubr.f32.gmra.mxu0 %v2402_v53  ;;  %v6393_v34 = vld [vmem:[%s6492_s28 + $0xd8] sm:$0xff]  ;;  %v6394_v47 = vld [vmem:[%s6492_s28 + $0xd0] sm:$0xff] }
 0x38d   : > { %8239 = vst [vmem:[#allocation6_spill] sm:$0xff] %v7360_v48  ;;  %v6291_v5 = vpop.eup %6290  ;;  %v2093_v10 = vsel %vm2056_vm0, %v7360_v48, 0.0  ;;  %v7371_v12 = vadd.f32 %v5678_v42, %v7014_v0  ;;  %v2404_v7 = vsel %vm2056_vm0, %v2340_v55, %v7251_v52 }
 0x38e   : > { %6304 = vpow2.f32 %v2251_v59  ;;  %v2257_v13 = vmul.f32 1.442695, %v2158_v60  ;;  %v2157_v41 = vmul.f32 0.5, %v2093_v10  ;;  %v1915_v16 = vpop.f32.mrf.mxu1  ;;  %v2403_v21 = vsel %vm2056_vm0, %v2339_v30, %v7260_v61 }
 0x38f   : > { %8240 = vst [vmem:[#allocation7_spill] sm:$0xff] %v7371_v12  ;;  %v6293_v22 = vpop.eup %6292  ;;  %v2096_v24 = vsel %vm2056_vm0, %v7371_v12, 0.0  ;;  %v7380_v25 = vadd.f32 %v1915_v16, %v7014_v0  ;;  %5786 = vmatprep.mubr.f32.mxu0 %v2403_v21  ;;  %v2342_v39 = vmul.f32 %v6393_v34, %v6291_v5  ;;  %v6395_v16 = vld [vmem:[%s6492_s28 + $0xe8] sm:$0xff]  ;;  %v6396_v34 = vld [vmem:[%s6492_s28 + $0xe0] sm:$0xff] }
 0x390   : > { %6306 = vpow2.f32 %v2257_v13  ;;  %v2255_v43 = vmul.f32 1.442695, %v2157_v41  ;;  %v2160_v45 = vmul.f32 0.5, %v2096_v24  ;;  %v5681_v46 = vpop.f32.mrf.mxu1  ;;  %v2341_v53 = vmul.f32 %v6394_v47, %v6293_v22  ;;  %5787 = vmatmul.mubr.f32.gmra.mxu0 %v2404_v7 }
 0x391   : > { %8241 = vst [vmem:[#allocation8_spill] sm:$0xff] %v7380_v25  ;;  %v6295_v54 = vpop.eup %6294  ;;  %v2095_v59 = vsel %vm2056_vm0, %v7380_v25, 0.0  ;;  %v7391_v60 = vadd.f32 %v5681_v46, %v7014_v0  ;;  %v2406_v41 = vsel %vm2056_vm0, %v2342_v39, %v7271_v15 }
 0x392   : > { %6308 = vpow2.f32 %v2255_v43  ;;  %v2261_v55 = vmul.f32 1.442695, %v2160_v45  ;;  %v2159_v42 = vmul.f32 0.5, %v2095_v59  ;;  %v1925_v3 = vpop.f32.mrf.mxu1  ;;  %v2405_v30 = vsel %vm2056_vm0, %v2341_v53, %v7280_v27 }
 0x393   : > { %8242 = vst [vmem:[#allocation9_spill] sm:$0xff] %v7391_v60  ;;  %v6297_v5 = vpop.eup %6296  ;;  %v2098_v10 = vsel %vm2056_vm0, %v7391_v60, 0.0  ;;  %v7400_v13 = vadd.f32 %v1925_v3, %v7014_v0  ;;  %5789 = vmatprep.mubr.f32.mxu0 %v2405_v30  ;;  %v2344_v21 = vmul.f32 %v6395_v16, %v6295_v54 }
 0x394   : > { %6310 = vpow2.f32 %v2261_v55  ;;  %v2259_v22 = vmul.f32 1.442695, %v2159_v42  ;;  %v2162_v24 = vmul.f32 0.5, %v2098_v10  ;;  %v5684_v7 = vpop.f32.mrf.mxu1  ;;  %v2343_v43 = vmul.f32 %v6396_v34, %v6297_v5  ;;  %5790 = vmatmul.mubr.f32.gmra.mxu0 %v2406_v41  ;;  %v6397_v5 = vld [vmem:[%s6492_s28 + $0xf8] sm:$0xff] }
 0x395   : > { %8243 = vst [vmem:[#allocation10_spill] sm:$0xff] %v7400_v13  ;;  %v6299_v45 = vpop.eup %6298  ;;  %v2097_v46 = vsel %vm2056_vm0, %v7400_v13, 0.0  ;;  %v7411_v47 = vadd.f32 %v5684_v7, %v7014_v0  ;;  %v2408_v30 = vsel %vm2056_vm0, %v2344_v21, %v7291_v51 }
 0x396   : > { %6312 = vpow2.f32 %v2259_v22  ;;  %v2265_v39 = vmul.f32 1.442695, %v2162_v24  ;;  %v2161_v53 = vmul.f32 0.5, %v2097_v46  ;;  %v1935_v54 = vpop.f32.mrf.mxu1  ;;  %v2407_v59 = vsel %vm2056_vm0, %v2343_v43, %v7300_v31  ;;  %v6398_v24 = vld [vmem:[%s6492_s28 + $0xf0] sm:$0xff] }
 0x397   : > { %8244 = vst [vmem:[#allocation11_spill] sm:$0xff] %v7411_v47  ;;  %v6301_v55 = vpop.eup %6300  ;;  %v2100_v42 = vsel %vm2056_vm0, %v7411_v47, 0.0  ;;  %v7420_v3 = vadd.f32 %v1935_v54, %v7014_v0  ;;  %5792 = vmatprep.mubr.f32.mxu0 %v2407_v59  ;;  %v2346_v10 = vmul.f32 %v6397_v5, %v6299_v45 }
 0x398   : > { %6314 = vpow2.f32 %v2265_v39  ;;  %v2263_v41 = vmul.f32 1.442695, %v2161_v53  ;;  %v2164_v16 = vmul.f32 0.5, %v2100_v42  ;;  %v5687_v22 = vpop.f32.mrf.mxu1  ;;  %v2345_v7 = vmul.f32 %v6398_v24, %v6301_v55  ;;  %5793 = vmatmul.mubr.f32.gmra.mxu0 %v2408_v30  ;;  %v6399_v30 = vld [vmem:[%s6492_s28 + $0x108] sm:$0xff]  ;;  %v6400_v24 = vld [vmem:[%s6492_s28 + $0x100] sm:$0xff] }
 0x399   : > { %8245 = vst [vmem:[#allocation12_spill] sm:$0xff] %v7420_v3  ;;  %v6303_v34 = vpop.eup %6302  ;;  %v2099_v43 = vsel %vm2056_vm0, %v7420_v3, 0.0  ;;  %v7431_v46 = vadd.f32 %v5687_v22, %v7014_v0  ;;  %v2410_v42 = vsel %vm2056_vm0, %v2346_v10, %v7311_v17 }
 0x39a   : > { %6316 = vpow2.f32 %v2263_v41  ;;  %v2269_v21 = vmul.f32 1.442695, %v2164_v16  ;;  %v2163_v45 = vmul.f32 0.5, %v2099_v43  ;;  %v1945_v39 = vpop.f32.mrf.mxu1  ;;  %v2409_v53 = vsel %vm2056_vm0, %v2345_v7, %v7320_v33 }
 0x39b   : > { %8246 = vst [vmem:[#allocation13_spill] sm:$0xff] %v7431_v46  ;;  %v6305_v54 = vpop.eup %6304  ;;  %v2102_v59 = vsel %vm2056_vm0, %v7431_v46, 0.0  ;;  %v7440_v55 = vadd.f32 %v1945_v39, %v7014_v0  ;;  %5795 = vmatprep.mubr.f32.mxu0 %v2409_v53  ;;  %v2348_v5 = vmul.f32 %v6399_v30, %v6303_v34 }
 0x39c   : > { %6318 = vpow2.f32 %v2269_v21  ;;  %v2267_v41 = vmul.f32 1.442695, %v2163_v45  ;;  %v2166_v16 = vmul.f32 0.5, %v2102_v59  ;;  %v5690_v22 = vpop.f32.mrf.mxu1  ;;  %v2347_v7 = vmul.f32 %v6400_v24, %v6305_v54  ;;  %5796 = vmatmul.mubr.f32.gmra.mxu0 %v2410_v42 }
 0x39d   : > { %8247 = vst [vmem:[#allocation14_spill] sm:$0xff] %v7440_v55  ;;  %v6307_v43 = vpop.eup %6306  ;;  %v2101_v39 = vsel %vm2056_vm0, %v7440_v55, 0.0  ;;  %v7451_v53 = vadd.f32 %v5690_v22, %v7014_v0  ;;  %v2412_v42 = vsel %vm2056_vm0, %v2348_v5, %v7331_v57 }
 0x39e   : > { %6320 = vpow2.f32 %v2267_v41  ;;  %v2273_v10 = vmul.f32 1.442695, %v2166_v16  ;;  %v2165_v34 = vmul.f32 0.5, %v2101_v39  ;;  %v1955_v21 = vpop.f32.mrf.mxu1  ;;  %v2411_v45 = vsel %vm2056_vm0, %v2347_v7, %v7340_v9  ;;  %v6401_v41 = vld [vmem:[%s6492_s28 + $0x118] sm:$0xff]  ;;  %v6402_v7 = vld [vmem:[%s6492_s28 + $0x110] sm:$0xff] }
 0x39f   : > { %8248 = vst [vmem:[#allocation15_spill] sm:$0xff] %v7451_v53  ;;  %v6309_v59 = vpop.eup %6308  ;;  %v2104_v54 = vsel %vm2056_vm0, %v7451_v53, 0.0  ;;  %v7460_v30 = vadd.f32 %v1955_v21, %v7014_v0  ;;  %5798 = vmatprep.mubr.f32.mxu0 %v2411_v45  ;;  %v2350_v16 = vmul.f32 %v6401_v41, %v6307_v43 }
 0x3a0   : > { %6322 = vpow2.f32 %v2273_v10  ;;  %v2271_v22 = vmul.f32 1.442695, %v2165_v34  ;;  %v2168_v24 = vmul.f32 0.5, %v2104_v54  ;;  %v5693_v39 = vpop.f32.mrf.mxu1  ;;  %v2349_v9 = vmul.f32 %v6402_v7, %v6309_v59  ;;  %5799 = vmatmul.mubr.f32.gmra.mxu0 %v2412_v42 }
 0x3a1   : > { %8249 = vst [vmem:[#allocation16_spill] sm:$0xff] %v7460_v30  ;;  %v6311_v33 = vpop.eup %6310  ;;  %v2103_v21 = vsel %vm2056_vm0, %v7460_v30, 0.0  ;;  %v7471_v45 = vadd.f32 %v5693_v39, %v7014_v0  ;;  %v2414_v42 = vsel %vm2056_vm0, %v2350_v16, %v7351_v32 }
 0x3a2   : > { %6324 = vpow2.f32 %v2271_v22  ;;  %v2277_v5 = vmul.f32 1.442695, %v2168_v24  ;;  %v2167_v43 = vmul.f32 0.5, %v2103_v21  ;;  %v1965_v10 = vpop.f32.mrf.mxu1  ;;  %v2413_v34 = vsel %vm2056_vm0, %v2349_v9, %v7360_v48  ;;  %v6403_v22 = vld [vmem:[%s6492_s28 + $0x128] sm:$0xff]  ;;  %v6404_v9 = vld [vmem:[%s6492_s28 + $0x120] sm:$0xff] }
 0x3a3   : > { %8250 = vst [vmem:[#allocation17_spill] sm:$0xff] %v7471_v45  ;;  %v6313_v54 = vpop.eup %6312  ;;  %v2106_v59 = vsel %vm2056_vm0, %v7471_v45, 0.0  ;;  %v7480_v41 = vadd.f32 %v1965_v10, %v7014_v0  ;;  %5801 = vmatprep.mubr.f32.mxu0 %v2413_v34  ;;  %v2352_v24 = vmul.f32 %v6403_v22, %v6311_v33 }
 0x3a4   : > { %6326 = vpow2.f32 %v2277_v5  ;;  %v2275_v39 = vmul.f32 1.442695, %v2167_v43  ;;  %v2170_v7 = vmul.f32 0.5, %v2106_v59  ;;  %v5696_v21 = vpop.f32.mrf.mxu1  ;;  %v2351_v48 = vmul.f32 %v6404_v9, %v6313_v54  ;;  %5802 = vmatmul.mubr.f32.gmra.mxu0 %v2414_v42 }
 0x3a5   : > { %8251 = vst [vmem:[#allocation18_spill] sm:$0xff] %v7480_v41  ;;  %v6315_v57 = vpop.eup %6314  ;;  %v2105_v10 = vsel %vm2056_vm0, %v7480_v41, 0.0  ;;  %v7491_v34 = vadd.f32 %v5696_v21, %v7014_v0  ;;  %v2416_v42 = vsel %vm2056_vm0, %v2352_v24, %v7371_v12 }
 0x3a6   : > { %6328 = vpow2.f32 %v2275_v39  ;;  %v2281_v16 = vmul.f32 1.442695, %v2170_v7  ;;  %v2169_v33 = vmul.f32 0.5, %v2105_v10  ;;  %v1975_v5 = vpop.f32.mrf.mxu1  ;;  %v2415_v43 = vsel %vm2056_vm0, %v2351_v48, %v7380_v25  ;;  %v6405_v39 = vld [vmem:[%s6492_s28 + $0x138] sm:$0xff]  ;;  %v6406_v48 = vld [vmem:[%s6492_s28 + $0x130] sm:$0xff] }
 0x3a7   : > { %v6317_v59 = vpop.eup %6316  ;;  %v2108_v54 = vsel %vm2056_vm0, %v7491_v34, 0.0  ;;  %v7500_v22 = vadd.f32 %v1975_v5, %v7014_v0  ;;  %5804 = vmatprep.mubr.f32.mxu0 %v2415_v43  ;;  %v2354_v7 = vmul.f32 %v6405_v39, %v6315_v57 }
 0x3a8   : > { %6330 = vpow2.f32 %v2281_v16  ;;  %v2279_v21 = vmul.f32 1.442695, %v2169_v33  ;;  %v2172_v9 = vmul.f32 0.5, %v2108_v54  ;;  %v5699_v10 = vpop.f32.mrf.mxu1  ;;  %v2353_v25 = vmul.f32 %v6406_v48, %v6317_v59  ;;  %5805 = vmatmul.mubr.f32.gmra.mxu0 %v2416_v42 }
 0x3a9   : > { %8252 = vst [vmem:[#allocation19_spill] sm:$0xff] %v7500_v22  ;;  %v6319_v32 = vpop.eup %6318  ;;  %v2107_v5 = vsel %vm2056_vm0, %v7500_v22, 0.0  ;;  %v7511_v43 = vadd.f32 %v5699_v10, %v7014_v0  ;;  %v2418_v42 = vsel %vm2056_vm0, %v2354_v7, %v7391_v60 }
 0x3aa   : > { %6332 = vpow2.f32 %v2279_v21  ;;  %v2285_v24 = vmul.f32 1.442695, %v2172_v9  ;;  %v2171_v57 = vmul.f32 0.5, %v2107_v5  ;;  %v1985_v16 = vpop.f32.mrf.mxu1  ;;  %v2417_v33 = vsel %vm2056_vm0, %v2353_v25, %v7400_v13  ;;  %v6407_v21 = vld [vmem:[%s6492_s28 + $0x148] sm:$0xff]  ;;  %v6408_v25 = vld [vmem:[%s6492_s28 + $0x140] sm:$0xff] }
 0x3ab   : > { %v6321_v54 = vpop.eup %6320  ;;  %v2110_v59 = vsel %vm2056_vm0, %v7511_v43, 0.0  ;;  %v7520_v39 = vadd.f32 %v1985_v16, %v7014_v0  ;;  %5807 = vmatprep.mubr.f32.mxu0 %v2417_v33  ;;  %v2356_v9 = vmul.f32 %v6407_v21, %v6319_v32 }
 0x3ac   : > { %6334 = vpow2.f32 %v2285_v24  ;;  %v2283_v10 = vmul.f32 1.442695, %v2171_v57  ;;  %v2174_v48 = vmul.f32 0.5, %v2110_v59  ;;  %v5702_v5 = vpop.f32.mrf.mxu1  ;;  %v2355_v13 = vmul.f32 %v6408_v25, %v6321_v54  ;;  %5808 = vmatmul.mubr.f32.gmra.mxu0 %v2418_v42 }
 0x3ad   : > { %8253 = vst [vmem:[#allocation20_spill] sm:$0xff] %v7520_v39  ;;  %v6323_v12 = vpop.eup %6322  ;;  %v2109_v16 = vsel %vm2056_vm0, %v7520_v39, 0.0  ;;  %v7531_v33 = vadd.f32 %v5702_v5, %v7014_v0  ;;  %v2420_v42 = vsel %vm2056_vm0, %v2356_v9, %v7411_v47 }
 0x3ae   : > { %6336 = vpow2.f32 %v2283_v10  ;;  %v2289_v7 = vmul.f32 1.442695, %v2174_v48  ;;  %v2173_v32 = vmul.f32 0.5, %v2109_v16  ;;  %v1995_v24 = vpop.f32.mrf.mxu1  ;;  %v2419_v57 = vsel %vm2056_vm0, %v2355_v13, %v7420_v3  ;;  %v6409_v10 = vld [vmem:[%s6492_s28 + $0x158] sm:$0xff]  ;;  %v6410_v13 = vld [vmem:[%s6492_s28 + $0x150] sm:$0xff] }
 0x3af   : > { %v6325_v59 = vpop.eup %6324  ;;  %v2112_v54 = vsel %vm2056_vm0, %v7531_v33, 0.0  ;;  %v7540_v21 = vadd.f32 %v1995_v24, %v7014_v0  ;;  %5810 = vmatprep.mubr.f32.mxu0 %v2419_v57  ;;  %v2358_v48 = vmul.f32 %v6409_v10, %v6323_v12 }
 0x3b0   : > { %6338 = vpow2.f32 %v2289_v7  ;;  %v2287_v5 = vmul.f32 1.442695, %v2173_v32  ;;  %v2176_v25 = vmul.f32 0.5, %v2112_v54  ;;  %v5705_v16 = vpop.f32.mrf.mxu1  ;;  %v2357_v3 = vmul.f32 %v6410_v13, %v6325_v59  ;;  %5811 = vmatmul.mubr.f32.gmra.mxu0 %v2420_v42 }
 0x3b1   : > { %v6327_v60 = vpop.eup %6326  ;;  %v2111_v24 = vsel %vm2056_vm0, %v7540_v21, 0.0  ;;  %v7551_v57 = vadd.f32 %v5705_v16, %v7014_v0  ;;  %v2422_v42 = vsel %vm2056_vm0, %v2358_v48, %v7431_v46 }
 0x3b2   : > { %6340 = vpow2.f32 %v2287_v5  ;;  %v2293_v9 = vmul.f32 1.442695, %v2176_v25  ;;  %v2175_v12 = vmul.f32 0.5, %v2111_v24  ;;  %v2005_v7 = vpop.f32.mrf.mxu1  ;;  %v2421_v32 = vsel %vm2056_vm0, %v2357_v3, %v7440_v55  ;;  %v6411_v5 = vld [vmem:[%s6492_s28 + $0x168] sm:$0xff]  ;;  %v6412_v3 = vld [vmem:[%s6492_s28 + $0x160] sm:$0xff] }
 0x3b3   : > { %v6329_v54 = vpop.eup %6328  ;;  %v2114_v59 = vsel %vm2056_vm0, %v7551_v57, 0.0  ;;  %v7560_v10 = vadd.f32 %v2005_v7, %v7014_v0  ;;  %5813 = vmatprep.mubr.f32.mxu0 %v2421_v32  ;;  %v2360_v25 = vmul.f32 %v6411_v5, %v6327_v60 }
 0x3b4   : > { %6342 = vpow2.f32 %v2293_v9  ;;  %v2291_v16 = vmul.f32 1.442695, %v2175_v12  ;;  %v2178_v13 = vmul.f32 0.5, %v2114_v59  ;;  %v5708_v24 = vpop.f32.mrf.mxu1  ;;  %v2359_v55 = vmul.f32 %v6412_v3, %v6329_v54  ;;  %5814 = vmatmul.mubr.f32.gmra.mxu0 %v2422_v42 }
 0x3b5   : > { %v6331_v47 = vpop.eup %6330  ;;  %v2113_v7 = vsel %vm2056_vm0, %v7560_v10, 0.0  ;;  %v7571_v32 = vadd.f32 %v5708_v24, %v7014_v0  ;;  %v2424_v42 = vsel %vm2056_vm0, %v2360_v25, %v7451_v53 }
 0x3b6   : > { %6344 = vpow2.f32 %v2291_v16  ;;  %v2297_v48 = vmul.f32 1.442695, %v2178_v13  ;;  %v2177_v60 = vmul.f32 0.5, %v2113_v7  ;;  %v2015_v9 = vpop.f32.mrf.mxu1  ;;  %v2423_v12 = vsel %vm2056_vm0, %v2359_v55, %v7460_v30  ;;  %v6413_v16 = vld [vmem:[%s6492_s28 + $0x178] sm:$0xff]  ;;  %v6414_v55 = vld [vmem:[%s6492_s28 + $0x170] sm:$0xff] }
 0x3b7   : > { %v6333_v59 = vpop.eup %6332  ;;  %v2116_v54 = vsel %vm2056_vm0, %v7571_v32, 0.0  ;;  %v7580_v5 = vadd.f32 %v2015_v9, %v7014_v0  ;;  %5816 = vmatprep.mubr.f32.mxu0 %v2423_v12  ;;  %v2362_v13 = vmul.f32 %v6413_v16, %v6331_v47 }
 0x3b8   : > { %6346 = vpow2.f32 %v2297_v48  ;;  %v2295_v24 = vmul.f32 1.442695, %v2177_v60  ;;  %v2180_v3 = vmul.f32 0.5, %v2116_v54  ;;  %v5711_v7 = vpop.f32.mrf.mxu1  ;;  %v2361_v30 = vmul.f32 %v6414_v55, %v6333_v59  ;;  %5817 = vmatmul.mubr.f32.gmra.mxu0 %v2424_v42 }
 0x3b9   : > { %v6335_v46 = vpop.eup %6334  ;;  %v2115_v9 = vsel %vm2056_vm0, %v7580_v5, 0.0  ;;  %v7591_v12 = vadd.f32 %v5711_v7, %v7014_v0  ;;  %v2426_v42 = vsel %vm2056_vm0, %v2362_v13, %v7471_v45 }
 0x3ba   : > { %6348 = vpow2.f32 %v2295_v24  ;;  %v2301_v25 = vmul.f32 1.442695, %v2180_v3  ;;  %v2179_v47 = vmul.f32 0.5, %v2115_v9  ;;  %v2025_v48 = vpop.f32.mrf.mxu1  ;;  %v2425_v60 = vsel %vm2056_vm0, %v2361_v30, %v7480_v41  ;;  %v6415_v24 = vld [vmem:[%s6492_s28 + $0x188] sm:$0xff]  ;;  %v6416_v30 = vld [vmem:[%s6492_s28 + $0x180] sm:$0xff] }
 0x3bb   : > { %v6337_v54 = vpop.eup %6336  ;;  %v2118_v59 = vsel %vm2056_vm0, %v7591_v12, 0.0  ;;  %v7600_v16 = vadd.f32 %v2025_v48, %v7014_v0  ;;  %5819 = vmatprep.mubr.f32.mxu0 %v2425_v60  ;;  %v2364_v3 = vmul.f32 %v6415_v24, %v6335_v46 }
 0x3bc   : > { %6350 = vpow2.f32 %v2301_v25  ;;  %v2299_v7 = vmul.f32 1.442695, %v2179_v47  ;;  %v2182_v55 = vmul.f32 0.5, %v2118_v59  ;;  %v5714_v9 = vpop.f32.mrf.mxu1  ;;  %v2363_v41 = vmul.f32 %v6416_v30, %v6337_v54  ;;  %5820 = vmatmul.mubr.f32.gmra.mxu0 %v2426_v42 }
 0x3bd   : > { %v6339_v53 = vpop.eup %6338  ;;  %v2117_v48 = vsel %vm2056_vm0, %v7600_v16, 0.0  ;;  %v7611_v60 = vadd.f32 %v5714_v9, %v7014_v0  ;;  %v2428_v42 = vsel %vm2056_vm0, %v2364_v3, %v7491_v34 }
 0x3be   : > { %6352 = vpow2.f32 %v2299_v7  ;;  %v2305_v13 = vmul.f32 1.442695, %v2182_v55  ;;  %v2181_v46 = vmul.f32 0.5, %v2117_v48  ;;  %v2035_v25 = vpop.f32.mrf.mxu1  ;;  %v2427_v47 = vsel %vm2056_vm0, %v2363_v41, %v7500_v22  ;;  %v6417_v7 = vld [vmem:[%s6492_s28 + $0x198] sm:$0xff]  ;;  %v6418_v41 = vld [vmem:[%s6492_s28 + $0x190] sm:$0xff] }
 0x3bf   : > { %v6341_v59 = vpop.eup %6340  ;;  %v2120_v54 = vsel %vm2056_vm0, %v7611_v60, 0.0  ;;  %v7620_v24 = vadd.f32 %v2035_v25, %v7014_v0  ;;  %5822 = vmatprep.mubr.f32.mxu0 %v2427_v47  ;;  %v2366_v55 = vmul.f32 %v6417_v7, %v6339_v53 }
 0x3c0   : > { %6354 = vpow2.f32 %v2305_v13  ;;  %v2303_v9 = vmul.f32 1.442695, %v2181_v46  ;;  %v2184_v30 = vmul.f32 0.5, %v2120_v54  ;;  %v5717_v48 = vpop.f32.mrf.mxu1  ;;  %v2365_v22 = vmul.f32 %v6418_v41, %v6341_v59  ;;  %5823 = vmatmul.mubr.f32.gmra.mxu0 %v2428_v42 }
 0x3c1   : > { %v6343_v45 = vpop.eup %6342  ;;  %v2119_v25 = vsel %vm2056_vm0, %v7620_v24, 0.0  ;;  %v7631_v47 = vadd.f32 %v5717_v48, %v7014_v0  ;;  %v2430_v42 = vsel %vm2056_vm0, %v2366_v55, %v7511_v43 }
 0x3c2   : > { %6356 = vpow2.f32 %v2303_v9  ;;  %v2309_v3 = vmul.f32 1.442695, %v2184_v30  ;;  %v2183_v53 = vmul.f32 0.5, %v2119_v25  ;;  %v2045_v13 = vpop.f32.mrf.mxu1  ;;  %v2429_v46 = vsel %vm2056_vm0, %v2365_v22, %v7520_v39  ;;  %v6419_v9 = vld [vmem:[%s6492_s28 + $0x1a8] sm:$0xff]  ;;  %v6420_v22 = vld [vmem:[%s6492_s28 + $0x1a0] sm:$0xff] }
 0x3c3   : > { %v6345_v54 = vpop.eup %6344  ;;  %v2122_v59 = vsel %vm2056_vm0, %v7631_v47, 0.0  ;;  %v7640_v7 = vadd.f32 %v2045_v13, %v7014_v0  ;;  %5825 = vmatprep.mubr.f32.mxu0 %v2429_v46  ;;  %v2368_v30 = vmul.f32 %v6419_v9, %v6343_v45 }
 0x3c4   : > { %6358 = vpow2.f32 %v2309_v3  ;;  %v2307_v48 = vmul.f32 1.442695, %v2183_v53  ;;  %v2186_v41 = vmul.f32 0.5, %v2122_v59  ;;  %v2367_v25 = vmul.f32 %v6420_v22, %v6345_v54  ;;  %5826 = vmatmul.mubr.f32.gmra.mxu0 %v2430_v42  ;;  %v6421_v54 = vld [vmem:[%s6492_s28 + $0x1b0] sm:$0xff]  ;;  %v6422_v42 = vld [vmem:[%s6492_s28 + $0x1b8] sm:$0xff] }
 0x3c5   : > { %v6347_v39 = vpop.eup %6346  ;;  %v2121_v0 = vsel %vm2056_vm0, %v7640_v7, 0.0  ;;  %v2432_v3 = vsel %vm2056_vm0, %v2368_v30, %v7531_v33 }
 0x3c6   : > { %6360 = vpow2.f32 %v2307_v48  ;;  %v2313_v13 = vmul.f32 1.442695, %v2186_v41  ;;  %v2185_v46 = vmul.f32 0.5, %v2121_v0  ;;  %v2431_v45 = vsel %vm2056_vm0, %v2367_v25, %v7540_v21  ;;  %v6423_v25 = vld [vmem:[%s6492_s28 + $0x1c0] sm:$0xff] }
 0x3c7   : > { %v6349_v55 = vpop.eup %6348  ;;  %5828 = vmatprep.mubr.f32.mxu0 %v2431_v45  ;;  %v2370_v9 = vmul.f32 %v6422_v42, %v6347_v39 }
 0x3c8   : > { %6362 = vpow2.f32 %v2313_v13  ;;  %v2311_v53 = vmul.f32 1.442695, %v2185_v46  ;;  %v2369_v59 = vmul.f32 %v6421_v54, %v6349_v55  ;;  %5829 = vmatmul.mubr.f32.gmra.mxu0 %v2432_v3  ;;  %v6424_v13 = vld [vmem:[%s6492_s28 + $0x1c8] sm:$0xff] }
 0x3c9   : > { %v6351_v48 = vpop.eup %6350  ;;  %v2434_v30 = vsel %vm2056_vm0, %v2370_v9, %v7551_v57 }
 0x3ca   : > { %6364 = vpow2.f32 %v2311_v53  ;;  %v2433_v41 = vsel %vm2056_vm0, %v2369_v59, %v7560_v10  ;;  %v2372_v46 = vmul.f32 %v6424_v13, %v6351_v48  ;;  %v6425_v53 = vld [vmem:[%s6492_s28 + $0x1d0] sm:$0xff]  ;;  %v6426_v59 = vld [vmem:[%s6492_s28 + $0x1d8] sm:$0xff] }
 0x3cb   : > { %v6353_v22 = vpop.eup %6352  ;;  %5831 = vmatprep.mubr.f32.mxu0 %v2433_v41 }
 0x3cc   : > { %v2371_v0 = vmul.f32 %v6423_v25, %v6353_v22  ;;  %5832 = vmatmul.mubr.f32.gmra.mxu0 %v2434_v30  ;;  %v2436_v3 = vsel %vm2056_vm0, %v2372_v46, %v7571_v32  ;;  %v6427_v30 = vld [vmem:[%s6492_s28 + $0x1e0] sm:$0xff] }
 0x3cd   : > { %v6355_v39 = vpop.eup %6354 }
 0x3ce   : > { %v2435_v45 = vsel %vm2056_vm0, %v2371_v0, %v7580_v5  ;;  %v2374_v42 = vmul.f32 %v6426_v59, %v6355_v39  ;;  %v6428_v0 = vld [vmem:[%s6492_s28 + $0x1e8] sm:$0xff] }
 0x3cf   : > { %v6357_v55 = vpop.eup %6356  ;;  %5834 = vmatprep.mubr.f32.mxu0 %v2435_v45 }
 0x3d0   : > { %v2373_v54 = vmul.f32 %v6425_v53, %v6357_v55  ;;  %5835 = vmatmul.mubr.f32.gmra.mxu0 %v2436_v3  ;;  %v2438_v22 = vsel %vm2056_vm0, %v2374_v42, %v7591_v12  ;;  %v6429_v3 = vld [vmem:[%s6492_s28 + $0x1f0] sm:$0xff] }
 0x3d1   : > { %v6359_v9 = vpop.eup %6358 }
 0x3d2   : > { %v2437_v48 = vsel %vm2056_vm0, %v2373_v54, %v7600_v16  ;;  %v2376_v13 = vmul.f32 %v6428_v0, %v6359_v9  ;;  %v6430_v54 = vld [vmem:[%s6492_s28 + $0x1f8] sm:$0xff]  ;;  %v2462_v0 = vsub.s32 4, %v6655_v38 }
 0x3d3   : > { %v6361_v41 = vpop.eup %6360  ;;  %5837 = vmatprep.mubr.f32.mxu0 %v2437_v48  ;;  %v4547_v48 = vld [vmem:[%s8213_s1 + $0x378] sm:$0xff] }
 0x3d4   : > { %v2375_v25 = vmul.f32 %v6427_v30, %v6361_v41  ;;  %5838 = vmatmul.mubr.f32.gmra.mxu0 %v2438_v22  ;;  %v2440_v55 = vsel %vm2056_vm0, %v2376_v13, %v7611_v60  ;;  %5974 = vmatprep.subr.mxu0 %v4547_v48  ;;  %v4546_v41 = vld [vmem:[%s8213_s1 + $0x370] sm:$0xff]  ;;  %v4545_v22 = vld [vmem:[%s8213_s1 + $0x368] sm:$0xff]  ;;  %v4543_v30 = vld [vmem:[%s8213_s1 + $0x358] sm:$0xff] }
 0x3d5   : > { %v6363_v46 = vpop.eup %6362  ;;  %5975 = vmatpush3.msra.mxu0 %v4547_v48  ;;  %v7718_v13 = vld [vmem:[%s8214_s2] sm:$0xff] }
 0x3d6   : > { %v2439_v39 = vsel %vm2056_vm0, %v2375_v25, %v7620_v24  ;;  %v2378_v59 = vmul.f32 %v6430_v54, %v6363_v46  ;;  %5976 = vmatprep.subr.mxu0 %v4546_v41  ;;  %v4542_v25 = vld [vmem:[%s8213_s1 + $0x350] sm:$0xff]  ;;  %v7721_v46 = vrot.slane %v7718_v13, %v2462_v0  ;;  %v4537_v0 = vld [vmem:[%s8213_s1 + $0x328] sm:$0xff] }
 0x3d7   : > { %v6365_v45 = vpop.eup %6364  ;;  %5840 = vmatprep.mubr.f32.mxu0 %v2439_v39  ;;  %5977 = vmatpush3.msra.mxu0 %v4546_v41 }
 0x3d8   : > { %v2377_v53 = vmul.f32 %v6429_v3, %v6365_v45  ;;  %5841 = vmatmul.mubr.f32.gmra.mxu0 %v2440_v55  ;;  %v2442_v9 = vsel %vm2056_vm0, %v2378_v59, %v7631_v47  ;;  %5978 = vmatprep.subr.mxu0 %v4545_v22  ;;  %v4541_v45 = vld [vmem:[%s8213_s1 + $0x348] sm:$0xff]  ;;  %v4540_v59 = vld [vmem:[%s8213_s1 + $0x340] sm:$0xff] }
 0x3d9   : > { %5979 = vmatpush3.msra.mxu0 %v4545_v22 }
 0x3da   : > { %v2441_v42 = vsel %vm2056_vm0, %v2377_v53, %v7640_v7  ;;  %5980 = vmatprep.subr.mxu0 %v4544_v63 }
 0x3db   : > { %5843 = vmatprep.mubr.f32.mxu0 %v2441_v42  ;;  %5981 = vmatpush3.msra.mxu0 %v4544_v63  ;;  %v4539_v42 = vld [vmem:[%s8213_s1 + $0x338] sm:$0xff]  ;;  %v4538_v63 = vld [vmem:[%s8213_s1 + $0x330] sm:$0xff] }
 0x3dc   : > { %5844 = vmatmul.mubr.f32.gmra.mxu0 %v2442_v9  ;;  %5982 = vmatprep.subr.mxu0 %v4543_v30 }
 0x3dd   : > { %5983 = vmatpush3.msra.mxu0 %v4543_v30 }
 0x3de   : > { %5984 = vmatprep.subr.mxu0 %v4542_v25 }
 0x3df   : > { %5985 = vmatpush3.msra.mxu0 %v4542_v25 }
 0x3e0   : > { %5986 = vmatprep.subr.mxu0 %v4541_v45 }
 0x3e1   : > { %5987 = vmatpush3.msra.mxu0 %v4541_v45 }
 0x3e2   : > { %5988 = vmatprep.subr.mxu0 %v4540_v59 }
 0x3e3   : > { %5989 = vmatpush3.msra.mxu0 %v4540_v59 }
 0x3e4   : > { %5990 = vmatprep.subr.mxu0 %v4539_v42 }
 0x3e5   : > { %5991 = vmatpush3.msra.mxu0 %v4539_v42  ;;  %v4535_v42 = vld [vmem:[%s8213_s1 + $0x318] sm:$0xff] }
 0x3e6   : > { %5992 = vmatprep.subr.mxu0 %v4538_v63 }
 0x3e7   : > { %5993 = vmatpush3.msra.mxu0 %v4538_v63  ;;  %v4534_v63 = vld [vmem:[%s8213_s1 + $0x310] sm:$0xff] }
 0x3e8   : > { %5994 = vmatprep.subr.mxu0 %v4537_v0 }
 0x3e9   : > { %5995 = vmatpush3.msra.mxu0 %v4537_v0  ;;  %v4533_v0 = vld [vmem:[%s8213_s1 + $0x308] sm:$0xff] }
 0x420   : > { %v5752_v39 = vpop.f32.mrf.mxu0 }
 0x421   : > { %v2536_v55 = vadd.f32 %v5752_v39, %v7721_v46 }
 0x422   : > { %v2530_v3 = vpop.f32.mrf.mxu0 }
 0x423   : > { %v2531_v53 = vadd.f32 %v2530_v3, %v7721_v46  ;;  %v2850_v48 = vmax.f32 %v2536_v55, 0.0 }
 0x424   : > { %v5755_v54 = vpop.f32.mrf.mxu0 }
 0x425   : > { %v2849_v9 = vmax.f32 %v2531_v53, 0.0  ;;  %v2546_v41 = vadd.f32 %v5755_v54, %v7721_v46  ;;  %v4536_v53 = vld [vmem:[%s8213_s1 + $0x320] sm:$0xff] }
 0x426   : > { %v2540_v22 = vpop.f32.mrf.mxu0  ;;  %5996 = vmatprep.subr.mxu0 %v4536_v53 }
 0x427   : > { %v2541_v30 = vadd.f32 %v2540_v22, %v7721_v46  ;;  %5878 = vmatprep.mubr.f32.mxu1 %v2849_v9  ;;  %v2852_v45 = vmax.f32 %v2546_v41, 0.0  ;;  %5997 = vmatpush3.msra.mxu0 %v4536_v53  ;;  %v4532_v53 = vld [vmem:[%s8213_s1 + $0x300] sm:$0xff] }
 0x428   : > { %v5758_v25 = vpop.f32.mrf.mxu0  ;;  %5879 = vmatmul.mubr.f32.vlgmr.msra.gmra.mxu1 %v2850_v48  ;;  %5998 = vmatprep.subr.mxu0 %v4535_v42 }
 0x429   : > { %v2851_v39 = vmax.f32 %v2541_v30, 0.0  ;;  %v2556_v55 = vadd.f32 %v5758_v25, %v7721_v46  ;;  %5999 = vmatpush3.msra.mxu0 %v4535_v42 }
 0x42a   : > { %v2550_v3 = vpop.f32.mrf.mxu0  ;;  %6000 = vmatprep.subr.mxu0 %v4534_v63 }
 0x42b   : > { %v2551_v54 = vadd.f32 %v2550_v3, %v7721_v46  ;;  %5881 = vmatprep.mubr.f32.mxu1 %v2851_v39  ;;  %v2854_v48 = vmax.f32 %v2556_v55, 0.0  ;;  %6001 = vmatpush3.msra.mxu0 %v4534_v63 }
 0x42c   : > { %v5761_v59 = vpop.f32.mrf.mxu0  ;;  %5882 = vmatmul.mubr.f32.gmra.mxu1 %v2852_v45  ;;  %6002 = vmatprep.subr.mxu0 %v4533_v0 }
 0x42d   : > { %v2853_v9 = vmax.f32 %v2551_v54, 0.0  ;;  %v2566_v41 = vadd.f32 %v5761_v59, %v7721_v46  ;;  %6003 = vmatpush3.msra.mxu0 %v4533_v0 }
 0x42e   : > { %v2560_v22 = vpop.f32.mrf.mxu0  ;;  %6004 = vmatprep.subr.mxu0 %v4532_v53 }
 0x42f   : > { %v2561_v30 = vadd.f32 %v2560_v22, %v7721_v46  ;;  %5884 = vmatprep.mubr.f32.mxu1 %v2853_v9  ;;  %v2856_v45 = vmax.f32 %v2566_v41, 0.0  ;;  %6005 = vmatpush3.msra.mxu0 %v4532_v53 }
 0x430   : > { %v5764_v25 = vpop.f32.mrf.mxu0  ;;  %5885 = vmatmul.mubr.f32.gmra.mxu1 %v2854_v48 }
 0x431   : > { %v2855_v39 = vmax.f32 %v2561_v30, 0.0  ;;  %v2576_v55 = vadd.f32 %v5764_v25, %v7721_v46 }
 0x432   : > { %v2570_v3 = vpop.f32.mrf.mxu0 }
 0x433   : > { %v2571_v54 = vadd.f32 %v2570_v3, %v7721_v46  ;;  %5887 = vmatprep.mubr.f32.mxu1 %v2855_v39  ;;  %v2858_v9 = vmax.f32 %v2576_v55, 0.0 }
 0x434   : > { %v5767_v59 = vpop.f32.mrf.mxu0  ;;  %5888 = vmatmul.mubr.f32.gmra.mxu1 %v2856_v45 }
 0x435   : > { %v2857_v42 = vmax.f32 %v2571_v54, 0.0  ;;  %v2586_v48 = vadd.f32 %v5767_v59, %v7721_v46 }
 0x436   : > { %v2580_v41 = vpop.f32.mrf.mxu0 }
 0x437   : > { %v2581_v22 = vadd.f32 %v2580_v41, %v7721_v46  ;;  %5890 = vmatprep.mubr.f32.mxu1 %v2857_v42  ;;  %v2860_v25 = vmax.f32 %v2586_v48, 0.0 }
 0x438   : > { %v5770_v63 = vpop.f32.mrf.mxu0  ;;  %5891 = vmatmul.mubr.f32.gmra.mxu1 %v2858_v9 }
 0x439   : > { %v2859_v30 = vmax.f32 %v2581_v22, 0.0  ;;  %v2596_v39 = vadd.f32 %v5770_v63, %v7721_v46 }
 0x43a   : > { %v2590_v3 = vpop.f32.mrf.mxu0 }
 0x43b   : > { %v2591_v45 = vadd.f32 %v2590_v3, %v7721_v46  ;;  %5893 = vmatprep.mubr.f32.mxu1 %v2859_v30  ;;  %v2862_v54 = vmax.f32 %v2596_v39, 0.0 }
 0x43c   : > { %v5773_v0 = vpop.f32.mrf.mxu0  ;;  %5894 = vmatmul.mubr.f32.gmra.mxu1 %v2860_v25 }
 0x43d   : > { %v2861_v55 = vmax.f32 %v2591_v45, 0.0  ;;  %v2606_v59 = vadd.f32 %v5773_v0, %v7721_v46 }
 0x43e   : > { %v2600_v53 = vpop.f32.mrf.mxu0 }
 0x43f   : > { %v2601_v41 = vadd.f32 %v2600_v53, %v7721_v46  ;;  %5896 = vmatprep.mubr.f32.mxu1 %v2861_v55  ;;  %v2864_v48 = vmax.f32 %v2606_v59, 0.0 }
 0x440   : > { %v5776_v42 = vpop.f32.mrf.mxu0  ;;  %5897 = vmatmul.mubr.f32.gmra.mxu1 %v2862_v54 }
 0x441   : > { %v2863_v9 = vmax.f32 %v2601_v41, 0.0  ;;  %v2616_v22 = vadd.f32 %v5776_v42, %v7721_v46 }
 0x442   : > { %v2610_v63 = vpop.f32.mrf.mxu0 }
 0x443   : > { %v2611_v3 = vadd.f32 %v2610_v63, %v7721_v46  ;;  %5899 = vmatprep.mubr.f32.mxu1 %v2863_v9  ;;  %v2866_v39 = vmax.f32 %v2616_v22, 0.0 }
 0x444   : > { %v5779_v30 = vpop.f32.mrf.mxu0  ;;  %5900 = vmatmul.mubr.f32.gmra.mxu1 %v2864_v48 }
 0x445   : > { %v2865_v25 = vmax.f32 %v2611_v3, 0.0  ;;  %v2626_v45 = vadd.f32 %v5779_v30, %v7721_v46 }
 0x446   : > { %v2620_v0 = vpop.f32.mrf.mxu0 }
 0x447   : > { %v2621_v53 = vadd.f32 %v2620_v0, %v7721_v46  ;;  %5902 = vmatprep.mubr.f32.mxu1 %v2865_v25  ;;  %v2868_v59 = vmax.f32 %v2626_v45, 0.0 }
 0x448   : > { %v5782_v55 = vpop.f32.mrf.mxu0  ;;  %5903 = vmatmul.mubr.f32.gmra.mxu1 %v2866_v39 }
 0x449   : > { %v2867_v54 = vmax.f32 %v2621_v53, 0.0  ;;  %v2636_v41 = vadd.f32 %v5782_v55, %v7721_v46 }
 0x44a   : > { %v2630_v42 = vpop.f32.mrf.mxu0 }
 0x44b   : > { %v2631_v63 = vadd.f32 %v2630_v42, %v7721_v46  ;;  %5905 = vmatprep.mubr.f32.mxu1 %v2867_v54  ;;  %v2870_v22 = vmax.f32 %v2636_v41, 0.0 }
 0x44c   : > { %v5785_v9 = vpop.f32.mrf.mxu0  ;;  %5906 = vmatmul.mubr.f32.gmra.mxu1 %v2868_v59 }
 0x44d   : > { %v2869_v48 = vmax.f32 %v2631_v63, 0.0  ;;  %v2646_v3 = vadd.f32 %v5785_v9, %v7721_v46 }
 0x44e   : > { %v2640_v30 = vpop.f32.mrf.mxu0 }
 0x44f   : > { %v2641_v0 = vadd.f32 %v2640_v30, %v7721_v46  ;;  %5908 = vmatprep.mubr.f32.mxu1 %v2869_v48  ;;  %v2872_v45 = vmax.f32 %v2646_v3, 0.0 }
 0x450   : > { %v5788_v25 = vpop.f32.mrf.mxu0  ;;  %5909 = vmatmul.mubr.f32.gmra.mxu1 %v2870_v22 }
 0x451   : > { %v2871_v39 = vmax.f32 %v2641_v0, 0.0  ;;  %v2656_v53 = vadd.f32 %v5788_v25, %v7721_v46 }
 0x452   : > { %v2650_v55 = vpop.f32.mrf.mxu0 }
 0x453   : > { %v2651_v42 = vadd.f32 %v2650_v55, %v7721_v46  ;;  %5911 = vmatprep.mubr.f32.mxu1 %v2871_v39  ;;  %v2874_v41 = vmax.f32 %v2656_v53, 0.0 }
 0x454   : > { %v5791_v54 = vpop.f32.mrf.mxu0  ;;  %5912 = vmatmul.mubr.f32.gmra.mxu1 %v2872_v45 }
 0x455   : > { %v2873_v59 = vmax.f32 %v2651_v42, 0.0  ;;  %v2666_v63 = vadd.f32 %v5791_v54, %v7721_v46 }
 0x456   : > { %v2660_v9 = vpop.f32.mrf.mxu0 }
 0x457   : > { %v2661_v30 = vadd.f32 %v2660_v9, %v7721_v46  ;;  %5914 = vmatprep.mubr.f32.mxu1 %v2873_v59  ;;  %v2876_v3 = vmax.f32 %v2666_v63, 0.0 }
 0x458   : > { %v5794_v48 = vpop.f32.mrf.mxu0  ;;  %5915 = vmatmul.mubr.f32.gmra.mxu1 %v2874_v41 }
 0x459   : > { %v2875_v22 = vmax.f32 %v2661_v30, 0.0  ;;  %v2676_v0 = vadd.f32 %v5794_v48, %v7721_v46 }
 0x45a   : > { %v2670_v25 = vpop.f32.mrf.mxu0 }
 0x45b   : > { %v2671_v55 = vadd.f32 %v2670_v25, %v7721_v46  ;;  %5917 = vmatprep.mubr.f32.mxu1 %v2875_v22  ;;  %v2878_v53 = vmax.f32 %v2676_v0, 0.0 }
 0x45c   : > { %v5797_v39 = vpop.f32.mrf.mxu0  ;;  %5918 = vmatmul.mubr.f32.gmra.mxu1 %v2876_v3 }
 0x45d   : > { %v2877_v45 = vmax.f32 %v2671_v55, 0.0  ;;  %v2686_v42 = vadd.f32 %v5797_v39, %v7721_v46 }
 0x45e   : > { %v2680_v54 = vpop.f32.mrf.mxu0 }
 0x45f   : > { %v2681_v9 = vadd.f32 %v2680_v54, %v7721_v46  ;;  %5920 = vmatprep.mubr.f32.mxu1 %v2877_v45  ;;  %v2880_v63 = vmax.f32 %v2686_v42, 0.0 }
 0x460   : > { %v5800_v59 = vpop.f32.mrf.mxu0  ;;  %5921 = vmatmul.mubr.f32.gmra.mxu1 %v2878_v53 }
 0x461   : > { %v2879_v41 = vmax.f32 %v2681_v9, 0.0  ;;  %v2696_v30 = vadd.f32 %v5800_v59, %v7721_v46 }
 0x462   : > { %v2690_v48 = vpop.f32.mrf.mxu0 }
 0x463   : > { %v2691_v25 = vadd.f32 %v2690_v48, %v7721_v46  ;;  %5923 = vmatprep.mubr.f32.mxu1 %v2879_v41  ;;  %v2882_v0 = vmax.f32 %v2696_v30, 0.0 }
 0x464   : > { %v5803_v22 = vpop.f32.mrf.mxu0  ;;  %5924 = vmatmul.mubr.f32.gmra.mxu1 %v2880_v63 }
 0x465   : > { %v2881_v3 = vmax.f32 %v2691_v25, 0.0  ;;  %v2706_v55 = vadd.f32 %v5803_v22, %v7721_v46 }
 0x466   : > { %v2700_v39 = vpop.f32.mrf.mxu0 }
 0x467   : > { %v2701_v54 = vadd.f32 %v2700_v39, %v7721_v46  ;;  %5926 = vmatprep.mubr.f32.mxu1 %v2881_v3  ;;  %v2884_v42 = vmax.f32 %v2706_v55, 0.0 }
 0x468   : > { %v5806_v45 = vpop.f32.mrf.mxu0  ;;  %5927 = vmatmul.mubr.f32.gmra.mxu1 %v2882_v0 }
 0x469   : > { %v2883_v53 = vmax.f32 %v2701_v54, 0.0  ;;  %v2716_v9 = vadd.f32 %v5806_v45, %v7721_v46 }
 0x46a   : > { %v2710_v59 = vpop.f32.mrf.mxu0 }
 0x46b   : > { %v2711_v48 = vadd.f32 %v2710_v59, %v7721_v46  ;;  %5929 = vmatprep.mubr.f32.mxu1 %v2883_v53  ;;  %v2886_v30 = vmax.f32 %v2716_v9, 0.0 }
 0x46c   : > { %v5809_v41 = vpop.f32.mrf.mxu0  ;;  %5930 = vmatmul.mubr.f32.gmra.mxu1 %v2884_v42 }
 0x46d   : > { %v2885_v63 = vmax.f32 %v2711_v48, 0.0  ;;  %v2726_v25 = vadd.f32 %v5809_v41, %v7721_v46 }
 0x46e   : > { %v2720_v22 = vpop.f32.mrf.mxu0 }
 0x46f   : > { %v2721_v39 = vadd.f32 %v2720_v22, %v7721_v46  ;;  %5932 = vmatprep.mubr.f32.mxu1 %v2885_v63  ;;  %v2888_v55 = vmax.f32 %v2726_v25, 0.0 }
 0x470   : > { %v5812_v3 = vpop.f32.mrf.mxu0  ;;  %5933 = vmatmul.mubr.f32.gmra.mxu1 %v2886_v30 }
 0x471   : > { %v2887_v0 = vmax.f32 %v2721_v39, 0.0  ;;  %v2736_v54 = vadd.f32 %v5812_v3, %v7721_v46 }
 0x472   : > { %v2730_v45 = vpop.f32.mrf.mxu0 }
 0x473   : > { %v2731_v59 = vadd.f32 %v2730_v45, %v7721_v46  ;;  %5935 = vmatprep.mubr.f32.mxu1 %v2887_v0  ;;  %v2890_v9 = vmax.f32 %v2736_v54, 0.0 }
 0x474   : > { %v5815_v53 = vpop.f32.mrf.mxu0  ;;  %5936 = vmatmul.mubr.f32.gmra.mxu1 %v2888_v55 }
 0x475   : > { %v2889_v42 = vmax.f32 %v2731_v59, 0.0  ;;  %v2746_v48 = vadd.f32 %v5815_v53, %v7721_v46 }
 0x476   : > { %v2740_v41 = vpop.f32.mrf.mxu0 }
 0x477   : > { %v2741_v22 = vadd.f32 %v2740_v41, %v7721_v46  ;;  %5938 = vmatprep.mubr.f32.mxu1 %v2889_v42  ;;  %v2892_v25 = vmax.f32 %v2746_v48, 0.0 }
 0x478   : > { %v5818_v63 = vpop.f32.mrf.mxu0  ;;  %5939 = vmatmul.mubr.f32.gmra.mxu1 %v2890_v9 }
 0x479   : > { %v2891_v30 = vmax.f32 %v2741_v22, 0.0  ;;  %v2756_v39 = vadd.f32 %v5818_v63, %v7721_v46 }
 0x47a   : > { %v2750_v3 = vpop.f32.mrf.mxu0 }
 0x47b   : > { %v2751_v45 = vadd.f32 %v2750_v3, %v7721_v46  ;;  %5941 = vmatprep.mubr.f32.mxu1 %v2891_v30  ;;  %v2894_v54 = vmax.f32 %v2756_v39, 0.0 }
 0x47c   : > { %v5821_v0 = vpop.f32.mrf.mxu0  ;;  %5942 = vmatmul.mubr.f32.gmra.mxu1 %v2892_v25 }
 0x47d   : > { %v2893_v55 = vmax.f32 %v2751_v45, 0.0  ;;  %v2766_v59 = vadd.f32 %v5821_v0, %v7721_v46 }
 0x47e   : > { %v2760_v53 = vpop.f32.mrf.mxu0 }
 0x47f   : > { %v2761_v41 = vadd.f32 %v2760_v53, %v7721_v46  ;;  %5944 = vmatprep.mubr.f32.mxu1 %v2893_v55  ;;  %v2896_v48 = vmax.f32 %v2766_v59, 0.0 }
 0x480   : > { %v5824_v42 = vpop.f32.mrf.mxu0  ;;  %5945 = vmatmul.mubr.f32.gmra.mxu1 %v2894_v54 }
 0x481   : > { %v2895_v9 = vmax.f32 %v2761_v41, 0.0  ;;  %v2776_v22 = vadd.f32 %v5824_v42, %v7721_v46 }
 0x482   : > { %v2770_v63 = vpop.f32.mrf.mxu0 }
 0x483   : > { %v2771_v3 = vadd.f32 %v2770_v63, %v7721_v46  ;;  %5947 = vmatprep.mubr.f32.mxu1 %v2895_v9  ;;  %v2898_v39 = vmax.f32 %v2776_v22, 0.0 }
 0x484   : > { %v5827_v30 = vpop.f32.mrf.mxu0  ;;  %5948 = vmatmul.mubr.f32.gmra.mxu1 %v2896_v48 }
 0x485   : > { %v2897_v25 = vmax.f32 %v2771_v3, 0.0  ;;  %v2786_v45 = vadd.f32 %v5827_v30, %v7721_v46 }
 0x486   : > { %v2780_v0 = vpop.f32.mrf.mxu0 }
 0x487   : > { %v2781_v53 = vadd.f32 %v2780_v0, %v7721_v46  ;;  %5950 = vmatprep.mubr.f32.mxu1 %v2897_v25  ;;  %v2900_v59 = vmax.f32 %v2786_v45, 0.0 }
 0x488   : > { %v5830_v55 = vpop.f32.mrf.mxu0  ;;  %5951 = vmatmul.mubr.f32.gmra.mxu1 %v2898_v39 }
 0x489   : > { %v2899_v54 = vmax.f32 %v2781_v53, 0.0  ;;  %v2796_v41 = vadd.f32 %v5830_v55, %v7721_v46 }
 0x48a   : > { %v2790_v42 = vpop.f32.mrf.mxu0 }
 0x48b   : > { %v2791_v63 = vadd.f32 %v2790_v42, %v7721_v46  ;;  %5953 = vmatprep.mubr.f32.mxu1 %v2899_v54  ;;  %v2902_v22 = vmax.f32 %v2796_v41, 0.0 }
 0x48c   : > { %v5833_v9 = vpop.f32.mrf.mxu0  ;;  %5954 = vmatmul.mubr.f32.gmra.mxu1 %v2900_v59 }
 0x48d   : > { %v2901_v48 = vmax.f32 %v2791_v63, 0.0  ;;  %v2806_v3 = vadd.f32 %v5833_v9, %v7721_v46 }
 0x48e   : > { %v2800_v30 = vpop.f32.mrf.mxu0 }
 0x48f   : > { %v2801_v0 = vadd.f32 %v2800_v30, %v7721_v46  ;;  %5956 = vmatprep.mubr.f32.mxu1 %v2901_v48  ;;  %v2904_v45 = vmax.f32 %v2806_v3, 0.0 }
 0x490   : > { %v5836_v25 = vpop.f32.mrf.mxu0  ;;  %5957 = vmatmul.mubr.f32.gmra.mxu1 %v2902_v22 }
 0x491   : > { %v2903_v39 = vmax.f32 %v2801_v0, 0.0  ;;  %v2816_v53 = vadd.f32 %v5836_v25, %v7721_v46 }
 0x492   : > { %v2810_v55 = vpop.f32.mrf.mxu0 }
 0x493   : > { %v2811_v42 = vadd.f32 %v2810_v55, %v7721_v46  ;;  %5959 = vmatprep.mubr.f32.mxu1 %v2903_v39  ;;  %v2906_v41 = vmax.f32 %v2816_v53, 0.0 }
 0x494   : > { %v5839_v54 = vpop.f32.mrf.mxu0  ;;  %5960 = vmatmul.mubr.f32.gmra.mxu1 %v2904_v45 }
 0x495   : > { %v2905_v59 = vmax.f32 %v2811_v42, 0.0  ;;  %v2826_v63 = vadd.f32 %v5839_v54, %v7721_v46 }
 0x496   : > { %v2820_v9 = vpop.f32.mrf.mxu0 }
 0x497   : > { %v2821_v30 = vadd.f32 %v2820_v9, %v7721_v46  ;;  %5962 = vmatprep.mubr.f32.mxu1 %v2905_v59  ;;  %v2908_v3 = vmax.f32 %v2826_v63, 0.0  ;;  %v4563_v63 = vld [vmem:[%s8213_s1 + $0x3f8] sm:$0xff] }
 0x498   : > { %v5842_v48 = vpop.f32.mrf.mxu0  ;;  %5963 = vmatmul.mubr.f32.gmra.mxu1 %v2906_v41  ;;  %6102 = vmatprep.subr.mxu1 %v4563_v63 }
 0x499   : > { %v2907_v22 = vmax.f32 %v2821_v30, 0.0  ;;  %v2836_v0 = vadd.f32 %v5842_v48, %v7721_v46  ;;  %6103 = vmatpush3.msra.mxu1 %v4563_v63  ;;  %v4562_v30 = vld [vmem:[%s8213_s1 + $0x3f0] sm:$0xff]  ;;  %v4560_v48 = vld [vmem:[%s8213_s1 + $0x3e0] sm:$0xff] }
 0x49a   : > { %v2830_v25 = vpop.f32.mrf.mxu0  ;;  %6104 = vmatprep.subr.mxu1 %v4562_v30 }
 0x49b   : > { %v2831_v55 = vadd.f32 %v2830_v25, %v7721_v46  ;;  %5965 = vmatprep.mubr.f32.mxu1 %v2907_v22  ;;  %v2910_v53 = vmax.f32 %v2836_v0, 0.0  ;;  %6105 = vmatpush3.msra.mxu1 %v4562_v30  ;;  %v4559_v22 = vld [vmem:[%s8213_s1 + $0x3d8] sm:$0xff]  ;;  %v2932_v0 = vsub.s32 5, %v6655_v38 }
 0x49c   : > { %v5845_v39 = vpop.f32.mrf.mxu0  ;;  %5966 = vmatmul.mubr.f32.gmra.mxu1 %v2908_v3  ;;  %v4558_v3 = vld [vmem:[%s8213_s1 + $0x3d0] sm:$0xff] }
 0x49d   : > { %v2909_v45 = vmax.f32 %v2831_v55, 0.0  ;;  %v2846_v42 = vadd.f32 %v5845_v39, %v7721_v46  ;;  %v7837_v25 = vrot.slane %v7718_v13, %v2932_v0  ;;  %v4557_v39 = vld [vmem:[%s8213_s1 + $0x3c8] sm:$0xff]  ;;  %v4555_v13 = vld [vmem:[%s8213_s1 + $0x3b8] sm:$0xff] }
 0x49e   : > { %v2840_v54 = vpop.f32.mrf.mxu0 }
 0x49f   : > { %v2841_v9 = vadd.f32 %v2840_v54, %v7721_v46  ;;  %5968 = vmatprep.mubr.f32.mxu1 %v2909_v45  ;;  %v2912_v41 = vmax.f32 %v2846_v42, 0.0  ;;  %v4561_v46 = vld [vmem:[%s8213_s1 + $0x3e8] sm:$0xff] }
 0x4a0   : > { %5969 = vmatmul.mubr.f32.gmra.mxu1 %v2910_v53  ;;  %6106 = vmatprep.subr.mxu1 %v4561_v46 }
 0x4a1   : > { %v2911_v59 = vmax.f32 %v2841_v9, 0.0  ;;  %6107 = vmatpush3.msra.mxu1 %v4561_v46  ;;  %v4556_v9 = vld [vmem:[%s8213_s1 + $0x3c0] sm:$0xff]  ;;  %v4554_v46 = vld [vmem:[%s8213_s1 + $0x3b0] sm:$0xff] }
 0x4a2   : > { %6108 = vmatprep.subr.mxu1 %v4560_v48 }
 0x4a3   : > { %5971 = vmatprep.mubr.f32.mxu1 %v2911_v59  ;;  %6109 = vmatpush3.msra.mxu1 %v4560_v48 }
 0x4a4   : > { %5972 = vmatmul.mubr.f32.gmra.mxu1 %v2912_v41  ;;  %6110 = vmatprep.subr.mxu1 %v4559_v22 }
 0x4a5   : > { %6111 = vmatpush3.msra.mxu1 %v4559_v22 }
 0x4a6   : > { %6112 = vmatprep.subr.mxu1 %v4558_v3 }
 0x4a7   : > { %6113 = vmatpush3.msra.mxu1 %v4558_v3  ;;  %v4553_v3 = vld [vmem:[%s8213_s1 + $0x3a8] sm:$0xff] }
 0x4a8   : > { %6114 = vmatprep.subr.mxu1 %v4557_v39 }
 0x4a9   : > { %6115 = vmatpush3.msra.mxu1 %v4557_v39 }
 0x4aa   : > { %6116 = vmatprep.subr.mxu1 %v4556_v9 }
 0x4ab   : > { %6117 = vmatpush3.msra.mxu1 %v4556_v9  ;;  %v4551_v9 = vld [vmem:[%s8213_s1 + $0x398] sm:$0xff] }
 0x4ac   : > { %6118 = vmatprep.subr.mxu1 %v4555_v13 }
 0x4ad   : > { %6119 = vmatpush3.msra.mxu1 %v4555_v13 }
 0x4ae   : > { %6120 = vmatprep.subr.mxu1 %v4554_v46 }
 0x4af   : > { %6121 = vmatpush3.msra.mxu1 %v4554_v46 }
 0x4b0   : > { %6122 = vmatprep.subr.mxu1 %v4553_v3 }
 0x4b1   : > { %6123 = vmatpush3.msra.mxu1 %v4553_v3 }
 0x4e8   : > { %v5880_v55 = vpop.f32.mrf.mxu1 }
 0x4e9   : > { %v3006_v45 = vadd.f32 %v5880_v55, %v7837_v25 }
 0x4ea   : > { %v3000_v53 = vpop.f32.mrf.mxu1 }
 0x4eb   : > { %v3001_v42 = vadd.f32 %v3000_v53, %v7837_v25  ;;  %v3320_v41 = vmax.f32 %v3006_v45, 0.0  ;;  %v4552_v53 = vld [vmem:[%s8213_s1 + $0x3a0] sm:$0xff] }
 0x4ec   : > { %v5883_v54 = vpop.f32.mrf.mxu1  ;;  %6124 = vmatprep.subr.mxu1 %v4552_v53 }
 0x4ed   : > { %v3319_v59 = vmax.f32 %v3001_v42, 0.0  ;;  %v3016_v63 = vadd.f32 %v5883_v54, %v7837_v25  ;;  %6125 = vmatpush3.msra.mxu1 %v4552_v53 }
 0x4ee   : > { %v3010_v30 = vpop.f32.mrf.mxu1  ;;  %6126 = vmatprep.subr.mxu1 %v4551_v9 }
 0x4ef   : > { %v3011_v48 = vadd.f32 %v3010_v30, %v7837_v25  ;;  %6006 = vmatprep.mubr.f32.mxu0 %v3319_v59  ;;  %v3322_v55 = vmax.f32 %v3016_v63, 0.0  ;;  %v4550_v30 = vld [vmem:[%s8213_s1 + $0x390] sm:$0xff]  ;;  %6127 = vmatpush3.msra.mxu1 %v4551_v9 }
 0x4f0   : > { %v5886_v22 = vpop.f32.mrf.mxu1  ;;  %6007 = vmatmul.mubr.f32.vlgmr.msra.gmra.mxu0 %v3320_v41  ;;  %6128 = vmatprep.subr.mxu1 %v4550_v30 }
 0x4f1   : > { %v3321_v0 = vmax.f32 %v3011_v48, 0.0  ;;  %v3026_v39 = vadd.f32 %v5886_v22, %v7837_v25  ;;  %v4549_v22 = vld [vmem:[%s8213_s1 + $0x388] sm:$0xff]  ;;  %6129 = vmatpush3.msra.mxu1 %v4550_v30 }
 0x4f2   : > { %v3020_v45 = vpop.f32.mrf.mxu1  ;;  %6130 = vmatprep.subr.mxu1 %v4549_v22 }
 0x4f3   : > { %v3021_v42 = vadd.f32 %v3020_v45, %v7837_v25  ;;  %6009 = vmatprep.mubr.f32.mxu0 %v3321_v0  ;;  %v3324_v59 = vmax.f32 %v3026_v39, 0.0  ;;  %v4548_v45 = vld [vmem:[%s8213_s1 + $0x380] sm:$0xff]  ;;  %6131 = vmatpush3.msra.mxu1 %v4549_v22 }
 0x4f4   : > { %v5889_v54 = vpop.f32.mrf.mxu1  ;;  %6010 = vmatmul.mubr.f32.gmra.mxu0 %v3322_v55  ;;  %6132 = vmatprep.subr.mxu1 %v4548_v45 }
 0x4f5   : > { %v3323_v13 = vmax.f32 %v3021_v42, 0.0  ;;  %v3036_v41 = vadd.f32 %v5889_v54, %v7837_v25  ;;  %6133 = vmatpush3.msra.mxu1 %v4548_v45 }
 0x4f6   : > { %v3030_v63 = vpop.f32.mrf.mxu1 }
 0x4f7   : > { %v3031_v46 = vadd.f32 %v3030_v63, %v7837_v25  ;;  %6012 = vmatprep.mubr.f32.mxu0 %v3323_v13  ;;  %v3326_v0 = vmax.f32 %v3036_v41, 0.0 }
 0x4f8   : > { %v5892_v48 = vpop.f32.mrf.mxu1  ;;  %6013 = vmatmul.mubr.f32.gmra.mxu0 %v3324_v59 }
 0x4f9   : > { %v3325_v3 = vmax.f32 %v3031_v46, 0.0  ;;  %v3046_v55 = vadd.f32 %v5892_v48, %v7837_v25 }
 0x4fa   : > { %v3040_v39 = vpop.f32.mrf.mxu1 }
 0x4fb   : > { %v3041_v53 = vadd.f32 %v3040_v39, %v7837_v25  ;;  %6015 = vmatprep.mubr.f32.mxu0 %v3325_v3  ;;  %v3328_v9 = vmax.f32 %v3046_v55, 0.0 }
 0x4fc   : > { %v5895_v42 = vpop.f32.mrf.mxu1  ;;  %6016 = vmatmul.mubr.f32.gmra.mxu0 %v3326_v0 }
 0x4fd   : > { %v3327_v54 = vmax.f32 %v3041_v53, 0.0  ;;  %v3056_v13 = vadd.f32 %v5895_v42, %v7837_v25 }
 0x4fe   : > { %v3050_v59 = vpop.f32.mrf.mxu1 }
 0x4ff   : > { %v3051_v41 = vadd.f32 %v3050_v59, %v7837_v25  ;;  %6018 = vmatprep.mubr.f32.mxu0 %v3327_v54  ;;  %v3330_v46 = vmax.f32 %v3056_v13, 0.0 }
 0x500   : > { %v5898_v63 = vpop.f32.mrf.mxu1  ;;  %6019 = vmatmul.mubr.f32.gmra.mxu0 %v3328_v9 }
 0x501   : > { %v3329_v30 = vmax.f32 %v3051_v41, 0.0  ;;  %v3066_v48 = vadd.f32 %v5898_v63, %v7837_v25 }
 0x502   : > { %v3060_v3 = vpop.f32.mrf.mxu1 }
 0x503   : > { %v3061_v0 = vadd.f32 %v3060_v3, %v7837_v25  ;;  %6021 = vmatprep.mubr.f32.mxu0 %v3329_v30  ;;  %v3332_v39 = vmax.f32 %v3066_v48, 0.0 }
 0x504   : > { %v5901_v22 = vpop.f32.mrf.mxu1  ;;  %6022 = vmatmul.mubr.f32.gmra.mxu0 %v3330_v46 }
 0x505   : > { %v3331_v55 = vmax.f32 %v3061_v0, 0.0  ;;  %v3076_v53 = vadd.f32 %v5901_v22, %v7837_v25 }
 0x506   : > { %v3070_v45 = vpop.f32.mrf.mxu1 }
 0x507   : > { %v3071_v42 = vadd.f32 %v3070_v45, %v7837_v25  ;;  %6024 = vmatprep.mubr.f32.mxu0 %v3331_v55  ;;  %v3334_v13 = vmax.f32 %v3076_v53, 0.0 }
 0x508   : > { %v5904_v54 = vpop.f32.mrf.mxu1  ;;  %6025 = vmatmul.mubr.f32.gmra.mxu0 %v3332_v39 }
 0x509   : > { %v3333_v9 = vmax.f32 %v3071_v42, 0.0  ;;  %v3086_v59 = vadd.f32 %v5904_v54, %v7837_v25 }
 0x50a   : > { %v3080_v41 = vpop.f32.mrf.mxu1 }
 0x50b   : > { %v3081_v63 = vadd.f32 %v3080_v41, %v7837_v25  ;;  %6027 = vmatprep.mubr.f32.mxu0 %v3333_v9  ;;  %v3336_v48 = vmax.f32 %v3086_v59, 0.0 }
 0x50c   : > { %v5907_v30 = vpop.f32.mrf.mxu1  ;;  %6028 = vmatmul.mubr.f32.gmra.mxu0 %v3334_v13 }
 0x50d   : > { %v3335_v46 = vmax.f32 %v3081_v63, 0.0  ;;  %v3096_v3 = vadd.f32 %v5907_v30, %v7837_v25 }
 0x50e   : > { %v3090_v0 = vpop.f32.mrf.mxu1 }
 0x50f   : > { %v3091_v22 = vadd.f32 %v3090_v0, %v7837_v25  ;;  %6030 = vmatprep.mubr.f32.mxu0 %v3335_v46  ;;  %v3338_v53 = vmax.f32 %v3096_v3, 0.0 }
 0x510   : > { %v5910_v55 = vpop.f32.mrf.mxu1  ;;  %6031 = vmatmul.mubr.f32.gmra.mxu0 %v3336_v48 }
 0x511   : > { %v3337_v39 = vmax.f32 %v3091_v22, 0.0  ;;  %v3106_v45 = vadd.f32 %v5910_v55, %v7837_v25 }
 0x512   : > { %v3100_v42 = vpop.f32.mrf.mxu1 }
 0x513   : > { %v3101_v54 = vadd.f32 %v3100_v42, %v7837_v25  ;;  %6033 = vmatprep.mubr.f32.mxu0 %v3337_v39  ;;  %v3340_v59 = vmax.f32 %v3106_v45, 0.0 }
 0x514   : > { %v5913_v9 = vpop.f32.mrf.mxu1  ;;  %6034 = vmatmul.mubr.f32.gmra.mxu0 %v3338_v53 }
 0x515   : > { %v3339_v13 = vmax.f32 %v3101_v54, 0.0  ;;  %v3116_v41 = vadd.f32 %v5913_v9, %v7837_v25 }
 0x516   : > { %v3110_v63 = vpop.f32.mrf.mxu1 }
 0x517   : > { %v3111_v30 = vadd.f32 %v3110_v63, %v7837_v25  ;;  %6036 = vmatprep.mubr.f32.mxu0 %v3339_v13  ;;  %v3342_v3 = vmax.f32 %v3116_v41, 0.0 }
 0x518   : > { %v5916_v46 = vpop.f32.mrf.mxu1  ;;  %6037 = vmatmul.mubr.f32.gmra.mxu0 %v3340_v59 }
 0x519   : > { %v3341_v48 = vmax.f32 %v3111_v30, 0.0  ;;  %v3126_v0 = vadd.f32 %v5916_v46, %v7837_v25 }
 0x51a   : > { %v3120_v22 = vpop.f32.mrf.mxu1 }
 0x51b   : > { %v3121_v55 = vadd.f32 %v3120_v22, %v7837_v25  ;;  %6039 = vmatprep.mubr.f32.mxu0 %v3341_v48  ;;  %v3344_v45 = vmax.f32 %v3126_v0, 0.0 }
 0x51c   : > { %v5919_v39 = vpop.f32.mrf.mxu1  ;;  %6040 = vmatmul.mubr.f32.gmra.mxu0 %v3342_v3 }
 0x51d   : > { %v3343_v53 = vmax.f32 %v3121_v55, 0.0  ;;  %v3136_v42 = vadd.f32 %v5919_v39, %v7837_v25 }
 0x51e   : > { %v3130_v54 = vpop.f32.mrf.mxu1 }
 0x51f   : > { %v3131_v9 = vadd.f32 %v3130_v54, %v7837_v25  ;;  %6042 = vmatprep.mubr.f32.mxu0 %v3343_v53  ;;  %v3346_v41 = vmax.f32 %v3136_v42, 0.0 }
 0x520   : > { %v5922_v13 = vpop.f32.mrf.mxu1  ;;  %6043 = vmatmul.mubr.f32.gmra.mxu0 %v3344_v45 }
 0x521   : > { %v3345_v59 = vmax.f32 %v3131_v9, 0.0  ;;  %v3146_v63 = vadd.f32 %v5922_v13, %v7837_v25 }
 0x522   : > { %v3140_v30 = vpop.f32.mrf.mxu1 }
 0x523   : > { %v3141_v46 = vadd.f32 %v3140_v30, %v7837_v25  ;;  %6045 = vmatprep.mubr.f32.mxu0 %v3345_v59  ;;  %v3348_v0 = vmax.f32 %v3146_v63, 0.0 }
 0x524   : > { %v5925_v48 = vpop.f32.mrf.mxu1  ;;  %6046 = vmatmul.mubr.f32.gmra.mxu0 %v3346_v41 }
 0x525   : > { %v3347_v3 = vmax.f32 %v3141_v46, 0.0  ;;  %v3156_v22 = vadd.f32 %v5925_v48, %v7837_v25 }
 0x526   : > { %v3150_v55 = vpop.f32.mrf.mxu1 }
 0x527   : > { %v3151_v39 = vadd.f32 %v3150_v55, %v7837_v25  ;;  %6048 = vmatprep.mubr.f32.mxu0 %v3347_v3  ;;  %v3350_v42 = vmax.f32 %v3156_v22, 0.0 }
 0x528   : > { %v5928_v53 = vpop.f32.mrf.mxu1  ;;  %6049 = vmatmul.mubr.f32.gmra.mxu0 %v3348_v0 }
 0x529   : > { %v3349_v45 = vmax.f32 %v3151_v39, 0.0  ;;  %v3166_v54 = vadd.f32 %v5928_v53, %v7837_v25 }
 0x52a   : > { %v3160_v9 = vpop.f32.mrf.mxu1 }
 0x52b   : > { %v3161_v13 = vadd.f32 %v3160_v9, %v7837_v25  ;;  %6051 = vmatprep.mubr.f32.mxu0 %v3349_v45  ;;  %v3352_v63 = vmax.f32 %v3166_v54, 0.0 }
 0x52c   : > { %v5931_v59 = vpop.f32.mrf.mxu1  ;;  %6052 = vmatmul.mubr.f32.gmra.mxu0 %v3350_v42 }
 0x52d   : > { %v3351_v41 = vmax.f32 %v3161_v13, 0.0  ;;  %v3176_v30 = vadd.f32 %v5931_v59, %v7837_v25 }
 0x52e   : > { %v3170_v46 = vpop.f32.mrf.mxu1 }
 0x52f   : > { %v3171_v48 = vadd.f32 %v3170_v46, %v7837_v25  ;;  %6054 = vmatprep.mubr.f32.mxu0 %v3351_v41  ;;  %v3354_v22 = vmax.f32 %v3176_v30, 0.0 }
 0x530   : > { %v5934_v3 = vpop.f32.mrf.mxu1  ;;  %6055 = vmatmul.mubr.f32.gmra.mxu0 %v3352_v63 }
 0x531   : > { %v3353_v0 = vmax.f32 %v3171_v48, 0.0  ;;  %v3186_v55 = vadd.f32 %v5934_v3, %v7837_v25 }
 0x532   : > { %v3180_v39 = vpop.f32.mrf.mxu1 }
 0x533   : > { %v3181_v53 = vadd.f32 %v3180_v39, %v7837_v25  ;;  %6057 = vmatprep.mubr.f32.mxu0 %v3353_v0  ;;  %v3356_v54 = vmax.f32 %v3186_v55, 0.0 }
 0x534   : > { %v5937_v45 = vpop.f32.mrf.mxu1  ;;  %6058 = vmatmul.mubr.f32.gmra.mxu0 %v3354_v22 }
 0x535   : > { %v3355_v42 = vmax.f32 %v3181_v53, 0.0  ;;  %v3196_v9 = vadd.f32 %v5937_v45, %v7837_v25 }
 0x536   : > { %v3190_v13 = vpop.f32.mrf.mxu1 }
 0x537   : > { %v3191_v59 = vadd.f32 %v3190_v13, %v7837_v25  ;;  %6060 = vmatprep.mubr.f32.mxu0 %v3355_v42  ;;  %v3358_v30 = vmax.f32 %v3196_v9, 0.0 }
 0x538   : > { %v5940_v41 = vpop.f32.mrf.mxu1  ;;  %6061 = vmatmul.mubr.f32.gmra.mxu0 %v3356_v54 }
 0x539   : > { %v3357_v63 = vmax.f32 %v3191_v59, 0.0  ;;  %v3206_v46 = vadd.f32 %v5940_v41, %v7837_v25 }
 0x53a   : > { %v3200_v48 = vpop.f32.mrf.mxu1 }
 0x53b   : > { %v3201_v3 = vadd.f32 %v3200_v48, %v7837_v25  ;;  %6063 = vmatprep.mubr.f32.mxu0 %v3357_v63  ;;  %v3360_v55 = vmax.f32 %v3206_v46, 0.0 }
 0x53c   : > { %v5943_v0 = vpop.f32.mrf.mxu1  ;;  %6064 = vmatmul.mubr.f32.gmra.mxu0 %v3358_v30 }
 0x53d   : > { %v3359_v22 = vmax.f32 %v3201_v3, 0.0  ;;  %v3216_v39 = vadd.f32 %v5943_v0, %v7837_v25 }
 0x53e   : > { %v3210_v53 = vpop.f32.mrf.mxu1 }
 0x53f   : > { %v3211_v45 = vadd.f32 %v3210_v53, %v7837_v25  ;;  %6066 = vmatprep.mubr.f32.mxu0 %v3359_v22  ;;  %v3362_v9 = vmax.f32 %v3216_v39, 0.0 }
 0x540   : > { %v5946_v42 = vpop.f32.mrf.mxu1  ;;  %6067 = vmatmul.mubr.f32.gmra.mxu0 %v3360_v55 }
 0x541   : > { %v3361_v54 = vmax.f32 %v3211_v45, 0.0  ;;  %v3226_v13 = vadd.f32 %v5946_v42, %v7837_v25 }
 0x542   : > { %v3220_v59 = vpop.f32.mrf.mxu1 }
 0x543   : > { %v3221_v41 = vadd.f32 %v3220_v59, %v7837_v25  ;;  %6069 = vmatprep.mubr.f32.mxu0 %v3361_v54  ;;  %v3364_v46 = vmax.f32 %v3226_v13, 0.0 }
 0x544   : > { %v5949_v63 = vpop.f32.mrf.mxu1  ;;  %6070 = vmatmul.mubr.f32.gmra.mxu0 %v3362_v9 }
 0x545   : > { %v3363_v30 = vmax.f32 %v3221_v41, 0.0  ;;  %v3236_v48 = vadd.f32 %v5949_v63, %v7837_v25 }
 0x546   : > { %v3230_v3 = vpop.f32.mrf.mxu1 }
 0x547   : > { %v3231_v0 = vadd.f32 %v3230_v3, %v7837_v25  ;;  %6072 = vmatprep.mubr.f32.mxu0 %v3363_v30  ;;  %v3366_v39 = vmax.f32 %v3236_v48, 0.0 }
 0x548   : > { %v5952_v22 = vpop.f32.mrf.mxu1  ;;  %6073 = vmatmul.mubr.f32.gmra.mxu0 %v3364_v46 }
 0x549   : > { %v3365_v55 = vmax.f32 %v3231_v0, 0.0  ;;  %v3246_v53 = vadd.f32 %v5952_v22, %v7837_v25 }
 0x54a   : > { %v3240_v45 = vpop.f32.mrf.mxu1 }
 0x54b   : > { %v3241_v42 = vadd.f32 %v3240_v45, %v7837_v25  ;;  %6075 = vmatprep.mubr.f32.mxu0 %v3365_v55  ;;  %v3368_v13 = vmax.f32 %v3246_v53, 0.0 }
 0x54c   : > { %v5955_v54 = vpop.f32.mrf.mxu1  ;;  %6076 = vmatmul.mubr.f32.gmra.mxu0 %v3366_v39 }
 0x54d   : > { %v3367_v9 = vmax.f32 %v3241_v42, 0.0  ;;  %v3256_v59 = vadd.f32 %v5955_v54, %v7837_v25 }
 0x54e   : > { %v3250_v41 = vpop.f32.mrf.mxu1 }
 0x54f   : > { %v3251_v63 = vadd.f32 %v3250_v41, %v7837_v25  ;;  %6078 = vmatprep.mubr.f32.mxu0 %v3367_v9  ;;  %v3370_v48 = vmax.f32 %v3256_v59, 0.0 }
 0x550   : > { %v5958_v30 = vpop.f32.mrf.mxu1  ;;  %6079 = vmatmul.mubr.f32.gmra.mxu0 %v3368_v13 }
 0x551   : > { %v3369_v46 = vmax.f32 %v3251_v63, 0.0  ;;  %v3266_v3 = vadd.f32 %v5958_v30, %v7837_v25 }
 0x552   : > { %v3260_v0 = vpop.f32.mrf.mxu1 }
 0x553   : > { %v3261_v22 = vadd.f32 %v3260_v0, %v7837_v25  ;;  %6081 = vmatprep.mubr.f32.mxu0 %v3369_v46  ;;  %v3372_v53 = vmax.f32 %v3266_v3, 0.0 }
 0x554   : > { %v5961_v55 = vpop.f32.mrf.mxu1  ;;  %6082 = vmatmul.mubr.f32.gmra.mxu0 %v3370_v48 }
 0x555   : > { %v3371_v39 = vmax.f32 %v3261_v22, 0.0  ;;  %v3276_v45 = vadd.f32 %v5961_v55, %v7837_v25 }
 0x556   : > { %v3270_v42 = vpop.f32.mrf.mxu1 }
 0x557   : > { %v3271_v54 = vadd.f32 %v3270_v42, %v7837_v25  ;;  %6084 = vmatprep.mubr.f32.mxu0 %v3371_v39  ;;  %v3374_v59 = vmax.f32 %v3276_v45, 0.0 }
 0x558   : > { %v5964_v9 = vpop.f32.mrf.mxu1  ;;  %6085 = vmatmul.mubr.f32.gmra.mxu0 %v3372_v53 }
 0x559   : > { %v3373_v13 = vmax.f32 %v3271_v54, 0.0  ;;  %v3286_v41 = vadd.f32 %v5964_v9, %v7837_v25 }
 0x55a   : > { %v3280_v63 = vpop.f32.mrf.mxu1 }
 0x55b   : > { %v3281_v30 = vadd.f32 %v3280_v63, %v7837_v25  ;;  %6087 = vmatprep.mubr.f32.mxu0 %v3373_v13  ;;  %v3376_v3 = vmax.f32 %v3286_v41, 0.0 }
 0x55c   : > { %v5967_v46 = vpop.f32.mrf.mxu1  ;;  %6088 = vmatmul.mubr.f32.gmra.mxu0 %v3374_v59 }
 0x55d   : > { %v3375_v48 = vmax.f32 %v3281_v30, 0.0  ;;  %v3296_v0 = vadd.f32 %v5967_v46, %v7837_v25 }
 0x55e   : > { %v3290_v22 = vpop.f32.mrf.mxu1 }
 0x55f   : > { %v3291_v55 = vadd.f32 %v3290_v22, %v7837_v25  ;;  %6090 = vmatprep.mubr.f32.mxu0 %v3375_v48  ;;  %v3378_v45 = vmax.f32 %v3296_v0, 0.0  ;;  %v3402_v0 = vsub.s32 6, %v6655_v38  ;;  %v7937_v22 = vld [vmem:[%s8214_s2] sm:$0xff] }
 0x560   : > { %v5970_v39 = vpop.f32.mrf.mxu1  ;;  %6091 = vmatmul.mubr.f32.gmra.mxu0 %v3376_v3 }
 0x561   : > { %v3377_v53 = vmax.f32 %v3291_v55, 0.0  ;;  %v3306_v42 = vadd.f32 %v5970_v39, %v7837_v25  ;;  %v7940_v55 = vrot.slane %v7937_v22, %v3402_v0 }
 0x562   : > { %v3300_v54 = vpop.f32.mrf.mxu1 }
 0x563   : > { %v3301_v9 = vadd.f32 %v3300_v54, %v7837_v25  ;;  %6093 = vmatprep.mubr.f32.mxu0 %v3377_v53  ;;  %v3380_v41 = vmax.f32 %v3306_v42, 0.0 }
 0x564   : > { %v5973_v13 = vpop.f32.mrf.mxu1  ;;  %6094 = vmatmul.mubr.f32.gmra.mxu0 %v3378_v45 }
 0x565   : > { %v3379_v59 = vmax.f32 %v3301_v9, 0.0  ;;  %v3316_v63 = vadd.f32 %v5973_v13, %v7837_v25 }
 0x566   : > { %v3310_v30 = vpop.f32.mrf.mxu1 }
 0x567   : > { %v3311_v46 = vadd.f32 %v3310_v30, %v7837_v25  ;;  %6096 = vmatprep.mubr.f32.mxu0 %v3379_v59  ;;  %v3382_v3 = vmax.f32 %v3316_v63, 0.0 }
 0x568   : > { %6097 = vmatmul.mubr.f32.gmra.mxu0 %v3380_v41 }
 0x569   : > { %v3381_v48 = vmax.f32 %v3311_v46, 0.0 }
 0x56b   : > { %6099 = vmatprep.mubr.f32.mxu0 %v3381_v48 }
 0x56c   : > { %6100 = vmatmul.mubr.f32.gmra.mxu0 %v3382_v3 }
 0x5b0   : > { %v6008_v39 = vpop.f32.mrf.mxu0 }
 0x5b1   : > { %v3476_v53 = vadd.f32 %v6008_v39, %v7940_v55 }
 0x5b2   : > { %v3470_v25 = vpop.f32.mrf.mxu0 }
 0x5b3   : > { %v3471_v45 = vadd.f32 %v3470_v25, %v7940_v55  ;;  %v3790_v9 = vmax.f32 %v3476_v53, 0.0 }
 0x5b4   : > { %v6011_v42 = vpop.f32.mrf.mxu0 }
 0x5b5   : > { %v3789_v54 = vmax.f32 %v3471_v45, 0.0  ;;  %v3486_v13 = vadd.f32 %v6011_v42, %v7940_v55 }
 0x5b6   : > { %v3480_v59 = vpop.f32.mrf.mxu0 }
 0x5b7   : > { %v3481_v41 = vadd.f32 %v3480_v59, %v7940_v55  ;;  %6134 = vmatprep.mubr.f32.mxu1 %v3789_v54  ;;  %v3792_v46 = vmax.f32 %v3486_v13, 0.0 }
 0x5b8   : > { %v6014_v63 = vpop.f32.mrf.mxu0  ;;  %6135 = vmatmul.mubr.f32.vlgmr.msra.gmra.mxu1 %v3790_v9 }
 0x5b9   : > { %v3791_v30 = vmax.f32 %v3481_v41, 0.0  ;;  %v3496_v48 = vadd.f32 %v6014_v63, %v7940_v55 }
 0x5ba   : > { %v3490_v3 = vpop.f32.mrf.mxu0 }
 0x5bb   : > { %v3491_v0 = vadd.f32 %v3490_v3, %v7940_v55  ;;  %6137 = vmatprep.mubr.f32.mxu1 %v3791_v30  ;;  %v3794_v53 = vmax.f32 %v3496_v48, 0.0 }
 0x5bc   : > { %v6017_v39 = vpop.f32.mrf.mxu0  ;;  %6138 = vmatmul.mubr.f32.gmra.mxu1 %v3792_v46 }
 0x5bd   : > { %v3793_v25 = vmax.f32 %v3491_v0, 0.0  ;;  %v3506_v45 = vadd.f32 %v6017_v39, %v7940_v55 }
 0x5be   : > { %v3500_v42 = vpop.f32.mrf.mxu0 }
 0x5bf   : > { %v3501_v59 = vadd.f32 %v3500_v42, %v7940_v55  ;;  %6140 = vmatprep.mubr.f32.mxu1 %v3793_v25  ;;  %v3796_v13 = vmax.f32 %v3506_v45, 0.0 }
 0x5c0   : > { %v6020_v54 = vpop.f32.mrf.mxu0  ;;  %6141 = vmatmul.mubr.f32.gmra.mxu1 %v3794_v53 }
 0x5c1   : > { %v3795_v9 = vmax.f32 %v3501_v59, 0.0  ;;  %v3516_v41 = vadd.f32 %v6020_v54, %v7940_v55 }
 0x5c2   : > { %v3510_v63 = vpop.f32.mrf.mxu0 }
 0x5c3   : > { %v3511_v3 = vadd.f32 %v3510_v63, %v7940_v55  ;;  %6143 = vmatprep.mubr.f32.mxu1 %v3795_v9  ;;  %v3798_v48 = vmax.f32 %v3516_v41, 0.0 }
 0x5c4   : > { %v6023_v30 = vpop.f32.mrf.mxu0  ;;  %6144 = vmatmul.mubr.f32.gmra.mxu1 %v3796_v13 }
 0x5c5   : > { %v3797_v46 = vmax.f32 %v3511_v3, 0.0  ;;  %v3526_v0 = vadd.f32 %v6023_v30, %v7940_v55 }
 0x5c6   : > { %v3520_v39 = vpop.f32.mrf.mxu0 }
 0x5c7   : > { %v3521_v42 = vadd.f32 %v3520_v39, %v7940_v55  ;;  %6146 = vmatprep.mubr.f32.mxu1 %v3797_v46  ;;  %v3800_v45 = vmax.f32 %v3526_v0, 0.0 }
 0x5c8   : > { %v6026_v25 = vpop.f32.mrf.mxu0  ;;  %6147 = vmatmul.mubr.f32.gmra.mxu1 %v3798_v48 }
 0x5c9   : > { %v3799_v53 = vmax.f32 %v3521_v42, 0.0  ;;  %v3536_v59 = vadd.f32 %v6026_v25, %v7940_v55 }
 0x5ca   : > { %v3530_v54 = vpop.f32.mrf.mxu0 }
 0x5cb   : > { %v3531_v63 = vadd.f32 %v3530_v54, %v7940_v55  ;;  %6149 = vmatprep.mubr.f32.mxu1 %v3799_v53  ;;  %v3802_v41 = vmax.f32 %v3536_v59, 0.0 }
 0x5cc   : > { %v6029_v9 = vpop.f32.mrf.mxu0  ;;  %6150 = vmatmul.mubr.f32.gmra.mxu1 %v3800_v45 }
 0x5cd   : > { %v3801_v13 = vmax.f32 %v3531_v63, 0.0  ;;  %v3546_v3 = vadd.f32 %v6029_v9, %v7940_v55 }
 0x5ce   : > { %v3540_v30 = vpop.f32.mrf.mxu0 }
 0x5cf   : > { %v3541_v39 = vadd.f32 %v3540_v30, %v7940_v55  ;;  %6152 = vmatprep.mubr.f32.mxu1 %v3801_v13  ;;  %v3804_v0 = vmax.f32 %v3546_v3, 0.0 }
 0x5d0   : > { %v6032_v46 = vpop.f32.mrf.mxu0  ;;  %6153 = vmatmul.mubr.f32.gmra.mxu1 %v3802_v41 }
 0x5d1   : > { %v3803_v48 = vmax.f32 %v3541_v39, 0.0  ;;  %v3556_v42 = vadd.f32 %v6032_v46, %v7940_v55 }
 0x5d2   : > { %v3550_v25 = vpop.f32.mrf.mxu0 }
 0x5d3   : > { %v3551_v54 = vadd.f32 %v3550_v25, %v7940_v55  ;;  %6155 = vmatprep.mubr.f32.mxu1 %v3803_v48  ;;  %v3806_v59 = vmax.f32 %v3556_v42, 0.0 }
 0x5d4   : > { %v6035_v53 = vpop.f32.mrf.mxu0  ;;  %6156 = vmatmul.mubr.f32.gmra.mxu1 %v3804_v0 }
 0x5d5   : > { %v3805_v45 = vmax.f32 %v3551_v54, 0.0  ;;  %v3566_v63 = vadd.f32 %v6035_v53, %v7940_v55 }
 0x5d6   : > { %v3560_v9 = vpop.f32.mrf.mxu0 }
 0x5d7   : > { %v3561_v30 = vadd.f32 %v3560_v9, %v7940_v55  ;;  %6158 = vmatprep.mubr.f32.mxu1 %v3805_v45  ;;  %v3808_v3 = vmax.f32 %v3566_v63, 0.0 }
 0x5d8   : > { %v6038_v13 = vpop.f32.mrf.mxu0  ;;  %6159 = vmatmul.mubr.f32.gmra.mxu1 %v3806_v59 }
 0x5d9   : > { %v3807_v41 = vmax.f32 %v3561_v30, 0.0  ;;  %v3576_v39 = vadd.f32 %v6038_v13, %v7940_v55 }
 0x5da   : > { %v3570_v46 = vpop.f32.mrf.mxu0 }
 0x5db   : > { %v3571_v25 = vadd.f32 %v3570_v46, %v7940_v55  ;;  %6161 = vmatprep.mubr.f32.mxu1 %v3807_v41  ;;  %v3810_v42 = vmax.f32 %v3576_v39, 0.0 }
 0x5dc   : > { %v6041_v48 = vpop.f32.mrf.mxu0  ;;  %6162 = vmatmul.mubr.f32.gmra.mxu1 %v3808_v3 }
 0x5dd   : > { %v3809_v0 = vmax.f32 %v3571_v25, 0.0  ;;  %v3586_v54 = vadd.f32 %v6041_v48, %v7940_v55 }
 0x5de   : > { %v3580_v53 = vpop.f32.mrf.mxu0 }
 0x5df   : > { %v3581_v9 = vadd.f32 %v3580_v53, %v7940_v55  ;;  %6164 = vmatprep.mubr.f32.mxu1 %v3809_v0  ;;  %v3812_v63 = vmax.f32 %v3586_v54, 0.0 }
 0x5e0   : > { %v6044_v45 = vpop.f32.mrf.mxu0  ;;  %6165 = vmatmul.mubr.f32.gmra.mxu1 %v3810_v42 }
 0x5e1   : > { %v3811_v59 = vmax.f32 %v3581_v9, 0.0  ;;  %v3596_v30 = vadd.f32 %v6044_v45, %v7940_v55 }
 0x5e2   : > { %v3590_v13 = vpop.f32.mrf.mxu0 }
 0x5e3   : > { %v3591_v46 = vadd.f32 %v3590_v13, %v7940_v55  ;;  %6167 = vmatprep.mubr.f32.mxu1 %v3811_v59  ;;  %v3814_v39 = vmax.f32 %v3596_v30, 0.0 }
 0x5e4   : > { %v6047_v41 = vpop.f32.mrf.mxu0  ;;  %6168 = vmatmul.mubr.f32.gmra.mxu1 %v3812_v63 }
 0x5e5   : > { %v3813_v3 = vmax.f32 %v3591_v46, 0.0  ;;  %v3606_v25 = vadd.f32 %v6047_v41, %v7940_v55 }
 0x5e6   : > { %v3600_v48 = vpop.f32.mrf.mxu0 }
 0x5e7   : > { %v3601_v53 = vadd.f32 %v3600_v48, %v7940_v55  ;;  %6170 = vmatprep.mubr.f32.mxu1 %v3813_v3  ;;  %v3816_v54 = vmax.f32 %v3606_v25, 0.0 }
 0x5e8   : > { %v6050_v0 = vpop.f32.mrf.mxu0  ;;  %6171 = vmatmul.mubr.f32.gmra.mxu1 %v3814_v39 }
 0x5e9   : > { %v3815_v42 = vmax.f32 %v3601_v53, 0.0  ;;  %v3616_v9 = vadd.f32 %v6050_v0, %v7940_v55 }
 0x5ea   : > { %v3610_v45 = vpop.f32.mrf.mxu0 }
 0x5eb   : > { %v3611_v13 = vadd.f32 %v3610_v45, %v7940_v55  ;;  %6173 = vmatprep.mubr.f32.mxu1 %v3815_v42  ;;  %v3818_v30 = vmax.f32 %v3616_v9, 0.0 }
 0x5ec   : > { %v6053_v59 = vpop.f32.mrf.mxu0  ;;  %6174 = vmatmul.mubr.f32.gmra.mxu1 %v3816_v54 }
 0x5ed   : > { %v3817_v63 = vmax.f32 %v3611_v13, 0.0  ;;  %v3626_v46 = vadd.f32 %v6053_v59, %v7940_v55 }
 0x5ee   : > { %v3620_v41 = vpop.f32.mrf.mxu0 }
 0x5ef   : > { %v3621_v48 = vadd.f32 %v3620_v41, %v7940_v55  ;;  %6176 = vmatprep.mubr.f32.mxu1 %v3817_v63  ;;  %v3820_v25 = vmax.f32 %v3626_v46, 0.0 }
 0x5f0   : > { %v6056_v3 = vpop.f32.mrf.mxu0  ;;  %6177 = vmatmul.mubr.f32.gmra.mxu1 %v3818_v30 }
 0x5f1   : > { %v3819_v39 = vmax.f32 %v3621_v48, 0.0  ;;  %v3636_v53 = vadd.f32 %v6056_v3, %v7940_v55 }
 0x5f2   : > { %v3630_v0 = vpop.f32.mrf.mxu0 }
 0x5f3   : > { %v3631_v45 = vadd.f32 %v3630_v0, %v7940_v55  ;;  %6179 = vmatprep.mubr.f32.mxu1 %v3819_v39  ;;  %v3822_v9 = vmax.f32 %v3636_v53, 0.0 }
 0x5f4   : > { %v6059_v42 = vpop.f32.mrf.mxu0  ;;  %6180 = vmatmul.mubr.f32.gmra.mxu1 %v3820_v25 }
 0x5f5   : > { %v3821_v54 = vmax.f32 %v3631_v45, 0.0  ;;  %v3646_v13 = vadd.f32 %v6059_v42, %v7940_v55 }
 0x5f6   : > { %v3640_v59 = vpop.f32.mrf.mxu0 }
 0x5f7   : > { %v3641_v41 = vadd.f32 %v3640_v59, %v7940_v55  ;;  %6182 = vmatprep.mubr.f32.mxu1 %v3821_v54  ;;  %v3824_v46 = vmax.f32 %v3646_v13, 0.0 }
 0x5f8   : > { %v6062_v63 = vpop.f32.mrf.mxu0  ;;  %6183 = vmatmul.mubr.f32.gmra.mxu1 %v3822_v9 }
 0x5f9   : > { %v3823_v30 = vmax.f32 %v3641_v41, 0.0  ;;  %v3656_v48 = vadd.f32 %v6062_v63, %v7940_v55 }
 0x5fa   : > { %v3650_v3 = vpop.f32.mrf.mxu0 }
 0x5fb   : > { %v3651_v0 = vadd.f32 %v3650_v3, %v7940_v55  ;;  %6185 = vmatprep.mubr.f32.mxu1 %v3823_v30  ;;  %v3826_v53 = vmax.f32 %v3656_v48, 0.0 }
 0x5fc   : > { %v6065_v39 = vpop.f32.mrf.mxu0  ;;  %6186 = vmatmul.mubr.f32.gmra.mxu1 %v3824_v46 }
 0x5fd   : > { %v3825_v25 = vmax.f32 %v3651_v0, 0.0  ;;  %v3666_v45 = vadd.f32 %v6065_v39, %v7940_v55 }
 0x5fe   : > { %v3660_v42 = vpop.f32.mrf.mxu0 }
 0x5ff   : > { %v3661_v59 = vadd.f32 %v3660_v42, %v7940_v55  ;;  %6188 = vmatprep.mubr.f32.mxu1 %v3825_v25  ;;  %v3828_v13 = vmax.f32 %v3666_v45, 0.0 }
 0x600   : > { %v6068_v54 = vpop.f32.mrf.mxu0  ;;  %6189 = vmatmul.mubr.f32.gmra.mxu1 %v3826_v53 }
 0x601   : > { %v3827_v9 = vmax.f32 %v3661_v59, 0.0  ;;  %v3676_v41 = vadd.f32 %v6068_v54, %v7940_v55 }
 0x602   : > { %v3670_v63 = vpop.f32.mrf.mxu0 }
 0x603   : > { %v3671_v3 = vadd.f32 %v3670_v63, %v7940_v55  ;;  %6191 = vmatprep.mubr.f32.mxu1 %v3827_v9  ;;  %v3830_v48 = vmax.f32 %v3676_v41, 0.0 }
 0x604   : > { %v6071_v30 = vpop.f32.mrf.mxu0  ;;  %6192 = vmatmul.mubr.f32.gmra.mxu1 %v3828_v13 }
 0x605   : > { %v3829_v46 = vmax.f32 %v3671_v3, 0.0  ;;  %v3686_v0 = vadd.f32 %v6071_v30, %v7940_v55 }
 0x606   : > { %v3680_v39 = vpop.f32.mrf.mxu0 }
 0x607   : > { %v3681_v42 = vadd.f32 %v3680_v39, %v7940_v55  ;;  %6194 = vmatprep.mubr.f32.mxu1 %v3829_v46  ;;  %v3832_v45 = vmax.f32 %v3686_v0, 0.0 }
 0x608   : > { %v6074_v25 = vpop.f32.mrf.mxu0  ;;  %6195 = vmatmul.mubr.f32.gmra.mxu1 %v3830_v48 }
 0x609   : > { %v3831_v53 = vmax.f32 %v3681_v42, 0.0  ;;  %v3696_v59 = vadd.f32 %v6074_v25, %v7940_v55 }
 0x60a   : > { %v3690_v54 = vpop.f32.mrf.mxu0 }
 0x60b   : > { %v3691_v63 = vadd.f32 %v3690_v54, %v7940_v55  ;;  %6197 = vmatprep.mubr.f32.mxu1 %v3831_v53  ;;  %v3834_v41 = vmax.f32 %v3696_v59, 0.0 }
 0x60c   : > { %v6077_v9 = vpop.f32.mrf.mxu0  ;;  %6198 = vmatmul.mubr.f32.gmra.mxu1 %v3832_v45 }
 0x60d   : > { %v3833_v13 = vmax.f32 %v3691_v63, 0.0  ;;  %v3706_v3 = vadd.f32 %v6077_v9, %v7940_v55 }
 0x60e   : > { %v3700_v30 = vpop.f32.mrf.mxu0 }
 0x60f   : > { %v3701_v39 = vadd.f32 %v3700_v30, %v7940_v55  ;;  %6200 = vmatprep.mubr.f32.mxu1 %v3833_v13  ;;  %v3836_v0 = vmax.f32 %v3706_v3, 0.0 }
 0x610   : > { %v6080_v46 = vpop.f32.mrf.mxu0  ;;  %6201 = vmatmul.mubr.f32.gmra.mxu1 %v3834_v41 }
 0x611   : > { %v3835_v48 = vmax.f32 %v3701_v39, 0.0  ;;  %v3716_v42 = vadd.f32 %v6080_v46, %v7940_v55 }
 0x612   : > { %v3710_v25 = vpop.f32.mrf.mxu0 }
 0x613   : > { %v3711_v54 = vadd.f32 %v3710_v25, %v7940_v55  ;;  %6203 = vmatprep.mubr.f32.mxu1 %v3835_v48  ;;  %v3838_v59 = vmax.f32 %v3716_v42, 0.0 }
 0x614   : > { %v6083_v53 = vpop.f32.mrf.mxu0  ;;  %6204 = vmatmul.mubr.f32.gmra.mxu1 %v3836_v0 }
 0x615   : > { %v3837_v45 = vmax.f32 %v3711_v54, 0.0  ;;  %v3726_v63 = vadd.f32 %v6083_v53, %v7940_v55 }
 0x616   : > { %v3720_v9 = vpop.f32.mrf.mxu0 }
 0x617   : > { %v3721_v30 = vadd.f32 %v3720_v9, %v7940_v55  ;;  %6206 = vmatprep.mubr.f32.mxu1 %v3837_v45  ;;  %v3840_v3 = vmax.f32 %v3726_v63, 0.0 }
 0x618   : > { %v6086_v13 = vpop.f32.mrf.mxu0  ;;  %6207 = vmatmul.mubr.f32.gmra.mxu1 %v3838_v59 }
 0x619   : > { %v3839_v41 = vmax.f32 %v3721_v30, 0.0  ;;  %v3736_v39 = vadd.f32 %v6086_v13, %v7940_v55 }
 0x61a   : > { %v3730_v46 = vpop.f32.mrf.mxu0 }
 0x61b   : > { %v3731_v25 = vadd.f32 %v3730_v46, %v7940_v55  ;;  %6209 = vmatprep.mubr.f32.mxu1 %v3839_v41  ;;  %v3842_v42 = vmax.f32 %v3736_v39, 0.0 }
 0x61c   : > { %v6089_v48 = vpop.f32.mrf.mxu0  ;;  %6210 = vmatmul.mubr.f32.gmra.mxu1 %v3840_v3 }
 0x61d   : > { %v3841_v0 = vmax.f32 %v3731_v25, 0.0  ;;  %v3746_v54 = vadd.f32 %v6089_v48, %v7940_v55 }
 0x61e   : > { %v3740_v53 = vpop.f32.mrf.mxu0 }
 0x61f   : > { %v3741_v9 = vadd.f32 %v3740_v53, %v7940_v55  ;;  %6212 = vmatprep.mubr.f32.mxu1 %v3841_v0  ;;  %v3844_v63 = vmax.f32 %v3746_v54, 0.0 }
 0x620   : > { %v6092_v45 = vpop.f32.mrf.mxu0  ;;  %6213 = vmatmul.mubr.f32.gmra.mxu1 %v3842_v42 }
 0x621   : > { %v3843_v59 = vmax.f32 %v3741_v9, 0.0  ;;  %v3756_v30 = vadd.f32 %v6092_v45, %v7940_v55 }
 0x622   : > { %v3750_v13 = vpop.f32.mrf.mxu0 }
 0x623   : > { %v3751_v46 = vadd.f32 %v3750_v13, %v7940_v55  ;;  %6215 = vmatprep.mubr.f32.mxu1 %v3843_v59  ;;  %v3846_v39 = vmax.f32 %v3756_v30, 0.0 }
 0x624   : > { %v6095_v41 = vpop.f32.mrf.mxu0  ;;  %6216 = vmatmul.mubr.f32.gmra.mxu1 %v3844_v63 }
 0x625   : > { %v3845_v3 = vmax.f32 %v3751_v46, 0.0  ;;  %v3766_v25 = vadd.f32 %v6095_v41, %v7940_v55 }
 0x626   : > { %v3760_v48 = vpop.f32.mrf.mxu0 }
 0x627   : > { %v3761_v53 = vadd.f32 %v3760_v48, %v7940_v55  ;;  %6218 = vmatprep.mubr.f32.mxu1 %v3845_v3  ;;  %v3848_v54 = vmax.f32 %v3766_v25, 0.0  ;;  %v3872_v48 = vsub.s32 7, %v6655_v38 }
 0x628   : > { %v6098_v0 = vpop.f32.mrf.mxu0  ;;  %6219 = vmatmul.mubr.f32.gmra.mxu1 %v3846_v39 }
 0x629   : > { %v3847_v42 = vmax.f32 %v3761_v53, 0.0  ;;  %v3776_v9 = vadd.f32 %v6098_v0, %v7940_v55  ;;  %v8008_v53 = vrot.slane %v7937_v22, %v3872_v48 }
 0x62a   : > { %v3770_v45 = vpop.f32.mrf.mxu0 }
 0x62b   : > { %v3771_v13 = vadd.f32 %v3770_v45, %v7940_v55  ;;  %6221 = vmatprep.mubr.f32.mxu1 %v3847_v42  ;;  %v3850_v30 = vmax.f32 %v3776_v9, 0.0 }
 0x62c   : > { %v6101_v59 = vpop.f32.mrf.mxu0  ;;  %6222 = vmatmul.mubr.f32.gmra.mxu1 %v3848_v54 }
 0x62d   : > { %v3849_v63 = vmax.f32 %v3771_v13, 0.0  ;;  %v3786_v46 = vadd.f32 %v6101_v59, %v7940_v55 }
 0x62e   : > { %v3780_v41 = vpop.f32.mrf.mxu0 }
 0x62f   : > { %v3781_v3 = vadd.f32 %v3780_v41, %v7940_v55  ;;  %6224 = vmatprep.mubr.f32.mxu1 %v3849_v63  ;;  %v3852_v25 = vmax.f32 %v3786_v46, 0.0 }
 0x630   : > { %6225 = vmatmul.mubr.f32.gmra.mxu1 %v3850_v30 }
 0x631   : > { %v3851_v39 = vmax.f32 %v3781_v3, 0.0 }
 0x633   : > { %6227 = vmatprep.mubr.f32.mxu1 %v3851_v39 }
 0x634   : > { %6228 = vmatmul.mubr.f32.gmra.mxu1 %v3852_v25 }
 0x678   : > { %v6136_v0 = vpop.f32.mrf.mxu1 }
 0x679   : > { %v3946_v42 = vadd.f32 %v6136_v0, %v8008_v53 }
 0x67a   : > { %v3940_v55 = vpop.f32.mrf.mxu1 }
 0x67b   : > { %v4260_v54 = vadd.f32 %v3946_v42, %v7018_v2  ;;  %v3941_v38 = vadd.f32 %v3940_v55, %v8008_v53 }
 0x67c   : > { %v6139_v22 = vpop.f32.mrf.mxu1 }
 0x67d   : > { %4324 = vst [vmem:[%s8016_s29 + $0x8] sm:$0xff] %v4260_v54  ;;  %v4259_v9 = vadd.f32 %v3941_v38, %v7027_v4  ;;  %v3956_v45 = vadd.f32 %v6139_v22, %v8008_v53 }
 0x67e   : > { %v3950_v13 = vpop.f32.mrf.mxu1 }
 0x67f   : > { %4323 = vst [vmem:[%s8016_s29] sm:$0xff] %v4259_v9  ;;  %v4262_v59 = vadd.f32 %v3956_v45, %v7033_v8  ;;  %v3951_v63 = vadd.f32 %v3950_v13, %v8008_v53 }
 0x680   : > { %v6142_v30 = vpop.f32.mrf.mxu1 }
 0x681   : > { %4326 = vst [vmem:[%s8016_s29 + $0x18] sm:$0xff] %v4262_v59  ;;  %v4261_v2 = vadd.f32 %v3951_v63, %v7042_v14  ;;  %v3966_v46 = vadd.f32 %v6142_v30, %v8008_v53 }
 0x682   : > { %v3960_v41 = vpop.f32.mrf.mxu1 }
 0x683   : > { %4325 = vst [vmem:[%s8016_s29 + $0x10] sm:$0xff] %v4261_v2  ;;  %v4264_v4 = vadd.f32 %v3966_v46, %v7048_v18  ;;  %v3961_v3 = vadd.f32 %v3960_v41, %v8008_v53 }
 0x684   : > { %v6145_v39 = vpop.f32.mrf.mxu1 }
 0x685   : > { %4328 = vst [vmem:[%s8016_s29 + $0x28] sm:$0xff] %v4264_v4  ;;  %v4263_v8 = vadd.f32 %v3961_v3, %v7054_v23  ;;  %v3976_v25 = vadd.f32 %v6145_v39, %v8008_v53 }
 0x686   : > { %v3970_v48 = vpop.f32.mrf.mxu1 }
 0x687   : > { %4327 = vst [vmem:[%s8016_s29 + $0x20] sm:$0xff] %v4263_v8  ;;  %v4266_v14 = vadd.f32 %v3976_v25, %v7063_v28  ;;  %v3971_v0 = vadd.f32 %v3970_v48, %v8008_v53 }
 0x688   : > { %v6148_v42 = vpop.f32.mrf.mxu1 }
 0x689   : > { %4330 = vst [vmem:[%s8016_s29 + $0x38] sm:$0xff] %v4266_v14  ;;  %v4265_v18 = vadd.f32 %v3971_v0, %v7069_v35  ;;  %v3986_v55 = vadd.f32 %v6148_v42, %v8008_v53 }
 0x68a   : > { %v3980_v54 = vpop.f32.mrf.mxu1 }
 0x68b   : > { %4329 = vst [vmem:[%s8016_s29 + $0x30] sm:$0xff] %v4265_v18  ;;  %v4268_v23 = vadd.f32 %v3986_v55, %v7075_v44  ;;  %v3981_v38 = vadd.f32 %v3980_v54, %v8008_v53 }
 0x68c   : > { %v6151_v22 = vpop.f32.mrf.mxu1 }
 0x68d   : > { %4332 = vst [vmem:[%s8016_s29 + $0x48] sm:$0xff] %v4268_v23  ;;  %v4267_v28 = vadd.f32 %v3981_v38, %v7081_v49  ;;  %v3996_v9 = vadd.f32 %v6151_v22, %v8008_v53 }
 0x68e   : > { %v3990_v45 = vpop.f32.mrf.mxu1 }
 0x68f   : > { %4331 = vst [vmem:[%s8016_s29 + $0x40] sm:$0xff] %v4267_v28  ;;  %v4270_v35 = vadd.f32 %v3996_v9, %v7090_v56  ;;  %v3991_v13 = vadd.f32 %v3990_v45, %v8008_v53 }
 0x690   : > { %v6154_v59 = vpop.f32.mrf.mxu1 }
 0x691   : > { %4334 = vst [vmem:[%s8016_s29 + $0x58] sm:$0xff] %v4270_v35  ;;  %v4269_v44 = vadd.f32 %v3991_v13, %v7097_v1  ;;  %v4006_v63 = vadd.f32 %v6154_v59, %v8008_v53 }
 0x692   : > { %v4000_v30 = vpop.f32.mrf.mxu1 }
 0x693   : > { %4333 = vst [vmem:[%s8016_s29 + $0x50] sm:$0xff] %v4269_v44  ;;  %v4272_v49 = vadd.f32 %v4006_v63, %v7103_v6  ;;  %v4001_v2 = vadd.f32 %v4000_v30, %v8008_v53 }
 0x694   : > { %v6157_v46 = vpop.f32.mrf.mxu1 }
 0x695   : > { %4336 = vst [vmem:[%s8016_s29 + $0x68] sm:$0xff] %v4272_v49  ;;  %v4271_v56 = vadd.f32 %v4001_v2, %v7119_v20  ;;  %v4016_v41 = vadd.f32 %v6157_v46, %v8008_v53 }
 0x696   : > { %v4010_v4 = vpop.f32.mrf.mxu1 }
 0x697   : > { %4335 = vst [vmem:[%s8016_s29 + $0x60] sm:$0xff] %v4271_v56  ;;  %v4274_v1 = vadd.f32 %v4016_v41, %v7133_v36  ;;  %v4011_v3 = vadd.f32 %v4010_v4, %v8008_v53 }
 0x698   : > { %v6160_v39 = vpop.f32.mrf.mxu1 }
 0x699   : > { %4338 = vst [vmem:[%s8016_s29 + $0x78] sm:$0xff] %v4274_v1  ;;  %v4273_v6 = vadd.f32 %v4011_v3, %v7145_v50  ;;  %v4026_v8 = vadd.f32 %v6160_v39, %v8008_v53 }
 0x69a   : > { %v4020_v25 = vpop.f32.mrf.mxu1 }
 0x69b   : > { %4337 = vst [vmem:[%s8016_s29 + $0x70] sm:$0xff] %v4273_v6  ;;  %v4276_v20 = vadd.f32 %v4026_v8, %v7159_v62  ;;  %v4021_v48 = vadd.f32 %v4020_v25, %v8008_v53  ;;  %v8254_v25 = vld [vmem:[#allocation2_spill] sm:$0xff] }
 0x69c   : > { %v6163_v14 = vpop.f32.mrf.mxu1 }
 0x69d   : > { %4340 = vst [vmem:[%s8016_s29 + $0x88] sm:$0xff] %v4276_v20  ;;  %v4275_v36 = vadd.f32 %v4021_v48, %v7171_v11  ;;  %v4036_v0 = vadd.f32 %v6163_v14, %v8008_v53  ;;  %v8255_v14 = vld [vmem:[#allocation3_spill] sm:$0xff] }
 0x69e   : > { %v4030_v42 = vpop.f32.mrf.mxu1 }
 0x69f   : > { %4339 = vst [vmem:[%s8016_s29 + $0x80] sm:$0xff] %v4275_v36  ;;  %v4278_v50 = vadd.f32 %v4036_v0, %v7185_v26  ;;  %v4031_v18 = vadd.f32 %v4030_v42, %v8008_v53  ;;  %v8256_v42 = vld [vmem:[#allocation4_spill] sm:$0xff] }
 0x6a0   : > { %v6166_v55 = vpop.f32.mrf.mxu1 }
 0x6a1   : > { %4342 = vst [vmem:[%s8016_s29 + $0x98] sm:$0xff] %v4278_v50  ;;  %v4277_v62 = vadd.f32 %v4031_v18, %v7197_v40  ;;  %v4046_v54 = vadd.f32 %v6166_v55, %v8008_v53  ;;  %v8257_v55 = vld [vmem:[#allocation5_spill] sm:$0xff] }
 0x6a2   : > { %v4040_v23 = vpop.f32.mrf.mxu1 }
 0x6a3   : > { %4341 = vst [vmem:[%s8016_s29 + $0x90] sm:$0xff] %v4277_v62  ;;  %v4280_v11 = vadd.f32 %v4046_v54, %v7211_v58  ;;  %v4041_v38 = vadd.f32 %v4040_v23, %v8008_v53 }
 0x6a4   : > { %v6169_v22 = vpop.f32.mrf.mxu1 }
 0x6a5   : > { %4344 = vst [vmem:[%s8016_s29 + $0xa8] sm:$0xff] %v4280_v11  ;;  %v4279_v26 = vadd.f32 %v4041_v38, %v7220_v37  ;;  %v4056_v28 = vadd.f32 %v6169_v22, %v8008_v53  ;;  %v8258_v11 = vld [vmem:[#allocation6_spill] sm:$0xff] }
 0x6a6   : > { %v4050_v9 = vpop.f32.mrf.mxu1 }
 0x6a7   : > { %4343 = vst [vmem:[%s8016_s29 + $0xa0] sm:$0xff] %v4279_v26  ;;  %v4282_v40 = vadd.f32 %v4056_v28, %v7231_v19  ;;  %v4051_v45 = vadd.f32 %v4050_v9, %v8008_v53  ;;  %v8259_v28 = vld [vmem:[#allocation7_spill] sm:$0xff] }
 0x6a8   : > { %v6172_v35 = vpop.f32.mrf.mxu1 }
 0x6a9   : > { %4346 = vst [vmem:[%s8016_s29 + $0xb8] sm:$0xff] %v4282_v40  ;;  %v4281_v58 = vadd.f32 %v4051_v45, %v7240_v29  ;;  %v4066_v13 = vadd.f32 %v6172_v35, %v8008_v53  ;;  %v8260_v35 = vld [vmem:[#allocation8_spill] sm:$0xff] }
 0x6aa   : > { %v4060_v59 = vpop.f32.mrf.mxu1 }
 0x6ab   : > { %4345 = vst [vmem:[%s8016_s29 + $0xb0] sm:$0xff] %v4281_v58  ;;  %v4284_v37 = vadd.f32 %v4066_v13, %v7251_v52  ;;  %v4061_v44 = vadd.f32 %v4060_v59, %v8008_v53 }
 0x6ac   : > { %v6175_v63 = vpop.f32.mrf.mxu1 }
 0x6ad   : > { %4348 = vst [vmem:[%s8016_s29 + $0xc8] sm:$0xff] %v4284_v37  ;;  %v4283_v19 = vadd.f32 %v4061_v44, %v7260_v61  ;;  %v4076_v30 = vadd.f32 %v6175_v63, %v8008_v53  ;;  %v8261_v37 = vld [vmem:[#allocation9_spill] sm:$0xff] }
 0x6ae   : > { %v4070_v49 = vpop.f32.mrf.mxu1 }
 0x6af   : > { %4347 = vst [vmem:[%s8016_s29 + $0xc0] sm:$0xff] %v4283_v19  ;;  %v4286_v29 = vadd.f32 %v4076_v30, %v7271_v15  ;;  %v4071_v2 = vadd.f32 %v4070_v49, %v8008_v53  ;;  %v8262_v30 = vld [vmem:[#allocation10_spill] sm:$0xff] }
 0x6b0   : > { %v6178_v46 = vpop.f32.mrf.mxu1 }
 0x6b1   : > { %4350 = vst [vmem:[%s8016_s29 + $0xd8] sm:$0xff] %v4286_v29  ;;  %v4285_v52 = vadd.f32 %v4071_v2, %v7280_v27  ;;  %v4086_v56 = vadd.f32 %v6178_v46, %v8008_v53  ;;  %v8263_v46 = vld [vmem:[#allocation11_spill] sm:$0xff] }
 0x6b2   : > { %v4080_v41 = vpop.f32.mrf.mxu1 }
 0x6b3   : > { %4349 = vst [vmem:[%s8016_s29 + $0xd0] sm:$0xff] %v4285_v52  ;;  %v4288_v61 = vadd.f32 %v4086_v56, %v7291_v51  ;;  %v4081_v4 = vadd.f32 %v4080_v41, %v8008_v53 }
 0x6b4   : > { %v6181_v1 = vpop.f32.mrf.mxu1 }
 0x6b5   : > { %4352 = vst [vmem:[%s8016_s29 + $0xe8] sm:$0xff] %v4288_v61  ;;  %v4287_v15 = vadd.f32 %v4081_v4, %v7300_v31  ;;  %v4096_v3 = vadd.f32 %v6181_v1, %v8008_v53  ;;  %v8264_v61 = vld [vmem:[#allocation12_spill] sm:$0xff] }
 0x6b6   : > { %v4090_v39 = vpop.f32.mrf.mxu1 }
 0x6b7   : > { %4351 = vst [vmem:[%s8016_s29 + $0xe0] sm:$0xff] %v4287_v15  ;;  %v4290_v27 = vadd.f32 %v4096_v3, %v7311_v17  ;;  %v4091_v6 = vadd.f32 %v4090_v39, %v8008_v53  ;;  %v8265_v3 = vld [vmem:[#allocation13_spill] sm:$0xff] }
 0x6b8   : > { %v6184_v8 = vpop.f32.mrf.mxu1 }
 0x6b9   : > { %4354 = vst [vmem:[%s8016_s29 + $0xf8] sm:$0xff] %v4290_v27  ;;  %v4289_v51 = vadd.f32 %v4091_v6, %v8254_v25  ;;  %v4106_v20 = vadd.f32 %v6184_v8, %v8008_v53  ;;  %v8266_v8 = vld [vmem:[#allocation14_spill] sm:$0xff] }
 0x6ba   : > { %v4100_v48 = vpop.f32.mrf.mxu1 }
 0x6bb   : > { %4353 = vst [vmem:[%s8016_s29 + $0xf0] sm:$0xff] %v4289_v51  ;;  %v4292_v31 = vadd.f32 %v4106_v20, %v8255_v14  ;;  %v4101_v36 = vadd.f32 %v4100_v48, %v8008_v53  ;;  %v8267_v48 = vld [vmem:[#allocation15_spill] sm:$0xff] }
 0x6bc   : > { %v6187_v0 = vpop.f32.mrf.mxu1 }
 0x6bd   : > { %4356 = vst [vmem:[%s8016_s29 + $0x108] sm:$0xff] %v4292_v31  ;;  %v4291_v17 = vadd.f32 %v4101_v36, %v8256_v42  ;;  %v4116_v50 = vadd.f32 %v6187_v0, %v8008_v53  ;;  %v8268_v0 = vld [vmem:[#allocation16_spill] sm:$0xff] }
 0x6be   : > { %v4110_v18 = vpop.f32.mrf.mxu1 }
 0x6bf   : > { %4355 = vst [vmem:[%s8016_s29 + $0x100] sm:$0xff] %v4291_v17  ;;  %v4294_v62 = vadd.f32 %v4116_v50, %v8257_v55  ;;  %v4111_v54 = vadd.f32 %v4110_v18, %v8008_v53  ;;  %v8269_v18 = vld [vmem:[#allocation17_spill] sm:$0xff] }
 0x6c0   : > { %v6190_v23 = vpop.f32.mrf.mxu1 }
 0x6c1   : > { %4358 = vst [vmem:[%s8016_s29 + $0x118] sm:$0xff] %v4294_v62  ;;  %v4293_v38 = vadd.f32 %v4111_v54, %v8258_v11  ;;  %v4126_v22 = vadd.f32 %v6190_v23, %v8008_v53  ;;  %v8270_v23 = vld [vmem:[#allocation18_spill] sm:$0xff] }
 0x6c2   : > { %v4120_v26 = vpop.f32.mrf.mxu1 }
 0x6c3   : > { %4357 = vst [vmem:[%s8016_s29 + $0x110] sm:$0xff] %v4293_v38  ;;  %v4296_v9 = vadd.f32 %v4126_v22, %v8259_v28  ;;  %v4121_v40 = vadd.f32 %v4120_v26, %v8008_v53 }
 0x6c4   : > { %v6193_v45 = vpop.f32.mrf.mxu1 }
 0x6c5   : > { %4360 = vst [vmem:[%s8016_s29 + $0x128] sm:$0xff] %v4296_v9  ;;  %v4295_v58 = vadd.f32 %v4121_v40, %v8260_v35  ;;  %v4136_v13 = vadd.f32 %v6193_v45, %v8008_v53  ;;  %v8271_v40 = vld [vmem:[#allocation19_spill] sm:$0xff] }
 0x6c6   : > { %v4130_v59 = vpop.f32.mrf.mxu1 }
 0x6c7   : > { %4359 = vst [vmem:[%s8016_s29 + $0x120] sm:$0xff] %v4295_v58  ;;  %v4298_v44 = vadd.f32 %v4136_v13, %v8261_v37  ;;  %v4131_v63 = vadd.f32 %v4130_v59, %v8008_v53 }
 0x6c8   : > { %v6196_v19 = vpop.f32.mrf.mxu1 }
 0x6c9   : > { %4362 = vst [vmem:[%s8016_s29 + $0x138] sm:$0xff] %v4298_v44  ;;  %v4297_v49 = vadd.f32 %v4131_v63, %v8262_v30  ;;  %v4146_v29 = vadd.f32 %v6196_v19, %v8008_v53  ;;  %v8272_v44 = vld [vmem:[#allocation20_spill] sm:$0xff] }
 0x6ca   : > { %v4140_v2 = vpop.f32.mrf.mxu1 }
 0x6cb   : > { %4361 = vst [vmem:[%s8016_s29 + $0x130] sm:$0xff] %v4297_v49  ;;  %v4300_v52 = vadd.f32 %v4146_v29, %v8263_v46  ;;  %v4141_v56 = vadd.f32 %v4140_v2, %v8008_v53 }
 0x6cc   : > { %v6199_v41 = vpop.f32.mrf.mxu1 }
 0x6cd   : > { %4364 = vst [vmem:[%s8016_s29 + $0x148] sm:$0xff] %v4300_v52  ;;  %v4299_v4 = vadd.f32 %v4141_v56, %v8264_v61  ;;  %v4156_v1 = vadd.f32 %v6199_v41, %v8008_v53 }
 0x6ce   : > { %v4150_v15 = vpop.f32.mrf.mxu1 }
 0x6cf   : > { %4363 = vst [vmem:[%s8016_s29 + $0x140] sm:$0xff] %v4299_v4  ;;  %v4302_v39 = vadd.f32 %v4156_v1, %v8265_v3  ;;  %v4151_v27 = vadd.f32 %v4150_v15, %v8008_v53 }
 0x6d0   : > { %v6202_v6 = vpop.f32.mrf.mxu1 }
 0x6d1   : > { %4366 = vst [vmem:[%s8016_s29 + $0x158] sm:$0xff] %v4302_v39  ;;  %v4301_v25 = vadd.f32 %v4151_v27, %v8266_v8  ;;  %v4166_v51 = vadd.f32 %v6202_v6, %v8008_v53 }
 0x6d2   : > { %v4160_v20 = vpop.f32.mrf.mxu1 }
 0x6d3   : > { %4365 = vst [vmem:[%s8016_s29 + $0x150] sm:$0xff] %v4301_v25  ;;  %v4304_v14 = vadd.f32 %v4166_v51, %v8267_v48  ;;  %v4161_v31 = vadd.f32 %v4160_v20, %v8008_v53 }
 0x6d4   : > { %v6205_v36 = vpop.f32.mrf.mxu1 }
 0x6d5   : > { %4368 = vst [vmem:[%s8016_s29 + $0x168] sm:$0xff] %v4304_v14  ;;  %v4303_v42 = vadd.f32 %v4161_v31, %v8268_v0  ;;  %v4176_v17 = vadd.f32 %v6205_v36, %v8008_v53 }
 0x6d6   : > { %v4170_v50 = vpop.f32.mrf.mxu1 }
 0x6d7   : > { %4367 = vst [vmem:[%s8016_s29 + $0x160] sm:$0xff] %v4303_v42  ;;  %v4306_v55 = vadd.f32 %v4176_v17, %v8269_v18  ;;  %v4171_v62 = vadd.f32 %v4170_v50, %v8008_v53 }
 0x6d8   : > { %v6208_v54 = vpop.f32.mrf.mxu1 }
 0x6d9   : > { %4370 = vst [vmem:[%s8016_s29 + $0x178] sm:$0xff] %v4306_v55  ;;  %v4305_v11 = vadd.f32 %v4171_v62, %v8270_v23  ;;  %v4186_v38 = vadd.f32 %v6208_v54, %v8008_v53 }
 0x6da   : > { %v4180_v22 = vpop.f32.mrf.mxu1 }
 0x6db   : > { %4369 = vst [vmem:[%s8016_s29 + $0x170] sm:$0xff] %v4305_v11  ;;  %v4308_v26 = vadd.f32 %v4186_v38, %v7491_v34  ;;  %v4181_v28 = vadd.f32 %v4180_v22, %v8008_v53 }
 0x6dc   : > { %v6211_v9 = vpop.f32.mrf.mxu1 }
 0x6dd   : > { %4372 = vst [vmem:[%s8016_s29 + $0x188] sm:$0xff] %v4308_v26  ;;  %v4307_v45 = vadd.f32 %v4181_v28, %v8271_v40  ;;  %v4196_v35 = vadd.f32 %v6211_v9, %v8008_v53 }
 0x6de   : > { %v4190_v58 = vpop.f32.mrf.mxu1 }
 0x6df   : > { %4371 = vst [vmem:[%s8016_s29 + $0x180] sm:$0xff] %v4307_v45  ;;  %v4310_v13 = vadd.f32 %v4196_v35, %v7511_v43  ;;  %v4191_v59 = vadd.f32 %v4190_v58, %v8008_v53 }
 0x6e0   : > { %v6214_v37 = vpop.f32.mrf.mxu1 }
 0x6e1   : > { %4374 = vst [vmem:[%s8016_s29 + $0x198] sm:$0xff] %v4310_v13  ;;  %v4309_v34 = vadd.f32 %v4191_v59, %v8272_v44  ;;  %v4206_v63 = vadd.f32 %v6214_v37, %v8008_v53 }
 0x6e2   : > { %v4200_v19 = vpop.f32.mrf.mxu1 }
 0x6e3   : > { %4373 = vst [vmem:[%s8016_s29 + $0x190] sm:$0xff] %v4309_v34  ;;  %v4312_v30 = vadd.f32 %v4206_v63, %v7531_v33  ;;  %v4201_v49 = vadd.f32 %v4200_v19, %v8008_v53 }
 0x6e4   : > { %v6217_v29 = vpop.f32.mrf.mxu1 }
 0x6e5   : > { %4376 = vst [vmem:[%s8016_s29 + $0x1a8] sm:$0xff] %v4312_v30  ;;  %v4311_v43 = vadd.f32 %v4201_v49, %v7540_v21  ;;  %v4216_v2 = vadd.f32 %v6217_v29, %v8008_v53 }
 0x6e6   : > { %v4210_v46 = vpop.f32.mrf.mxu1 }
 0x6e7   : > { %4375 = vst [vmem:[%s8016_s29 + $0x1a0] sm:$0xff] %v4311_v43  ;;  %v4314_v52 = vadd.f32 %v4216_v2, %v7551_v57  ;;  %v4211_v56 = vadd.f32 %v4210_v46, %v8008_v53 }
 0x6e8   : > { %v6220_v41 = vpop.f32.mrf.mxu1 }
 0x6e9   : > { %4378 = vst [vmem:[%s8016_s29 + $0x1b8] sm:$0xff] %v4314_v52  ;;  %v4313_v33 = vadd.f32 %v4211_v56, %v7560_v10  ;;  %v4226_v61 = vadd.f32 %v6220_v41, %v8008_v53 }
 0x6ea   : > { %v4220_v4 = vpop.f32.mrf.mxu1 }
 0x6eb   : > { %4377 = vst [vmem:[%s8016_s29 + $0x1b0] sm:$0xff] %v4313_v33  ;;  %v4316_v21 = vadd.f32 %v4226_v61, %v7571_v32  ;;  %v4221_v1 = vadd.f32 %v4220_v4, %v8008_v53 }
 0x6ec   : > { %v6223_v15 = vpop.f32.mrf.mxu1 }
 0x6ed   : > { %4380 = vst [vmem:[%s8016_s29 + $0x1c8] sm:$0xff] %v4316_v21  ;;  %v4315_v57 = vadd.f32 %v4221_v1, %v7580_v5  ;;  %v4236_v3 = vadd.f32 %v6223_v15, %v8008_v53 }
 0x6ee   : > { %v4230_v39 = vpop.f32.mrf.mxu1 }
 0x6ef   : > { %4379 = vst [vmem:[%s8016_s29 + $0x1c0] sm:$0xff] %v4315_v57  ;;  %v4318_v10 = vadd.f32 %v4236_v3, %v7591_v12  ;;  %v4231_v27 = vadd.f32 %v4230_v39, %v8008_v53 }
 0x6f0   : > { %v6226_v6 = vpop.f32.mrf.mxu1 }
 0x6f1   : > { %4382 = vst [vmem:[%s8016_s29 + $0x1d8] sm:$0xff] %v4318_v10  ;;  %v4317_v32 = vadd.f32 %v4231_v27, %v7600_v16  ;;  %v4246_v8 = vadd.f32 %v6226_v6, %v8008_v53 }
 0x6f2   : > { %v4240_v25 = vpop.f32.mrf.mxu1 }
 0x6f3   : > { %4381 = vst [vmem:[%s8016_s29 + $0x1d0] sm:$0xff] %v4317_v32  ;;  %v4320_v5 = vadd.f32 %v4246_v8, %v7611_v60  ;;  %v4241_v51 = vadd.f32 %v4240_v25, %v8008_v53 }
 0x6f4   : > { %v6229_v20 = vpop.f32.mrf.mxu1 }
 0x6f5   : > { %4384 = vst [vmem:[%s8016_s29 + $0x1e8] sm:$0xff] %v4320_v5  ;;  %v4319_v12 = vadd.f32 %v4241_v51, %v7620_v24  ;;  %v4256_v48 = vadd.f32 %v6229_v20, %v8008_v53 }
 0x6f6   : > { %v4250_v14 = vpop.f32.mrf.mxu1 }
 0x6f7   : > { %4383 = vst [vmem:[%s8016_s29 + $0x1e0] sm:$0xff] %v4319_v12  ;;  %v4322_v31 = vadd.f32 %v4256_v48, %v7631_v47  ;;  %v4251_v16 = vadd.f32 %v4250_v14, %v8008_v53 }
 0x6f9   : > { %4386 = vst [vmem:[%s8016_s29 + $0x1f8] sm:$0xff] %v4322_v31  ;;  %v4321_v36 = vadd.f32 %v4251_v16, %v7640_v7 }
 0x6fb   : > { %4385 = vst [vmem:[%s8016_s29 + $0x1f0] sm:$0xff] %v4321_v36 }
 0x6fc PF: > { %s13_s12 = sadd.s32 1, %s6439_s12  }
 0x6fd   : > { %p10_p4 = scmp.ge.s32.totalorder %s13_s12, 4  }
 0x6ff   :  { %12 = sbr.rel (!%p10_p4) target bundleno = 1 (0x1), region = 69 }

</bundles_post_ra>
